<compile_context>
chip_gen: v7x
topology: tpu7x:2x2x1
jax: 0.10.0
libtpu: 0.0.40
codegen_flags: <defaults>
</compile_context>

<pallas_src>
import functools

import jax
import jax.numpy as jnp
from jax import lax
from jax.experimental import pallas as pl
from jax.experimental.pallas import tpu as pltpu

BN_EPS = 1e-5                              # PyTorch BatchNorm2d default eps
_VMEM_LIMIT = 40 * 1024 * 1024             # <= ~48 MiB so the same tiling carries to v7x


def _cparams(semantics):
    return pltpu.CompilerParams(dimension_semantics=semantics,
                                vmem_limit_bytes=_VMEM_LIMIT)


def _geom(H, W):
    Wp = W + 2                             # padded row length
    S = (H + 2) * Wp                       # flattened padded image size
    L = (H - 1) * Wp + W                   # contiguous span covering all interior outputs
    s_pad = ((S + 127) // 128) * 128       # lane-aligned flat buffer size
    return Wp, S, L, s_pad


# ----------------------------------------------------------------------------
# Kernels
# ----------------------------------------------------------------------------
def _fused_group_kernel(x_ref, w_ref, mask_ref, conv_ref, sum_ref, sumsq_ref,
                        buf_a, buf_b, slab_ref, *, Wp, L, n_resblocks, precision):
    """All ResBlocks + tail conv for one image; activations stay in VMEM."""
    C, s_pad = buf_a.shape
    cdt = buf_a.dtype                      # compute dtype (bf16 or f32)
    lo, hi = Wp + 1, Wp + 1 + L
    mask = mask_ref[...]                   # (1, L) f32: 1 at interior pixels, 0 at pad cols

    def conv(src_ref, layer):
        # Stack the 9 shifted taps along sublanes -> ONE K=9*C MXU matmul.
        for tap in range(9):
            kh, kw = divmod(tap, 3)
            start = kh * Wp + kw
            slab_ref[tap * C:(tap + 1) * C, :] = (
                src_ref[:, start:start + L].astype(jnp.float32))
        return jnp.dot(w_ref[layer], slab_ref[...].astype(cdt),
                       preferred_element_type=jnp.float32, precision=precision)

    # Activations ping-pong between buf_a / buf_b; the pad ring stays zero
    # because only the masked core span [lo, hi) is ever rewritten.
    buf_a[...] = x_ref[0].astype(cdt)
    buf_b[...] = jnp.zeros_like(buf_b)

    for r in range(n_resblocks):
        t = jnp.maximum(conv(buf_a, 2 * r), 0.0) * mask            # ConvBNReLU2D(act='ReLU')
        buf_b[:, lo:hi] = t.astype(cdt)
        h = conv(buf_b, 2 * r + 1) + buf_a[:, lo:hi].astype(jnp.float32)
        h = jnp.maximum(h, 0.0) * mask                             # relu(conv + skip)
        buf_a[:, lo:hi] = h.astype(cdt)

    # Tail conv (raw, pre-BN) + per-image BN partial statistics in f32.
    core = conv(buf_a, 2 * n_resblocks) * mask
    sum_ref[0] = jnp.sum(core, axis=1, keepdims=True)
    sumsq_ref[0] = jnp.sum(core * core, axis=1, keepdims=True)
    conv_ref[0, :, 0:lo] = jnp.zeros((C, lo), conv_ref.dtype)
    conv_ref[0, :, lo:hi] = core.astype(conv_ref.dtype)
    conv_ref[0, :, hi:s_pad] = jnp.zeros((C, s_pad - hi), conv_ref.dtype)


def _bn_relu_residual_kernel(conv_ref, x0_ref, scale_ref, shift_ref, rescale_ref, out_ref):
    # BN pass 2: folded affine + ReLU + re_scale skip, all f32 epilogue math.
    y = jnp.maximum(conv_ref[0].astype(jnp.float32) * scale_ref[...] + shift_ref[...], 0.0)
    out_ref[0] = (y + rescale_ref[0] * x0_ref[0]).astype(out_ref.dtype)
    # NOTE: pad columns of the output hold relu(shift_c); they are cropped by the wrapper.


# ----------------------------------------------------------------------------
# pallas_call wrappers
# ----------------------------------------------------------------------------
def fused_group_conv(x0, w_all, mask, H, W, n_resblocks):
    N, C, s_pad = x0.shape
    Wp, _, L, _ = _geom(H, W)
    cdt = w_all.dtype
    n_layers = w_all.shape[0]
    itemsize = jnp.dtype(cdt).itemsize
    precision = (lax.Precision.HIGHEST if jnp.dtype(cdt) == jnp.dtype(jnp.float32)
                 else lax.Precision.DEFAULT)
    flops = 2 * N * n_layers * C * (9 * C) * L
    bytes_accessed = int(4 * N * C * s_pad
                         + itemsize * (N * C * s_pad + n_layers * C * 9 * C)
                         + 8 * N * C)
    kern = functools.partial(_fused_group_kernel, Wp=Wp, L=L,
                             n_resblocks=n_resblocks, precision=precision)
    return pl.pallas_call(
        kern,
        out_shape=(jax.ShapeDtypeStruct((N, C, s_pad), cdt),          # raw tail conv
                   jax.ShapeDtypeStruct((N, C, 1), jnp.float32),      # per-image sum
                   jax.ShapeDtypeStruct((N, C, 1), jnp.float32)),     # per-image sum of squares
        grid=(N,),
        in_specs=[
            pl.BlockSpec((1, C, s_pad), lambda n: (n, 0, 0)),
            pl.BlockSpec((n_layers, C, 9 * C), lambda n: (0, 0, 0)),  # all weights resident
            pl.BlockSpec((1, L), lambda n: (0, 0)),
        ],
        out_specs=(
            pl.BlockSpec((1, C, s_pad), lambda n: (n, 0, 0)),
            pl.BlockSpec((1, C, 1), lambda n: (n, 0, 0)),
            pl.BlockSpec((1, C, 1), lambda n: (n, 0, 0)),
        ),
        scratch_shapes=[
            pltpu.VMEM((C, s_pad), cdt),          # activation buffer A
            pltpu.VMEM((C, s_pad), cdt),          # activation buffer B
            pltpu.VMEM((9 * C, L), jnp.float32),  # stacked-tap slab (f32: aligned stores)
        ],
        compiler_params=_cparams(("parallel",)),  # per-image work -> megacore on v7x
        cost_estimate=pl.CostEstimate(flops=flops, transcendentals=0,
                                      bytes_accessed=bytes_accessed),
    )(x0, w_all, mask)


def bn_relu_residual(conv_flat, x0_flat, scale, shift, re_scale):
    N, C, s_pad = conv_flat.shape
    itemsize = jnp.dtype(conv_flat.dtype).itemsize
    return pl.pallas_call(
        _bn_relu_residual_kernel,
        out_shape=jax.ShapeDtypeStruct((N, C, s_pad), jnp.float32),
        grid=(N,),
        in_specs=[
            pl.BlockSpec((1, C, s_pad), lambda n: (n, 0, 0)),
            pl.BlockSpec((1, C, s_pad), lambda n: (n, 0, 0)),
            pl.BlockSpec((C, 1), lambda n: (0, 0)),
            pl.BlockSpec((C, 1), lambda n: (0, 0)),
            pl.BlockSpec(memory_space=pltpu.MemorySpace.SMEM),        # re_scale scalar
        ],
        out_specs=pl.BlockSpec((1, C, s_pad), lambda n: (n, 0, 0)),
        compiler_params=_cparams(("parallel",)),
        cost_estimate=pl.CostEstimate(flops=4 * N * C * s_pad, transcendentals=0,
                                      bytes_accessed=(itemsize + 8) * N * C * s_pad),
    )(conv_flat, x0_flat, scale, shift, re_scale)


# ----------------------------------------------------------------------------
# Layout glue + full ResidualGroup forward
# ----------------------------------------------------------------------------
def _pad_flat(x_nchw, s_pad):
    N, C, H, W = x_nchw.shape
    xp = jnp.pad(x_nchw, ((0, 0), (0, 0), (1, 1), (1, 1)))
    flat = xp.reshape(N, C, (H + 2) * (W + 2))
    return jnp.pad(flat, ((0, 0), (0, 0), (0, s_pad - flat.shape[2])))


def _unpad_flat(y_flat, H, W):
    N, C, _ = y_flat.shape
    Wp = W + 2
    core = y_flat[:, :, :(H + 2) * Wp].reshape(N, C, H + 2, Wp)
    return core[:, :, 1:H + 1, 1:W + 1]


def _interior_mask(H, W):
    """1.0 at real output pixels, 0.0 at the pad columns interleaved in the core span."""
    Wp, _, L, _ = _geom(H, W)
    f = jnp.arange(L, dtype=jnp.int32) + (Wp + 1)
    col = f % Wp
    return ((col >= 1) & (col <= W)).astype(jnp.float32).reshape(1, L)


def _stack_weights(params, C):
    """(Cout, Cin, 3, 3) per layer -> (n_layers, Cout, 9*Cin), K order (kh, kw, cin)."""
    ws = []
    for w1, w2 in params["resblocks"]:
        ws += [w1, w2]
    ws.append(params["w_tail"])
    flat = [jnp.transpose(w, (0, 2, 3, 1)).reshape(C, 9 * C) for w in ws]
    return jnp.stack(flat, axis=0)


def residual_group_forward(x, params, compute_dtype=jnp.bfloat16):
    """ResidualGroup forward: n_resblocks ResBlocks -> Conv+BN+ReLU tail -> + re_scale*x."""
    N, C, H, W = x.shape
    n_resblocks = len(params["resblocks"])
    _, _, _, s_pad = _geom(H, W)

    x0 = _pad_flat(x.astype(jnp.float32), s_pad)            # (N, C, S_pad) f32, pads zero
    mask = _interior_mask(H, W)                              # (1, L) f32
    w_all = _stack_weights(params, C).astype(compute_dtype)

    conv_out, sums, sumsqs = fused_group_conv(x0, w_all, mask, H, W, n_resblocks)

    # Training-mode BatchNorm statistics over the whole batch (biased variance).
    # NOTE: E[x^2]-E[x]^2 in f32 is adequate here; switch to a centered second
    # pass if |mean| >> std in your data regime.
    m = jnp.float32(N * H * W)
    csum = jnp.sum(sums[:, :, 0], axis=0)
    csumsq = jnp.sum(sumsqs[:, :, 0], axis=0)
    mean = csum / m
    var = jnp.maximum(csumsq / m - mean * mean, 0.0)
    inv_std = lax.rsqrt(var + BN_EPS)
    gamma = params["gamma"].astype(jnp.float32)
    beta = params["beta"].astype(jnp.float32)
    scale = (gamma * inv_std).reshape(C, 1)
    shift = (beta - mean * gamma * inv_std).reshape(C, 1)

    out_flat = bn_relu_residual(conv_out, x0, scale, shift,
                                params["re_scale"].astype(jnp.float32))
    return _unpad_flat(out_flat, H, W)


# ----------------------------------------------------------------------------
# Pure-JAX reference (matches the PyTorch module; optional bf16 quantization
# at exactly the points the kernel quantizes, for tight low-precision checks).
# ----------------------------------------------------------------------------
def reference_residual_group(x, params, compute_dtype=jnp.float32):
    q = lambda a: a.astype(compute_dtype).astype(jnp.float32)

    def conv(h, w):
        return lax.conv_general_dilated(
            h, q(w), window_strides=(1, 1), padding=((1, 1), (1, 1)),
            dimension_numbers=("NCHW", "OIHW", "NCHW"),
            precision=lax.Precision.HIGHEST)

    x32 = x.astype(jnp.float32)
    h = q(x32)
    for w1, w2 in params["resblocks"]:
        t = q(jnp.maximum(conv(h, w1), 0.0))
        h = q(jnp.maximum(conv(t, w2) + h, 0.0))
    c = conv(h, params["w_tail"])
    mean = jnp.mean(c, axis=(0, 2, 3), keepdims=True)
    var = jnp.mean(jnp.square(c - mean), axis=(0, 2, 3), keepdims=True)
    y = (q(c) - mean) * lax.rsqrt(var + BN_EPS)
    y = y * params["gamma"].reshape(1, -1, 1, 1) + params["beta"].reshape(1, -1, 1, 1)
    y = jnp.maximum(y, 0.0)
    return y + params["re_scale"][0] * x32


if __name__ == "__main__":
    # ResidualGroup(n_feat=8, kernel_size=3, reduction=<unused>, act='ReLU',
    #               norm='BN', n_resblocks=2), training-mode BN (batch statistics).
    N, C, H, W = 2, 8, 16, 16
    n_resblocks = 2

    key = jax.random.PRNGKey(0)
    keys = jax.random.split(key, 2 * n_resblocks + 4)
    fan_in = C * 3 * 3

    k = 0
    resblocks = []
    for _ in range(n_resblocks):
        w1 = jax.random.normal(keys[k], (C, C, 3, 3), jnp.float32) / jnp.sqrt(fan_in); k += 1
        w2 = jax.random.normal(keys[k], (C, C, 3, 3), jnp.float32) / jnp.sqrt(fan_in); k += 1
        resblocks.append((w1, w2))
    w_tail = jax.random.normal(keys[k], (C, C, 3, 3), jnp.float32) / jnp.sqrt(fan_in); k += 1
    gamma = 1.0 + 0.1 * jax.random.normal(keys[k], (C,), jnp.float32); k += 1
    beta = 0.1 * jax.random.normal(keys[k], (C,), jnp.float32); k += 1
    x = jax.random.normal(keys[k], (N, C, H, W), jnp.float32)
    re_scale = jnp.ones((1,), jnp.float32)                  # Scale(1) init in ResidualGroup

    params = dict(resblocks=resblocks, w_tail=w_tail, gamma=gamma, beta=beta,
                  re_scale=re_scale)

    # 1) f32 verification path (exact semantics, HIGHEST-precision matmuls).
    fwd32 = jax.jit(functools.partial(residual_group_forward, compute_dtype=jnp.float32))
    ref32 = jax.jit(functools.partial(reference_residual_group, compute_dtype=jnp.float32))
    out32 = jax.block_until_ready(fwd32(x, params))
    r32 = jax.block_until_ready(ref32(x, params))
    assert out32.shape == (N, C, H, W), out32.shape
    err32 = float(jnp.max(jnp.abs(out32 - r32)))
    assert jnp.allclose(out32, r32, atol=1e-3, rtol=1e-3), err32

    # 2) bf16 production path (bf16 activations/weights, f32 accumulation),
    #    checked against a reference that quantizes at the same points.
    fwd16 = jax.jit(functools.partial(residual_group_forward, compute_dtype=jnp.bfloat16))
    ref16 = jax.jit(functools.partial(reference_residual_group, compute_dtype=jnp.bfloat16))
    out16 = jax.block_until_ready(fwd16(x, params))
    r16 = jax.block_until_ready(ref16(x, params))
    assert out16.shape == (N, C, H, W), out16.shape
    assert bool(jnp.all(jnp.isfinite(out16)))
    err16 = float(jnp.max(jnp.abs(out16 - r16)))
    assert jnp.allclose(out16, r16, atol=4e-2, rtol=4e-2), err16

    print("KERNEL_OK")
</pallas_src>

<mosaic_0001>
module attributes {stable_mosaic.version = 11 : i64} {
  func.func @_fused_group_kernel(%arg0: i32, %arg1: memref<1x8x384xf32, #tpu.memory_space<vmem>>, %arg2: memref<5x8x72xf32, #tpu.memory_space<vmem>>, %arg3: memref<1x286xf32, #tpu.memory_space<vmem>>, %arg4: memref<1x8x384xf32, #tpu.memory_space<vmem>>, %arg5: memref<1x8x1xf32, #tpu.memory_space<vmem>>, %arg6: memref<1x8x1xf32, #tpu.memory_space<vmem>>, %arg7: memref<8x384xf32, #tpu.memory_space<vmem>>, %arg8: memref<8x384xf32, #tpu.memory_space<vmem>>, %arg9: memref<72x286xf32, #tpu.memory_space<vmem>>) attributes {dimension_semantics = [#tpu.dimension_semantics<parallel>], iteration_bounds = array<i64: 2>, scalar_prefetch = 0 : i64, scratch_operands = 3 : i64, tpu.core_type = #tpu.core_type<tc>, window_params = [{transform_indices = @transform_0, window_bounds = array<i64: 1, 8, 384>}, {pipeline_mode = #tpu.pipeline_mode<synchronous>, transform_indices = @transform_1, window_bounds = array<i64: 5, 8, 72>}, {pipeline_mode = #tpu.pipeline_mode<synchronous>, transform_indices = @transform_2, window_bounds = array<i64: 1, 286>}, {transform_indices = @transform_3, window_bounds = array<i64: 1, 8, 384>}, {transform_indices = @transform_4, window_bounds = array<i64: 1, 8, 1>}, {transform_indices = @transform_5, window_bounds = array<i64: 1, 8, 1>}]} {
    %c0 = arith.constant 0 : index
    %c0_0 = arith.constant 0 : index
    %0 = vector.load %arg3[%c0, %c0_0] : memref<1x286xf32, #tpu.memory_space<vmem>>, vector<1x286xf32>
    %c0_1 = arith.constant 0 : index
    %c0_2 = arith.constant 0 : index
    %c0_3 = arith.constant 0 : index
    %1 = vector.load %arg1[%c0_1, %c0_2, %c0_3] : memref<1x8x384xf32, #tpu.memory_space<vmem>>, vector<1x8x384xf32>
    %2 = vector.shape_cast %1 : vector<1x8x384xf32> to vector<8x384xf32>
    %c0_4 = arith.constant 0 : index
    %c0_5 = arith.constant 0 : index
    %3 = vector.load %arg7[%c0_4, %c0_5] : memref<8x384xf32, #tpu.memory_space<vmem>>, vector<8x384xf32>
    tpu.vector_store %arg7[%c0_4, %c0_5], %2 {strides = array<i32>} : memref<8x384xf32, #tpu.memory_space<vmem>>, vector<8x384xf32>,
    %cst = arith.constant 0.000000e+00 : f32
    %4 = vector.broadcast %cst : f32 to vector<8x384xf32>
    %c0_6 = arith.constant 0 : index
    %c0_7 = arith.constant 0 : index
    %5 = vector.load %arg8[%c0_6, %c0_7] : memref<8x384xf32, #tpu.memory_space<vmem>>, vector<8x384xf32>
    tpu.vector_store %arg8[%c0_6, %c0_7], %4 {strides = array<i32>} : memref<8x384xf32, #tpu.memory_space<vmem>>, vector<8x384xf32>,
    %c0_8 = arith.constant 0 : index
    %c0_9 = arith.constant 0 : index
    %6 = vector.load %arg7[%c0_8, %c0_9] : memref<8x384xf32, #tpu.memory_space<vmem>>, vector<8x286xf32>
    %c0_10 = arith.constant 0 : index
    %c0_11 = arith.constant 0 : index
    %7 = vector.load %arg9[%c0_10, %c0_11] : memref<72x286xf32, #tpu.memory_space<vmem>>, vector<8x286xf32>
    tpu.vector_store %arg9[%c0_10, %c0_11], %6 {strides = array<i32>} : memref<72x286xf32, #tpu.memory_space<vmem>>, vector<8x286xf32>,
    %c0_12 = arith.constant 0 : index
    %c1 = arith.constant 1 : index
    %8 = vector.load %arg7[%c0_12, %c1] : memref<8x384xf32, #tpu.memory_space<vmem>>, vector<8x286xf32>
    %c8 = arith.constant 8 : index
    %c0_13 = arith.constant 0 : index
    %9 = vector.load %arg9[%c8, %c0_13] : memref<72x286xf32, #tpu.memory_space<vmem>>, vector<8x286xf32>
    tpu.vector_store %arg9[%c8, %c0_13], %8 {strides = array<i32>} : memref<72x286xf32, #tpu.memory_space<vmem>>, vector<8x286xf32>,
    %c0_14 = arith.constant 0 : index
    %c2 = arith.constant 2 : index
    %10 = vector.load %arg7[%c0_14, %c2] : memref<8x384xf32, #tpu.memory_space<vmem>>, vector<8x286xf32>
    %c16 = arith.constant 16 : index
    %c0_15 = arith.constant 0 : index
    %11 = vector.load %arg9[%c16, %c0_15] : memref<72x286xf32, #tpu.memory_space<vmem>>, vector<8x286xf32>
    tpu.vector_store %arg9[%c16, %c0_15], %10 {strides = array<i32>} : memref<72x286xf32, #tpu.memory_space<vmem>>, vector<8x286xf32>,
    %c0_16 = arith.constant 0 : index
    %c18 = arith.constant 18 : index
    %12 = vector.load %arg7[%c0_16, %c18] : memref<8x384xf32, #tpu.memory_space<vmem>>, vector<8x286xf32>
    %c24 = arith.constant 24 : index
    %c0_17 = arith.constant 0 : index
    %13 = vector.load %arg9[%c24, %c0_17] : memref<72x286xf32, #tpu.memory_space<vmem>>, vector<8x286xf32>
    tpu.vector_store %arg9[%c24, %c0_17], %12 {strides = array<i32>} : memref<72x286xf32, #tpu.memory_space<vmem>>, vector<8x286xf32>,
    %c0_18 = arith.constant 0 : index
    %c19 = arith.constant 19 : index
    %14 = vector.load %arg7[%c0_18, %c19] : memref<8x384xf32, #tpu.memory_space<vmem>>, vector<8x286xf32>
    %c32 = arith.constant 32 : index
    %c0_19 = arith.constant 0 : index
    %15 = vector.load %arg9[%c32, %c0_19] : memref<72x286xf32, #tpu.memory_space<vmem>>, vector<8x286xf32>
    tpu.vector_store %arg9[%c32, %c0_19], %14 {strides = array<i32>} : memref<72x286xf32, #tpu.memory_space<vmem>>, vector<8x286xf32>,
    %c0_20 = arith.constant 0 : index
    %c20 = arith.constant 20 : index
    %16 = vector.load %arg7[%c0_20, %c20] : memref<8x384xf32, #tpu.memory_space<vmem>>, vector<8x286xf32>
    %c40 = arith.constant 40 : index
    %c0_21 = arith.constant 0 : index
    %17 = vector.load %arg9[%c40, %c0_21] : memref<72x286xf32, #tpu.memory_space<vmem>>, vector<8x286xf32>
    tpu.vector_store %arg9[%c40, %c0_21], %16 {strides = array<i32>} : memref<72x286xf32, #tpu.memory_space<vmem>>, vector<8x286xf32>,
    %c0_22 = arith.constant 0 : index
    %c36 = arith.constant 36 : index
    %18 = vector.load %arg7[%c0_22, %c36] : memref<8x384xf32, #tpu.memory_space<vmem>>, vector<8x286xf32>
    %c48 = arith.constant 48 : index
    %c0_23 = arith.constant 0 : index
    %19 = vector.load %arg9[%c48, %c0_23] : memref<72x286xf32, #tpu.memory_space<vmem>>, vector<8x286xf32>
    tpu.vector_store %arg9[%c48, %c0_23], %18 {strides = array<i32>} : memref<72x286xf32, #tpu.memory_space<vmem>>, vector<8x286xf32>,
    %c0_24 = arith.constant 0 : index
    %c37 = arith.constant 37 : index
    %20 = vector.load %arg7[%c0_24, %c37] : memref<8x384xf32, #tpu.memory_space<vmem>>, vector<8x286xf32>
    %c56 = arith.constant 56 : index
    %c0_25 = arith.constant 0 : index
    %21 = vector.load %arg9[%c56, %c0_25] : memref<72x286xf32, #tpu.memory_space<vmem>>, vector<8x286xf32>
    tpu.vector_store %arg9[%c56, %c0_25], %20 {strides = array<i32>} : memref<72x286xf32, #tpu.memory_space<vmem>>, vector<8x286xf32>,
    %c0_26 = arith.constant 0 : index
    %c38 = arith.constant 38 : index
    %22 = vector.load %arg7[%c0_26, %c38] : memref<8x384xf32, #tpu.memory_space<vmem>>, vector<8x286xf32>
    %c64 = arith.constant 64 : index
    %c0_27 = arith.constant 0 : index
    %23 = vector.load %arg9[%c64, %c0_27] : memref<72x286xf32, #tpu.memory_space<vmem>>, vector<8x286xf32>
    tpu.vector_store %arg9[%c64, %c0_27], %22 {strides = array<i32>} : memref<72x286xf32, #tpu.memory_space<vmem>>, vector<8x286xf32>,
    %c0_28 = arith.constant 0 : index
    %c0_29 = arith.constant 0 : index
    %c0_30 = arith.constant 0 : index
    %24 = vector.load %arg2[%c0_28, %c0_29, %c0_30] : memref<5x8x72xf32, #tpu.memory_space<vmem>>, vector<1x8x72xf32>
    %25 = vector.shape_cast %24 : vector<1x8x72xf32> to vector<8x72xf32>
    %c0_31 = arith.constant 0 : index
    %c0_32 = arith.constant 0 : index
    %26 = vector.load %arg9[%c0_31, %c0_32] : memref<72x286xf32, #tpu.memory_space<vmem>>, vector<72x286xf32>
    %cst_33 = arith.constant dense<0.000000e+00> : vector<8x286xf32>
    %27 = tpu.matmul %25, %26, %cst_33 {dimension_numbers = #tpu.dot_dimension_numbers<[1], [0], [0], [1], [0, 0, 1, 1], [], []>, precision = #tpu.contract_precision<fp32>} : vector<8x72xf32>, vector<72x286xf32>, vector<8x286xf32> -> vector<8x286xf32>
    %cst_34 = arith.constant 0.000000e+00 : f32
    %28 = vector.broadcast %cst_34 : f32 to vector<8x286xf32>
    %29 = arith.maximumf %27, %28 : vector<8x286xf32>
    %30 = vector.broadcast %0 : vector<1x286xf32> to vector<8x286xf32>
    %31 = arith.mulf %29, %30 : vector<8x286xf32>
    %c0_35 = arith.constant 0 : index
    %c19_36 = arith.constant 19 : index
    %32 = vector.load %arg8[%c0_35, %c19_36] : memref<8x384xf32, #tpu.memory_space<vmem>>, vector<8x286xf32>
    tpu.vector_store %arg8[%c0_35, %c19_36], %31 {strides = array<i32>} : memref<8x384xf32, #tpu.memory_space<vmem>>, vector<8x286xf32>,
    %c0_37 = arith.constant 0 : index
    %c0_38 = arith.constant 0 : index
    %33 = vector.load %arg8[%c0_37, %c0_38] : memref<8x384xf32, #tpu.memory_space<vmem>>, vector<8x286xf32>
    %c0_39 = arith.constant 0 : index
    %c0_40 = arith.constant 0 : index
    %34 = vector.load %arg9[%c0_39, %c0_40] : memref<72x286xf32, #tpu.memory_space<vmem>>, vector<8x286xf32>
    tpu.vector_store %arg9[%c0_39, %c0_40], %33 {strides = array<i32>} : memref<72x286xf32, #tpu.memory_space<vmem>>, vector<8x286xf32>,
    %c0_41 = arith.constant 0 : index
    %c1_42 = arith.constant 1 : index
    %35 = vector.load %arg8[%c0_41, %c1_42] : memref<8x384xf32, #tpu.memory_space<vmem>>, vector<8x286xf32>
    %c8_43 = arith.constant 8 : index
    %c0_44 = arith.constant 0 : index
    %36 = vector.load %arg9[%c8_43, %c0_44] : memref<72x286xf32, #tpu.memory_space<vmem>>, vector<8x286xf32>
    tpu.vector_store %arg9[%c8_43, %c0_44], %35 {strides = array<i32>} : memref<72x286xf32, #tpu.memory_space<vmem>>, vector<8x286xf32>,
    %c0_45 = arith.constant 0 : index
    %c2_46 = arith.constant 2 : index
    %37 = vector.load %arg8[%c0_45, %c2_46] : memref<8x384xf32, #tpu.memory_space<vmem>>, vector<8x286xf32>
    %c16_47 = arith.constant 16 : index
    %c0_48 = arith.constant 0 : index
    %38 = vector.load %arg9[%c16_47, %c0_48] : memref<72x286xf32, #tpu.memory_space<vmem>>, vector<8x286xf32>
    tpu.vector_store %arg9[%c16_47, %c0_48], %37 {strides = array<i32>} : memref<72x286xf32, #tpu.memory_space<vmem>>, vector<8x286xf32>,
    %c0_49 = arith.constant 0 : index
    %c18_50 = arith.constant 18 : index
    %39 = vector.load %arg8[%c0_49, %c18_50] : memref<8x384xf32, #tpu.memory_space<vmem>>, vector<8x286xf32>
    %c24_51 = arith.constant 24 : index
    %c0_52 = arith.constant 0 : index
    %40 = vector.load %arg9[%c24_51, %c0_52] : memref<72x286xf32, #tpu.memory_space<vmem>>, vector<8x286xf32>
    tpu.vector_store %arg9[%c24_51, %c0_52], %39 {strides = array<i32>} : memref<72x286xf32, #tpu.memory_space<vmem>>, vector<8x286xf32>,
    %c0_53 = arith.constant 0 : index
    %c19_54 = arith.constant 19 : index
    %41 = vector.load %arg8[%c0_53, %c19_54] : memref<8x384xf32, #tpu.memory_space<vmem>>, vector<8x286xf32>
    %c32_55 = arith.constant 32 : index
    %c0_56 = arith.constant 0 : index
    %42 = vector.load %arg9[%c32_55, %c0_56] : memref<72x286xf32, #tpu.memory_space<vmem>>, vector<8x286xf32>
    tpu.vector_store %arg9[%c32_55, %c0_56], %41 {strides = array<i32>} : memref<72x286xf32, #tpu.memory_space<vmem>>, vector<8x286xf32>,
    %c0_57 = arith.constant 0 : index
    %c20_58 = arith.constant 20 : index
    %43 = vector.load %arg8[%c0_57, %c20_58] : memref<8x384xf32, #tpu.memory_space<vmem>>, vector<8x286xf32>
    %c40_59 = arith.constant 40 : index
    %c0_60 = arith.constant 0 : index
    %44 = vector.load %arg9[%c40_59, %c0_60] : memref<72x286xf32, #tpu.memory_space<vmem>>, vector<8x286xf32>
    tpu.vector_store %arg9[%c40_59, %c0_60], %43 {strides = array<i32>} : memref<72x286xf32, #tpu.memory_space<vmem>>, vector<8x286xf32>,
    %c0_61 = arith.constant 0 : index
    %c36_62 = arith.constant 36 : index
    %45 = vector.load %arg8[%c0_61, %c36_62] : memref<8x384xf32, #tpu.memory_space<vmem>>, vector<8x286xf32>
    %c48_63 = arith.constant 48 : index
    %c0_64 = arith.constant 0 : index
    %46 = vector.load %arg9[%c48_63, %c0_64] : memref<72x286xf32, #tpu.memory_space<vmem>>, vector<8x286xf32>
    tpu.vector_store %arg9[%c48_63, %c0_64], %45 {strides = array<i32>} : memref<72x286xf32, #tpu.memory_space<vmem>>, vector<8x286xf32>,
    %c0_65 = arith.constant 0 : index
    %c37_66 = arith.constant 37 : index
    %47 = vector.load %arg8[%c0_65, %c37_66] : memref<8x384xf32, #tpu.memory_space<vmem>>, vector<8x286xf32>
    %c56_67 = arith.constant 56 : index
    %c0_68 = arith.constant 0 : index
    %48 = vector.load %arg9[%c56_67, %c0_68] : memref<72x286xf32, #tpu.memory_space<vmem>>, vector<8x286xf32>
    tpu.vector_store %arg9[%c56_67, %c0_68], %47 {strides = array<i32>} : memref<72x286xf32, #tpu.memory_space<vmem>>, vector<8x286xf32>,
    %c0_69 = arith.constant 0 : index
    %c38_70 = arith.constant 38 : index
    %49 = vector.load %arg8[%c0_69, %c38_70] : memref<8x384xf32, #tpu.memory_space<vmem>>, vector<8x286xf32>
    %c64_71 = arith.constant 64 : index
    %c0_72 = arith.constant 0 : index
    %50 = vector.load %arg9[%c64_71, %c0_72] : memref<72x286xf32, #tpu.memory_space<vmem>>, vector<8x286xf32>
    tpu.vector_store %arg9[%c64_71, %c0_72], %49 {strides = array<i32>} : memref<72x286xf32, #tpu.memory_space<vmem>>, vector<8x286xf32>,
    %c1_73 = arith.constant 1 : index
    %c0_74 = arith.constant 0 : index
    %c0_75 = arith.constant 0 : index
    %51 = vector.load %arg2[%c1_73, %c0_74, %c0_75] : memref<5x8x72xf32, #tpu.memory_space<vmem>>, vector<1x8x72xf32>
    %52 = vector.shape_cast %51 : vector<1x8x72xf32> to vector<8x72xf32>
    %c0_76 = arith.constant 0 : index
    %c0_77 = arith.constant 0 : index
    %53 = vector.load %arg9[%c0_76, %c0_77] : memref<72x286xf32, #tpu.memory_space<vmem>>, vector<72x286xf32>
    %cst_78 = arith.constant dense<0.000000e+00> : vector<8x286xf32>
    %54 = tpu.matmul %52, %53, %cst_78 {dimension_numbers = #tpu.dot_dimension_numbers<[1], [0], [0], [1], [0, 0, 1, 1], [], []>, precision = #tpu.contract_precision<fp32>} : vector<8x72xf32>, vector<72x286xf32>, vector<8x286xf32> -> vector<8x286xf32>
    %c0_79 = arith.constant 0 : index
    %c19_80 = arith.constant 19 : index
    %55 = vector.load %arg7[%c0_79, %c19_80] : memref<8x384xf32, #tpu.memory_space<vmem>>, vector<8x286xf32>
    %56 = arith.addf %54, %55 : vector<8x286xf32>
    %cst_81 = arith.constant 0.000000e+00 : f32
    %57 = vector.broadcast %cst_81 : f32 to vector<8x286xf32>
    %58 = arith.maximumf %56, %57 : vector<8x286xf32>
    %59 = vector.broadcast %0 : vector<1x286xf32> to vector<8x286xf32>
    %60 = arith.mulf %58, %59 : vector<8x286xf32>
    %c0_82 = arith.constant 0 : index
    %c19_83 = arith.constant 19 : index
    %61 = vector.load %arg7[%c0_82, %c19_83] : memref<8x384xf32, #tpu.memory_space<vmem>>, vector<8x286xf32>
    tpu.vector_store %arg7[%c0_82, %c19_83], %60 {strides = array<i32>} : memref<8x384xf32, #tpu.memory_space<vmem>>, vector<8x286xf32>,
    %c0_84 = arith.constant 0 : index
    %c0_85 = arith.constant 0 : index
    %62 = vector.load %arg7[%c0_84, %c0_85] : memref<8x384xf32, #tpu.memory_space<vmem>>, vector<8x286xf32>
    %c0_86 = arith.constant 0 : index
    %c0_87 = arith.constant 0 : index
    %63 = vector.load %arg9[%c0_86, %c0_87] : memref<72x286xf32, #tpu.memory_space<vmem>>, vector<8x286xf32>
    tpu.vector_store %arg9[%c0_86, %c0_87], %62 {strides = array<i32>} : memref<72x286xf32, #tpu.memory_space<vmem>>, vector<8x286xf32>,
    %c0_88 = arith.constant 0 : index
    %c1_89 = arith.constant 1 : index
    %64 = vector.load %arg7[%c0_88, %c1_89] : memref<8x384xf32, #tpu.memory_space<vmem>>, vector<8x286xf32>
    %c8_90 = arith.constant 8 : index
    %c0_91 = arith.constant 0 : index
    %65 = vector.load %arg9[%c8_90, %c0_91] : memref<72x286xf32, #tpu.memory_space<vmem>>, vector<8x286xf32>
    tpu.vector_store %arg9[%c8_90, %c0_91], %64 {strides = array<i32>} : memref<72x286xf32, #tpu.memory_space<vmem>>, vector<8x286xf32>,
    %c0_92 = arith.constant 0 : index
    %c2_93 = arith.constant 2 : index
    %66 = vector.load %arg7[%c0_92, %c2_93] : memref<8x384xf32, #tpu.memory_space<vmem>>, vector<8x286xf32>
    %c16_94 = arith.constant 16 : index
    %c0_95 = arith.constant 0 : index
    %67 = vector.load %arg9[%c16_94, %c0_95] : memref<72x286xf32, #tpu.memory_space<vmem>>, vector<8x286xf32>
    tpu.vector_store %arg9[%c16_94, %c0_95], %66 {strides = array<i32>} : memref<72x286xf32, #tpu.memory_space<vmem>>, vector<8x286xf32>,
    %c0_96 = arith.constant 0 : index
    %c18_97 = arith.constant 18 : index
    %68 = vector.load %arg7[%c0_96, %c18_97] : memref<8x384xf32, #tpu.memory_space<vmem>>, vector<8x286xf32>
    %c24_98 = arith.constant 24 : index
    %c0_99 = arith.constant 0 : index
    %69 = vector.load %arg9[%c24_98, %c0_99] : memref<72x286xf32, #tpu.memory_space<vmem>>, vector<8x286xf32>
    tpu.vector_store %arg9[%c24_98, %c0_99], %68 {strides = array<i32>} : memref<72x286xf32, #tpu.memory_space<vmem>>, vector<8x286xf32>,
    %c0_100 = arith.constant 0 : index
    %c19_101 = arith.constant 19 : index
    %70 = vector.load %arg7[%c0_100, %c19_101] : memref<8x384xf32, #tpu.memory_space<vmem>>, vector<8x286xf32>
    %c32_102 = arith.constant 32 : index
    %c0_103 = arith.constant 0 : index
    %71 = vector.load %arg9[%c32_102, %c0_103] : memref<72x286xf32, #tpu.memory_space<vmem>>, vector<8x286xf32>
    tpu.vector_store %arg9[%c32_102, %c0_103], %70 {strides = array<i32>} : memref<72x286xf32, #tpu.memory_space<vmem>>, vector<8x286xf32>,
    %c0_104 = arith.constant 0 : index
    %c20_105 = arith.constant 20 : index
    %72 = vector.load %arg7[%c0_104, %c20_105] : memref<8x384xf32, #tpu.memory_space<vmem>>, vector<8x286xf32>
    %c40_106 = arith.constant 40 : index
    %c0_107 = arith.constant 0 : index
    %73 = vector.load %arg9[%c40_106, %c0_107] : memref<72x286xf32, #tpu.memory_space<vmem>>, vector<8x286xf32>
    tpu.vector_store %arg9[%c40_106, %c0_107], %72 {strides = array<i32>} : memref<72x286xf32, #tpu.memory_space<vmem>>, vector<8x286xf32>,
    %c0_108 = arith.constant 0 : index
    %c36_109 = arith.constant 36 : index
    %74 = vector.load %arg7[%c0_108, %c36_109] : memref<8x384xf32, #tpu.memory_space<vmem>>, vector<8x286xf32>
    %c48_110 = arith.constant 48 : index
    %c0_111 = arith.constant 0 : index
    %75 = vector.load %arg9[%c48_110, %c0_111] : memref<72x286xf32, #tpu.memory_space<vmem>>, vector<8x286xf32>
    tpu.vector_store %arg9[%c48_110, %c0_111], %74 {strides = array<i32>} : memref<72x286xf32, #tpu.memory_space<vmem>>, vector<8x286xf32>,
    %c0_112 = arith.constant 0 : index
    %c37_113 = arith.constant 37 : index
    %76 = vector.load %arg7[%c0_112, %c37_113] : memref<8x384xf32, #tpu.memory_space<vmem>>, vector<8x286xf32>
    %c56_114 = arith.constant 56 : index
    %c0_115 = arith.constant 0 : index
    %77 = vector.load %arg9[%c56_114, %c0_115] : memref<72x286xf32, #tpu.memory_space<vmem>>, vector<8x286xf32>
    tpu.vector_store %arg9[%c56_114, %c0_115], %76 {strides = array<i32>} : memref<72x286xf32, #tpu.memory_space<vmem>>, vector<8x286xf32>,
    %c0_116 = arith.constant 0 : index
    %c38_117 = arith.constant 38 : index
    %78 = vector.load %arg7[%c0_116, %c38_117] : memref<8x384xf32, #tpu.memory_space<vmem>>, vector<8x286xf32>
    %c64_118 = arith.constant 64 : index
    %c0_119 = arith.constant 0 : index
    %79 = vector.load %arg9[%c64_118, %c0_119] : memref<72x286xf32, #tpu.memory_space<vmem>>, vector<8x286xf32>
    tpu.vector_store %arg9[%c64_118, %c0_119], %78 {strides = array<i32>} : memref<72x286xf32, #tpu.memory_space<vmem>>, vector<8x286xf32>,
    %c2_120 = arith.constant 2 : index
    %c0_121 = arith.constant 0 : index
    %c0_122 = arith.constant 0 : index
    %80 = vector.load %arg2[%c2_120, %c0_121, %c0_122] : memref<5x8x72xf32, #tpu.memory_space<vmem>>, vector<1x8x72xf32>
    %81 = vector.shape_cast %80 : vector<1x8x72xf32> to vector<8x72xf32>
    %c0_123 = arith.constant 0 : index
    %c0_124 = arith.constant 0 : index
    %82 = vector.load %arg9[%c0_123, %c0_124] : memref<72x286xf32, #tpu.memory_space<vmem>>, vector<72x286xf32>
    %cst_125 = arith.constant dense<0.000000e+00> : vector<8x286xf32>
    %83 = tpu.matmul %81, %82, %cst_125 {dimension_numbers = #tpu.dot_dimension_numbers<[1], [0], [0], [1], [0, 0, 1, 1], [], []>, precision = #tpu.contract_precision<fp32>} : vector<8x72xf32>, vector<72x286xf32>, vector<8x286xf32> -> vector<8x286xf32>
    %cst_126 = arith.constant 0.000000e+00 : f32
    %84 = vector.broadcast %cst_126 : f32 to vector<8x286xf32>
    %85 = arith.maximumf %83, %84 : vector<8x286xf32>
    %86 = vector.broadcast %0 : vector<1x286xf32> to vector<8x286xf32>
    %87 = arith.mulf %85, %86 : vector<8x286xf32>
    %c0_127 = arith.constant 0 : index
    %c19_128 = arith.constant 19 : index
    %88 = vector.load %arg8[%c0_127, %c19_128] : memref<8x384xf32, #tpu.memory_space<vmem>>, vector<8x286xf32>
    tpu.vector_store %arg8[%c0_127, %c19_128], %87 {strides = array<i32>} : memref<8x384xf32, #tpu.memory_space<vmem>>, vector<8x286xf32>,
    %c0_129 = arith.constant 0 : index
    %c0_130 = arith.constant 0 : index
    %89 = vector.load %arg8[%c0_129, %c0_130] : memref<8x384xf32, #tpu.memory_space<vmem>>, vector<8x286xf32>
    %c0_131 = arith.constant 0 : index
    %c0_132 = arith.constant 0 : index
    %90 = vector.load %arg9[%c0_131, %c0_132] : memref<72x286xf32, #tpu.memory_space<vmem>>, vector<8x286xf32>
    tpu.vector_store %arg9[%c0_131, %c0_132], %89 {strides = array<i32>} : memref<72x286xf32, #tpu.memory_space<vmem>>, vector<8x286xf32>,
    %c0_133 = arith.constant 0 : index
    %c1_134 = arith.constant 1 : index
    %91 = vector.load %arg8[%c0_133, %c1_134] : memref<8x384xf32, #tpu.memory_space<vmem>>, vector<8x286xf32>
    %c8_135 = arith.constant 8 : index
    %c0_136 = arith.constant 0 : index
    %92 = vector.load %arg9[%c8_135, %c0_136] : memref<72x286xf32, #tpu.memory_space<vmem>>, vector<8x286xf32>
    tpu.vector_store %arg9[%c8_135, %c0_136], %91 {strides = array<i32>} : memref<72x286xf32, #tpu.memory_space<vmem>>, vector<8x286xf32>,
    %c0_137 = arith.constant 0 : index
    %c2_138 = arith.constant 2 : index
    %93 = vector.load %arg8[%c0_137, %c2_138] : memref<8x384xf32, #tpu.memory_space<vmem>>, vector<8x286xf32>
    %c16_139 = arith.constant 16 : index
    %c0_140 = arith.constant 0 : index
    %94 = vector.load %arg9[%c16_139, %c0_140] : memref<72x286xf32, #tpu.memory_space<vmem>>, vector<8x286xf32>
    tpu.vector_store %arg9[%c16_139, %c0_140], %93 {strides = array<i32>} : memref<72x286xf32, #tpu.memory_space<vmem>>, vector<8x286xf32>,
    %c0_141 = arith.constant 0 : index
    %c18_142 = arith.constant 18 : index
    %95 = vector.load %arg8[%c0_141, %c18_142] : memref<8x384xf32, #tpu.memory_space<vmem>>, vector<8x286xf32>
    %c24_143 = arith.constant 24 : index
    %c0_144 = arith.constant 0 : index
    %96 = vector.load %arg9[%c24_143, %c0_144] : memref<72x286xf32, #tpu.memory_space<vmem>>, vector<8x286xf32>
    tpu.vector_store %arg9[%c24_143, %c0_144], %95 {strides = array<i32>} : memref<72x286xf32, #tpu.memory_space<vmem>>, vector<8x286xf32>,
    %c0_145 = arith.constant 0 : index
    %c19_146 = arith.constant 19 : index
    %97 = vector.load %arg8[%c0_145, %c19_146] : memref<8x384xf32, #tpu.memory_space<vmem>>, vector<8x286xf32>
    %c32_147 = arith.constant 32 : index
    %c0_148 = arith.constant 0 : index
    %98 = vector.load %arg9[%c32_147, %c0_148] : memref<72x286xf32, #tpu.memory_space<vmem>>, vector<8x286xf32>
    tpu.vector_store %arg9[%c32_147, %c0_148], %97 {strides = array<i32>} : memref<72x286xf32, #tpu.memory_space<vmem>>, vector<8x286xf32>,
    %c0_149 = arith.constant 0 : index
    %c20_150 = arith.constant 20 : index
    %99 = vector.load %arg8[%c0_149, %c20_150] : memref<8x384xf32, #tpu.memory_space<vmem>>, vector<8x286xf32>
    %c40_151 = arith.constant 40 : index
    %c0_152 = arith.constant 0 : index
    %100 = vector.load %arg9[%c40_151, %c0_152] : memref<72x286xf32, #tpu.memory_space<vmem>>, vector<8x286xf32>
    tpu.vector_store %arg9[%c40_151, %c0_152], %99 {strides = array<i32>} : memref<72x286xf32, #tpu.memory_space<vmem>>, vector<8x286xf32>,
    %c0_153 = arith.constant 0 : index
    %c36_154 = arith.constant 36 : index
    %101 = vector.load %arg8[%c0_153, %c36_154] : memref<8x384xf32, #tpu.memory_space<vmem>>, vector<8x286xf32>
    %c48_155 = arith.constant 48 : index
    %c0_156 = arith.constant 0 : index
    %102 = vector.load %arg9[%c48_155, %c0_156] : memref<72x286xf32, #tpu.memory_space<vmem>>, vector<8x286xf32>
    tpu.vector_store %arg9[%c48_155, %c0_156], %101 {strides = array<i32>} : memref<72x286xf32, #tpu.memory_space<vmem>>, vector<8x286xf32>,
    %c0_157 = arith.constant 0 : index
    %c37_158 = arith.constant 37 : index
    %103 = vector.load %arg8[%c0_157, %c37_158] : memref<8x384xf32, #tpu.memory_space<vmem>>, vector<8x286xf32>
    %c56_159 = arith.constant 56 : index
    %c0_160 = arith.constant 0 : index
    %104 = vector.load %arg9[%c56_159, %c0_160] : memref<72x286xf32, #tpu.memory_space<vmem>>, vector<8x286xf32>
    tpu.vector_store %arg9[%c56_159, %c0_160], %103 {strides = array<i32>} : memref<72x286xf32, #tpu.memory_space<vmem>>, vector<8x286xf32>,
    %c0_161 = arith.constant 0 : index
    %c38_162 = arith.constant 38 : index
    %105 = vector.load %arg8[%c0_161, %c38_162] : memref<8x384xf32, #tpu.memory_space<vmem>>, vector<8x286xf32>
    %c64_163 = arith.constant 64 : index
    %c0_164 = arith.constant 0 : index
    %106 = vector.load %arg9[%c64_163, %c0_164] : memref<72x286xf32, #tpu.memory_space<vmem>>, vector<8x286xf32>
    tpu.vector_store %arg9[%c64_163, %c0_164], %105 {strides = array<i32>} : memref<72x286xf32, #tpu.memory_space<vmem>>, vector<8x286xf32>,
    %c3 = arith.constant 3 : index
    %c0_165 = arith.constant 0 : index
    %c0_166 = arith.constant 0 : index
    %107 = vector.load %arg2[%c3, %c0_165, %c0_166] : memref<5x8x72xf32, #tpu.memory_space<vmem>>, vector<1x8x72xf32>
    %108 = vector.shape_cast %107 : vector<1x8x72xf32> to vector<8x72xf32>
    %c0_167 = arith.constant 0 : index
    %c0_168 = arith.constant 0 : index
    %109 = vector.load %arg9[%c0_167, %c0_168] : memref<72x286xf32, #tpu.memory_space<vmem>>, vector<72x286xf32>
    %cst_169 = arith.constant dense<0.000000e+00> : vector<8x286xf32>
    %110 = tpu.matmul %108, %109, %cst_169 {dimension_numbers = #tpu.dot_dimension_numbers<[1], [0], [0], [1], [0, 0, 1, 1], [], []>, precision = #tpu.contract_precision<fp32>} : vector<8x72xf32>, vector<72x286xf32>, vector<8x286xf32> -> vector<8x286xf32>
    %c0_170 = arith.constant 0 : index
    %c19_171 = arith.constant 19 : index
    %111 = vector.load %arg7[%c0_170, %c19_171] : memref<8x384xf32, #tpu.memory_space<vmem>>, vector<8x286xf32>
    %112 = arith.addf %110, %111 : vector<8x286xf32>
    %cst_172 = arith.constant 0.000000e+00 : f32
    %113 = vector.broadcast %cst_172 : f32 to vector<8x286xf32>
    %114 = arith.maximumf %112, %113 : vector<8x286xf32>
    %115 = vector.broadcast %0 : vector<1x286xf32> to vector<8x286xf32>
    %116 = arith.mulf %114, %115 : vector<8x286xf32>
    %c0_173 = arith.constant 0 : index
    %c19_174 = arith.constant 19 : index
    %117 = vector.load %arg7[%c0_173, %c19_174] : memref<8x384xf32, #tpu.memory_space<vmem>>, vector<8x286xf32>
    tpu.vector_store %arg7[%c0_173, %c19_174], %116 {strides = array<i32>} : memref<8x384xf32, #tpu.memory_space<vmem>>, vector<8x286xf32>,
    %c0_175 = arith.constant 0 : index
    %c0_176 = arith.constant 0 : index
    %118 = vector.load %arg7[%c0_175, %c0_176] : memref<8x384xf32, #tpu.memory_space<vmem>>, vector<8x286xf32>
    %c0_177 = arith.constant 0 : index
    %c0_178 = arith.constant 0 : index
    %119 = vector.load %arg9[%c0_177, %c0_178] : memref<72x286xf32, #tpu.memory_space<vmem>>, vector<8x286xf32>
    tpu.vector_store %arg9[%c0_177, %c0_178], %118 {strides = array<i32>} : memref<72x286xf32, #tpu.memory_space<vmem>>, vector<8x286xf32>,
    %c0_179 = arith.constant 0 : index
    %c1_180 = arith.constant 1 : index
    %120 = vector.load %arg7[%c0_179, %c1_180] : memref<8x384xf32, #tpu.memory_space<vmem>>, vector<8x286xf32>
    %c8_181 = arith.constant 8 : index
    %c0_182 = arith.constant 0 : index
    %121 = vector.load %arg9[%c8_181, %c0_182] : memref<72x286xf32, #tpu.memory_space<vmem>>, vector<8x286xf32>
    tpu.vector_store %arg9[%c8_181, %c0_182], %120 {strides = array<i32>} : memref<72x286xf32, #tpu.memory_space<vmem>>, vector<8x286xf32>,
    %c0_183 = arith.constant 0 : index
    %c2_184 = arith.constant 2 : index
    %122 = vector.load %arg7[%c0_183, %c2_184] : memref<8x384xf32, #tpu.memory_space<vmem>>, vector<8x286xf32>
    %c16_185 = arith.constant 16 : index
    %c0_186 = arith.constant 0 : index
    %123 = vector.load %arg9[%c16_185, %c0_186] : memref<72x286xf32, #tpu.memory_space<vmem>>, vector<8x286xf32>
    tpu.vector_store %arg9[%c16_185, %c0_186], %122 {strides = array<i32>} : memref<72x286xf32, #tpu.memory_space<vmem>>, vector<8x286xf32>,
    %c0_187 = arith.constant 0 : index
    %c18_188 = arith.constant 18 : index
    %124 = vector.load %arg7[%c0_187, %c18_188] : memref<8x384xf32, #tpu.memory_space<vmem>>, vector<8x286xf32>
    %c24_189 = arith.constant 24 : index
    %c0_190 = arith.constant 0 : index
    %125 = vector.load %arg9[%c24_189, %c0_190] : memref<72x286xf32, #tpu.memory_space<vmem>>, vector<8x286xf32>
    tpu.vector_store %arg9[%c24_189, %c0_190], %124 {strides = array<i32>} : memref<72x286xf32, #tpu.memory_space<vmem>>, vector<8x286xf32>,
    %c0_191 = arith.constant 0 : index
    %c19_192 = arith.constant 19 : index
    %126 = vector.load %arg7[%c0_191, %c19_192] : memref<8x384xf32, #tpu.memory_space<vmem>>, vector<8x286xf32>
    %c32_193 = arith.constant 32 : index
    %c0_194 = arith.constant 0 : index
    %127 = vector.load %arg9[%c32_193, %c0_194] : memref<72x286xf32, #tpu.memory_space<vmem>>, vector<8x286xf32>
    tpu.vector_store %arg9[%c32_193, %c0_194], %126 {strides = array<i32>} : memref<72x286xf32, #tpu.memory_space<vmem>>, vector<8x286xf32>,
    %c0_195 = arith.constant 0 : index
    %c20_196 = arith.constant 20 : index
    %128 = vector.load %arg7[%c0_195, %c20_196] : memref<8x384xf32, #tpu.memory_space<vmem>>, vector<8x286xf32>
    %c40_197 = arith.constant 40 : index
    %c0_198 = arith.constant 0 : index
    %129 = vector.load %arg9[%c40_197, %c0_198] : memref<72x286xf32, #tpu.memory_space<vmem>>, vector<8x286xf32>
    tpu.vector_store %arg9[%c40_197, %c0_198], %128 {strides = array<i32>} : memref<72x286xf32, #tpu.memory_space<vmem>>, vector<8x286xf32>,
    %c0_199 = arith.constant 0 : index
    %c36_200 = arith.constant 36 : index
    %130 = vector.load %arg7[%c0_199, %c36_200] : memref<8x384xf32, #tpu.memory_space<vmem>>, vector<8x286xf32>
    %c48_201 = arith.constant 48 : index
    %c0_202 = arith.constant 0 : index
    %131 = vector.load %arg9[%c48_201, %c0_202] : memref<72x286xf32, #tpu.memory_space<vmem>>, vector<8x286xf32>
    tpu.vector_store %arg9[%c48_201, %c0_202], %130 {strides = array<i32>} : memref<72x286xf32, #tpu.memory_space<vmem>>, vector<8x286xf32>,
    %c0_203 = arith.constant 0 : index
    %c37_204 = arith.constant 37 : index
    %132 = vector.load %arg7[%c0_203, %c37_204] : memref<8x384xf32, #tpu.memory_space<vmem>>, vector<8x286xf32>
    %c56_205 = arith.constant 56 : index
    %c0_206 = arith.constant 0 : index
    %133 = vector.load %arg9[%c56_205, %c0_206] : memref<72x286xf32, #tpu.memory_space<vmem>>, vector<8x286xf32>
    tpu.vector_store %arg9[%c56_205, %c0_206], %132 {strides = array<i32>} : memref<72x286xf32, #tpu.memory_space<vmem>>, vector<8x286xf32>,
    %c0_207 = arith.constant 0 : index
    %c38_208 = arith.constant 38 : index
    %134 = vector.load %arg7[%c0_207, %c38_208] : memref<8x384xf32, #tpu.memory_space<vmem>>, vector<8x286xf32>
    %c64_209 = arith.constant 64 : index
    %c0_210 = arith.constant 0 : index
    %135 = vector.load %arg9[%c64_209, %c0_210] : memref<72x286xf32, #tpu.memory_space<vmem>>, vector<8x286xf32>
    tpu.vector_store %arg9[%c64_209, %c0_210], %134 {strides = array<i32>} : memref<72x286xf32, #tpu.memory_space<vmem>>, vector<8x286xf32>,
    %c4 = arith.constant 4 : index
    %c0_211 = arith.constant 0 : index
    %c0_212 = arith.constant 0 : index
    %136 = vector.load %arg2[%c4, %c0_211, %c0_212] : memref<5x8x72xf32, #tpu.memory_space<vmem>>, vector<1x8x72xf32>
    %137 = vector.shape_cast %136 : vector<1x8x72xf32> to vector<8x72xf32>
    %c0_213 = arith.constant 0 : index
    %c0_214 = arith.constant 0 : index
    %138 = vector.load %arg9[%c0_213, %c0_214] : memref<72x286xf32, #tpu.memory_space<vmem>>, vector<72x286xf32>
    %cst_215 = arith.constant dense<0.000000e+00> : vector<8x286xf32>
    %139 = tpu.matmul %137, %138, %cst_215 {dimension_numbers = #tpu.dot_dimension_numbers<[1], [0], [0], [1], [0, 0, 1, 1], [], []>, precision = #tpu.contract_precision<fp32>} : vector<8x72xf32>, vector<72x286xf32>, vector<8x286xf32> -> vector<8x286xf32>
    %140 = vector.broadcast %0 : vector<1x286xf32> to vector<8x286xf32>
    %141 = arith.mulf %139, %140 : vector<8x286xf32>
    %cst_216 = arith.constant dense<0.000000e+00> : vector<8xf32>
    %142 = vector.multi_reduction <add>, %141, %cst_216 [1] : vector<8x286xf32> to vector<8xf32>
    %143 = vector.shape_cast %142 : vector<8xf32> to vector<8x1xf32>
    %c0_217 = arith.constant 0 : index
    %c0_218 = arith.constant 0 : index
    %c0_219 = arith.constant 0 : index
    %144 = vector.load %arg5[%c0_217, %c0_218, %c0_219] : memref<1x8x1xf32, #tpu.memory_space<vmem>>, vector<1x8x1xf32>
    %145 = vector.shape_cast %144 : vector<1x8x1xf32> to vector<8x1xf32>
    %146 = vector.shape_cast %143 : vector<8x1xf32> to vector<1x8x1xf32>
    tpu.vector_store %arg5[%c0_217, %c0_218, %c0_219], %146 {strides = array<i32>} : memref<1x8x1xf32, #tpu.memory_space<vmem>>, vector<1x8x1xf32>,
    %147 = arith.mulf %141, %141 : vector<8x286xf32>
    %cst_220 = arith.constant dense<0.000000e+00> : vector<8xf32>
    %148 = vector.multi_reduction <add>, %147, %cst_220 [1] : vector<8x286xf32> to vector<8xf32>
    %149 = vector.shape_cast %148 : vector<8xf32> to vector<8x1xf32>
    %c0_221 = arith.constant 0 : index
    %c0_222 = arith.constant 0 : index
    %c0_223 = arith.constant 0 : index
    %150 = vector.load %arg6[%c0_221, %c0_222, %c0_223] : memref<1x8x1xf32, #tpu.memory_space<vmem>>, vector<1x8x1xf32>
    %151 = vector.shape_cast %150 : vector<1x8x1xf32> to vector<8x1xf32>
    %152 = vector.shape_cast %149 : vector<8x1xf32> to vector<1x8x1xf32>
    tpu.vector_store %arg6[%c0_221, %c0_222, %c0_223], %152 {strides = array<i32>} : memref<1x8x1xf32, #tpu.memory_space<vmem>>, vector<1x8x1xf32>,
    %cst_224 = arith.constant 0.000000e+00 : f32
    %153 = vector.broadcast %cst_224 : f32 to vector<8x19xf32>
    %c0_225 = arith.constant 0 : index
    %c0_226 = arith.constant 0 : index
    %c0_227 = arith.constant 0 : index
    %154 = vector.load %arg4[%c0_225, %c0_226, %c0_227] : memref<1x8x384xf32, #tpu.memory_space<vmem>>, vector<1x8x19xf32>
    %155 = vector.shape_cast %154 : vector<1x8x19xf32> to vector<8x19xf32>
    %156 = vector.shape_cast %153 : vector<8x19xf32> to vector<1x8x19xf32>
    tpu.vector_store %arg4[%c0_225, %c0_226, %c0_227], %156 {strides = array<i32>} : memref<1x8x384xf32, #tpu.memory_space<vmem>>, vector<1x8x19xf32>,
    %c0_228 = arith.constant 0 : index
    %c0_229 = arith.constant 0 : index
    %c19_230 = arith.constant 19 : index
    %157 = vector.load %arg4[%c0_228, %c0_229, %c19_230] : memref<1x8x384xf32, #tpu.memory_space<vmem>>, vector<1x8x286xf32>
    %158 = vector.shape_cast %157 : vector<1x8x286xf32> to vector<8x286xf32>
    %159 = vector.shape_cast %141 : vector<8x286xf32> to vector<1x8x286xf32>
    tpu.vector_store %arg4[%c0_228, %c0_229, %c19_230], %159 {strides = array<i32>} : memref<1x8x384xf32, #tpu.memory_space<vmem>>, vector<1x8x286xf32>,
    %cst_231 = arith.constant 0.000000e+00 : f32
    %160 = vector.broadcast %cst_231 : f32 to vector<8x79xf32>
    %c0_232 = arith.constant 0 : index
    %c0_233 = arith.constant 0 : index
    %c305 = arith.constant 305 : index
    %161 = vector.load %arg4[%c0_232, %c0_233, %c305] : memref<1x8x384xf32, #tpu.memory_space<vmem>>, vector<1x8x79xf32>
    %162 = vector.shape_cast %161 : vector<1x8x79xf32> to vector<8x79xf32>
    %163 = vector.shape_cast %160 : vector<8x79xf32> to vector<1x8x79xf32>
    tpu.vector_store %arg4[%c0_232, %c0_233, %c305], %163 {strides = array<i32>} : memref<1x8x384xf32, #tpu.memory_space<vmem>>, vector<1x8x79xf32>,
    return
  }
  func.func @transform_0(%arg0: i32) -> (i32, i32, i32) {
    %c0_i32 = arith.constant 0 : i32
    %c0_i32_0 = arith.constant 0 : i32
    %c0_i32_1 = arith.constant 0 : i32
    return %arg0, %c0_i32, %c0_i32_0 : i32, i32, i32
  }
  func.func @transform_1(%arg0: i32) -> (i32, i32, i32) {
    %c0_i32 = arith.constant 0 : i32
    %c0_i32_0 = arith.constant 0 : i32
    %c0_i32_1 = arith.constant 0 : i32
    %c0_i32_2 = arith.constant 0 : i32
    return %c0_i32, %c0_i32_0, %c0_i32_1 : i32, i32, i32
  }
  func.func @transform_2(%arg0: i32) -> (i32, i32) {
    %c0_i32 = arith.constant 0 : i32
    %c0_i32_0 = arith.constant 0 : i32
    %c0_i32_1 = arith.constant 0 : i32
    return %c0_i32, %c0_i32_0 : i32, i32
  }
  func.func @transform_3(%arg0: i32) -> (i32, i32, i32) {
    %c0_i32 = arith.constant 0 : i32
    %c0_i32_0 = arith.constant 0 : i32
    %c0_i32_1 = arith.constant 0 : i32
    return %arg0, %c0_i32, %c0_i32_0 : i32, i32, i32
  }
  func.func @transform_4(%arg0: i32) -> (i32, i32, i32) {
    %c0_i32 = arith.constant 0 : i32
    %c0_i32_0 = arith.constant 0 : i32
    %c0_i32_1 = arith.constant 0 : i32
    return %arg0, %c0_i32, %c0_i32_0 : i32, i32, i32
  }
  func.func @transform_5(%arg0: i32) -> (i32, i32, i32) {
    %c0_i32 = arith.constant 0 : i32
    %c0_i32_0 = arith.constant 0 : i32
    %c0_i32_1 = arith.constant 0 : i32
    return %arg0, %c0_i32, %c0_i32_0 : i32, i32, i32
  }
}

module attributes {stable_mosaic.version = 11 : i64} {
  func.func @_bn_relu_residual_kernel(%arg0: i32, %arg1: memref<1x8x384xf32, #tpu.memory_space<vmem>>, %arg2: memref<1x8x384xf32, #tpu.memory_space<vmem>>, %arg3: memref<8x1xf32, #tpu.memory_space<vmem>>, %arg4: memref<8x1xf32, #tpu.memory_space<vmem>>, %arg5: memref<1xf32, #tpu.memory_space<smem>>, %arg6: memref<1x8x384xf32, #tpu.memory_space<vmem>>) attributes {dimension_semantics = [#tpu.dimension_semantics<parallel>], iteration_bounds = array<i64: 2>, scalar_prefetch = 0 : i64, scratch_operands = 0 : i64, tpu.core_type = #tpu.core_type<tc>, window_params = [{transform_indices = @transform_0, window_bounds = array<i64: 1, 8, 384>}, {transform_indices = @transform_1, window_bounds = array<i64: 1, 8, 384>}, {pipeline_mode = #tpu.pipeline_mode<synchronous>, transform_indices = @transform_2, window_bounds = array<i64: 8, 1>}, {pipeline_mode = #tpu.pipeline_mode<synchronous>, transform_indices = @transform_3, window_bounds = array<i64: 8, 1>}, {transform_indices = @transform_4, window_bounds = array<i64: 1>}, {transform_indices = @transform_5, window_bounds = array<i64: 1, 8, 384>}]} {
    %c0 = arith.constant 0 : index
    %c0_0 = arith.constant 0 : index
    %c0_1 = arith.constant 0 : index
    %0 = vector.load %arg1[%c0, %c0_0, %c0_1] : memref<1x8x384xf32, #tpu.memory_space<vmem>>, vector<1x8x384xf32>
    %1 = vector.shape_cast %0 : vector<1x8x384xf32> to vector<8x384xf32>
    %c0_2 = arith.constant 0 : index
    %c0_3 = arith.constant 0 : index
    %2 = vector.load %arg3[%c0_2, %c0_3] : memref<8x1xf32, #tpu.memory_space<vmem>>, vector<8x1xf32>
    %3 = vector.broadcast %2 : vector<8x1xf32> to vector<8x384xf32>
    %4 = arith.mulf %1, %3 : vector<8x384xf32>
    %c0_4 = arith.constant 0 : index
    %c0_5 = arith.constant 0 : index
    %5 = vector.load %arg4[%c0_4, %c0_5] : memref<8x1xf32, #tpu.memory_space<vmem>>, vector<8x1xf32>
    %6 = vector.broadcast %5 : vector<8x1xf32> to vector<8x384xf32>
    %7 = arith.addf %4, %6 : vector<8x384xf32>
    %cst = arith.constant 0.000000e+00 : f32
    %8 = vector.broadcast %cst : f32 to vector<8x384xf32>
    %9 = arith.maximumf %7, %8 : vector<8x384xf32>
    %c0_6 = arith.constant 0 : index
    %10 = memref.load %arg5[%c0_6] : memref<1xf32, #tpu.memory_space<smem>>
    %c0_7 = arith.constant 0 : index
    %c0_8 = arith.constant 0 : index
    %c0_9 = arith.constant 0 : index
    %11 = vector.load %arg2[%c0_7, %c0_8, %c0_9] : memref<1x8x384xf32, #tpu.memory_space<vmem>>, vector<1x8x384xf32>
    %12 = vector.shape_cast %11 : vector<1x8x384xf32> to vector<8x384xf32>
    %13 = vector.broadcast %10 : f32 to vector<8x384xf32>
    %14 = arith.mulf %13, %12 : vector<8x384xf32>
    %15 = arith.addf %9, %14 : vector<8x384xf32>
    %c0_10 = arith.constant 0 : index
    %c0_11 = arith.constant 0 : index
    %c0_12 = arith.constant 0 : index
    %16 = vector.load %arg6[%c0_10, %c0_11, %c0_12] : memref<1x8x384xf32, #tpu.memory_space<vmem>>, vector<1x8x384xf32>
    %17 = vector.shape_cast %16 : vector<1x8x384xf32> to vector<8x384xf32>
    %18 = vector.shape_cast %15 : vector<8x384xf32> to vector<1x8x384xf32>
    tpu.vector_store %arg6[%c0_10, %c0_11, %c0_12], %18 {strides = array<i32>} : memref<1x8x384xf32, #tpu.memory_space<vmem>>, vector<1x8x384xf32>,
    return
  }
  func.func @transform_0(%arg0: i32) -> (i32, i32, i32) {
    %c0_i32 = arith.constant 0 : i32
    %c0_i32_0 = arith.constant 0 : i32
    %c0_i32_1 = arith.constant 0 : i32
    return %arg0, %c0_i32, %c0_i32_0 : i32, i32, i32
  }
  func.func @transform_1(%arg0: i32) -> (i32, i32, i32) {
    %c0_i32 = arith.constant 0 : i32
    %c0_i32_0 = arith.constant 0 : i32
    %c0_i32_1 = arith.constant 0 : i32
    return %arg0, %c0_i32, %c0_i32_0 : i32, i32, i32
  }
  func.func @transform_2(%arg0: i32) -> (i32, i32) {
    %c0_i32 = arith.constant 0 : i32
    %c0_i32_0 = arith.constant 0 : i32
    %c0_i32_1 = arith.constant 0 : i32
    return %c0_i32, %c0_i32_0 : i32, i32
  }
  func.func @transform_3(%arg0: i32) -> (i32, i32) {
    %c0_i32 = arith.constant 0 : i32
    %c0_i32_0 = arith.constant 0 : i32
    %c0_i32_1 = arith.constant 0 : i32
    return %c0_i32, %c0_i32_0 : i32, i32
  }
  func.func @transform_4(%arg0: i32) -> i32 {
    %c0_i32 = arith.constant 0 : i32
    %c0_i32_0 = arith.constant 0 : i32
    return %c0_i32 : i32
  }
  func.func @transform_5(%arg0: i32) -> (i32, i32, i32) {
    %c0_i32 = arith.constant 0 : i32
    %c0_i32_0 = arith.constant 0 : i32
    %c0_i32_1 = arith.constant 0 : i32
    return %arg0, %c0_i32, %c0_i32_0 : i32, i32, i32
  }
}

</mosaic_0001>

<bundles_post_ra>
// kernel: residual_group_forward.3
= control target key start
LH: loop header
LB: loop body
LE: loop exit
PB: predicated region body
PF: predicated region fallthrough
CT: control target
= control target key end

     0   :  { %s414_s20 = smov 0   ;;  %s440_s0 = inlined_call_operand.vmem [shape: f32[2,8,384], index: 0, kind: input, shape index: {}]   ;;  %s441_s1 = inlined_call_operand.vmem [shape: f32[2,8,384], index: 1, kind: input, shape index: {}]   ;;  %s442_s2 = inlined_call_operand.vmem [shape: f32[8,1], index: 2, kind: input, shape index: {}]   ;;  %s443_s3 = inlined_call_operand.vmem [shape: f32[8,1], index: 3, kind: input, shape index: {}]   ;;  %s444_s4 = inlined_call_operand.<no memory space> [shape: f32[1], index: 4, kind: input, shape index: {}]   ;;  %s445_s5 = inlined_call_operand.vmem [shape: f32[2,8,384], index: 5, kind: output, shape index: {}]  }
   0x1   :  { %10 = sst [smem:[#allocation2]] %s444_s4 }
   0x2 LB: > { %s351_s21 = sadd.s32 4294967295, %s378_s20   ;;  %p355_p0 = scmp.ge.s32.totalorder %s378_s20, 1  ;;  %s378_s20 = sphi %s414_s20, %s16_s20  }
   0x3   : > { %p198_p1 = scmp.lt.s32.totalorder %s378_s20, 3 }
   0x5   : > { %p199_p2 = pnand %p355_p0, %p198_p1 }
   0x6   : > { %v249_v0 = vld [vmem:[%s442_s2] sm:$0xff] (!%p199_p2)  ;;  %v380_v1 = vmov (!%p199_p2), 0   ;;  %p231_p3 = scmp.lt.s32.totalorder (!%p199_p2), %s351_s21, 1  ;;  %s270_s26 = sld [smem:[#allocation2]] (!%p199_p2) }
   0x7   : > { %202 = sbr.rel (%p199_p2) target bundleno = 148 (0x94), region = 40  ;;  %371 = vset.pattern.permute.xlu0 (!%p199_p2), %v380_v1  ;;  %v258_v2 = vld [vmem:[%s443_s3] sm:$0xff] (!%p199_p2) }
   0x8   : > { %252 = vperm.xlu0 (!%p199_p2), %371, %v249_v0  }
   0xc   : > { %261 = vperm.xlu0 (!%p199_p2), %371, %v258_v2   ;;  %v274_v7 = vstv (!%p199_p2), %s270_s26 }
   0xe   : > { %s447_s21 = smov (!%p231_p3, %s351_s21), 1 }
   0xf   : > { %s361_s25 = smul.u32 24, %s447_s21 }
  0x11   : > { %s235_s29 = scalar_lea.vmem %s440_s0, %s361_s25  ;;  %s240_s7 = scalar_lea.vmem %s441_s1, %s361_s25 }
  0x12   : > { %v246_v4 = vld [vmem:[%s235_s29] sm:$0xff]  ;;  %v247_v5 = vld [vmem:[%s235_s29 + $0x8] sm:$0xff]  ;;  %v248_v6 = vld [vmem:[%s235_s29 + $0x10] sm:$0xff]  ;;  %s245_s10 = scalar_lea.vmem %s445_s5, %s361_s25 }
  0x13   : > { %v271_v8 = vld [vmem:[%s240_s7] sm:$0xff]  ;;  %v272_v9 = vld [vmem:[%s240_s7 + $0x8] sm:$0xff]  ;;  %v273_v10 = vld [vmem:[%s240_s7 + $0x10] sm:$0xff] }
  0x14   : > { %v275_v15 = vmul.f32 %v274_v7, %v271_v8  ;;  %v276_v16 = vmul.f32 %v274_v7, %v272_v9  ;;  %v277_v20 = vmul.f32 %v274_v7, %v273_v10 }
  0x87   : > { %v253_v3 = vpop.permute.xlu0 %252 }
  0x88   : > { %v255_v11 = vmul.f32 %v253_v3, %v246_v4  ;;  %v256_v12 = vmul.f32 %v253_v3, %v247_v5  ;;  %v257_v13 = vmul.f32 %v253_v3, %v248_v6 }
  0x8b   : > { %v262_v14 = vpop.permute.xlu0 %261 }
  0x8c   : > { %v264_v17 = vadd.f32 %v262_v14, %v255_v11  ;;  %v265_v18 = vadd.f32 %v262_v14, %v256_v12  ;;  %v266_v19 = vadd.f32 %v262_v14, %v257_v13 }
  0x8e   : > { %v267_v21 = vmax.f32 %v264_v17, 0.0  ;;  %v268_v22 = vmax.f32 %v265_v18, 0.0  ;;  %v269_v23 = vmax.f32 %v266_v19, 0.0 }
  0x90   : > { %v278_v24 = vadd.f32 %v275_v15, %v267_v21  ;;  %v279_v25 = vadd.f32 %v276_v16, %v268_v22  ;;  %v280_v26 = vadd.f32 %v277_v20, %v269_v23 }
  0x92   : > { %281 = vst [vmem:[%s245_s10] sm:$0xff] %v278_v24  ;;  %282 = vst [vmem:[%s245_s10 + $0x8] sm:$0xff] %v279_v25 }
  0x93   : > { %283 = vst [vmem:[%s245_s10 + $0x10] sm:$0xff] %v280_v26 }
  0x94 PF: > { %s16_s20 = sadd.s32 1, %s378_s20  }
  0x95   : > { %p13_p4 = scmp.ge.s32.totalorder %s16_s20, 4  }
  0x97   :  { %15 = sbr.rel (!%p13_p4) target bundleno = 2 (0x2), region = 73 }

// kernel: residual_group_forward.2
= control target key start
LH: loop header
LB: loop body
LE: loop exit
PB: predicated region body
PF: predicated region fallthrough
CT: control target
= control target key end

     0   :  { %s9633_s18 = smov 0   ;;  %s12245_s0 = inlined_call_operand.vmem [shape: f32[2,8,384], index: 0, kind: input, shape index: {}]   ;;  %s12246_s1 = inlined_call_operand.vmem [shape: f32[5,8,72], index: 1, kind: input, shape index: {}]   ;;  %s12247_s2 = inlined_call_operand.vmem [shape: f32[1,286], index: 2, kind: input, shape index: {}]   ;;  %s12248_s3 = inlined_call_operand.vmem [shape: f32[2,8,384], index: 3, kind: output, shape index: {0}]   ;;  %s12249_s4 = inlined_call_operand.vmem [shape: f32[2,8,1], index: 4, kind: output, shape index: {1}]   ;;  %s12250_s5 = inlined_call_operand.vmem [shape: f32[2,8,1], index: 5, kind: output, shape index: {2}]  }
   0x1 LB: > { %s7671_s19 = sadd.s32 4294967295, %s9589_s18   ;;  %p7675_p0 = scmp.ge.s32.totalorder %s9589_s18, 1  ;;  %s9589_s18 = sphi %s9633_s18, %s16_s18  }
   0x2   : > { %p192_p1 = scmp.lt.s32.totalorder %s9589_s18, 3 }
   0x4   : > { %p193_p2 = pnand %p7675_p0, %p192_p1 }
   0x6   : > { %196 = sbr.rel (%p193_p2) target bundleno = 3059 (0xbf3), region = 32 }
   0xd   : > { %p228_p3 = scmp.lt.s32.totalorder %s7671_s19, 1  ;;  %vm261_vm0 = vcmask 244736   ;;  %s9591_s24 = smov 127   ;;  %v12260_v3 = vmov 0.0|0.0   ;;  %v12262_v4 = vmov 0.0   ;;  %vm9601_vm1 = vmmov 0  }
   0xe   : > { %8712 = vmatprep.subr.bf16.mxu1 %v12260_v3  ;;  %s9593_s25 = smov 126   ;;  %s9594_s26 = smov 110   ;;  %253 = vst [vmem:[#allocation3] sm:$0xff] %v12262_v4  ;;  %255 = vst [vmem:[#allocation3 + $0x10] sm:$0xff] %v12262_v4  ;;  %545 = vmatprep.mubr.f32.mxu0 %v12262_v4  ;;  %vm275_vm2 = vcmask 1039360   ;;  %vm296_vm3 = vcmask 1031168  }
   0xf   : > { %s12637_s19 = smov (!%p228_p3, %s7671_s19), 1  ;;  %s9595_s27 = smov 109   ;;  %8004 = vmatprep.mubr.msk.f32.mxu1 %vm9601_vm1, %v12262_v4  ;;  %vm317_vm4 = vcmask 900096   ;;  %v431_v29 = vld [vmem:[%s12246_s1] sm:$0xff]  ;;  %vm459_vm5 = vcmask 588800   ;;  %vm338_vm6 = vcmask 891904  }
  0x10   : > { %s9562_s20 = smul.u32 24, %s12637_s19  ;;  %s9596_s28 = smov 108   ;;  %v461_v36 = vsel %vm459_vm5, %v431_v29, 0  ;;  %vm359_vm7 = vcmask 883712   ;;  %vm380_vm8 = vcmask 752640   ;;  %vm401_vm9 = vcmask 744448  }
  0x11   : > { %s9597_s29 = smov 92   ;;  %s9598_s30 = smov 91   ;;  %v9744_v45 = vand.u32 4294901760, %v461_v36  ;;  %vm422_vm10 = vcmask 736256   ;;  %vm1723_vm11 = vcmask 1047704   ;;  %vm1726_vm12 = vcmask 400384  }
  0x12   : > { %s232_s23 = scalar_lea.vmem %s12245_s0, %s9562_s20  ;;  %s9600_s6 = smov 90   ;;  %vm1717_vm13 = vcmask 154624   ;;  %vm7523_vm14 = vcmask 7168   ;;  %vm7552_vm15 = vcmask 1047944  }
  0x13   : > { %v9649_v0 = vld [vmem:[%s232_s23 + $0x8] sm:$0xff]  ;;  %v9651_v1 = vld [vmem:[%s232_s23] sm:$0xff]  ;;  %v249_v2 = vld [vmem:[%s232_s23 + $0x10] sm:$0xff]  ;;  %v9768_v57 = vsub.f32 %v461_v36, %v9744_v45  ;;  %s9602_s11 = smov 19  }
  0x14   : > { %251 = vst [vmem:[#allocation2 + $0x8] sm:$0xff] %v9649_v0  ;;  %271 = vrot.lane.b32.xlu0 %v9649_v0, %s9591_s24  ;;  %250 = vst [vmem:[#allocation2] sm:$0xff] %v9651_v1  ;;  %269 = vrot.lane.b32.xlu1 %v9651_v1, %s9591_s24  ;;  %v463_v10 = vand.u32 4294901760, %v9649_v0  ;;  %v465_v12 = vand.u32 4294901760, %v9651_v1 }
  0x15   : > { %252 = vst [vmem:[#allocation2 + $0x10] sm:$0xff] %v249_v2  ;;  %262 = vst.msk [vmem:[#allocation4 + $0x10] sm:$0xff] %vm261_vm0, %v249_v2 }
  0x16   : > { %v9736_v40 = vsub.f32 %v9649_v0, %v463_v10  ;;  %v9747_v46 = vsub.f32 %v9651_v1, %v465_v12 }
  0x18   : > { %273 = vrot.lane.b32.xlu0 %v249_v2, %s9591_s24  ;;  %292 = vrot.lane.b32.xlu1 %v9649_v0, %s9593_s25  ;;  %v12259_v53 = vand.u32 4294901760, %v9736_v40  ;;  %v12255_v59 = vand.u32 4294901760, %v9747_v46 }
  0x1c   : > { %294 = vrot.lane.b32.xlu0 %v249_v2, %s9593_s25  ;;  %313 = vrot.lane.b32.xlu1 %v9649_v0, %s9594_s26  ;;  %v434_v17 = vld [vmem:[#allocation4 + $0x10] sm:$0xff] }
  0x1d   : > { %v1137_v21 = vand.u32 4294901760, %v434_v17 }
  0x1f   : > { %v9755_v50 = vsub.f32 %v434_v17, %v1137_v21 }
  0x20   : > { %315 = vrot.lane.b32.xlu0 %v249_v2, %s9594_s26  ;;  %290 = vrot.lane.b32.xlu1 %v9651_v1, %s9593_s25 }
  0x24   : > { %311 = vrot.lane.b32.xlu0 %v9651_v1, %s9594_s26  ;;  %334 = vrot.lane.b32.xlu1 %v9649_v0, %s9595_s27 }
  0x28   : > { %336 = vrot.lane.b32.xlu0 %v249_v2, %s9595_s27  ;;  %355 = vrot.lane.b32.xlu1 %v9649_v0, %s9596_s28 }
  0x2c   : > { %357 = vrot.lane.b32.xlu0 %v249_v2, %s9596_s28  ;;  %332 = vrot.lane.b32.xlu1 %v9651_v1, %s9595_s27 }
  0x30   : > { %353 = vrot.lane.b32.xlu0 %v9651_v1, %s9596_s28  ;;  %376 = vrot.lane.b32.xlu1 %v9649_v0, %s9597_s29 }
  0x34   : > { %378 = vrot.lane.b32.xlu0 %v249_v2, %s9597_s29  ;;  %397 = vrot.lane.b32.xlu1 %v9649_v0, %s9598_s30 }
  0x38   : > { %399 = vrot.lane.b32.xlu0 %v249_v2, %s9598_s30  ;;  %374 = vrot.lane.b32.xlu1 %v9651_v1, %s9597_s29 }
  0x3c   : > { %395 = vrot.lane.b32.xlu0 %v9651_v1, %s9598_s30  ;;  %418 = vrot.lane.b32.xlu1 %v9649_v0, %s9600_s6 }
  0x40   : > { %420 = vrot.lane.b32.xlu0 %v249_v2, %s9600_s6  ;;  %416 = vrot.lane.b32.xlu1 %v9651_v1, %s9600_s6  ;;  %v12251_v1 = vand.u32 4294901760, %v9755_v50  ;;  %v9789_v2 = vsub.f32 %v9736_v40, %v12259_v53 }
  0x86   : > { %v272_v5 = vpop.permute.xlu0 %271  ;;  %v270_v6 = vpop.permute.xlu1 %269 }
  0x87   : > { %v276_v7 = vsel %vm275_vm2, %v270_v6, %v272_v5 }
  0x88   : > { %v469_v13 = vand.u32 4294901760, %v276_v7 }
  0x8a   : > { %v274_v8 = vpop.permute.xlu0 %273  ;;  %v293_v9 = vpop.permute.xlu1 %292  ;;  %v9710_v19 = vpack.c.bf16 %v469_v13, %v465_v12  ;;  %v9752_v49 = vsub.f32 %v276_v7, %v469_v13 }
  0x8b   : > { %v277_v11 = vsel %vm275_vm2, %v272_v5, %v274_v8  ;;  %283 = vst.msk [vmem:[#allocation4 + $0x28] sm:$0xff] %vm261_vm0, %v274_v8 }
  0x8c   : > { %v467_v14 = vand.u32 4294901760, %v277_v11  ;;  %v12252_v63 = vand.u32 4294901760, %v9752_v49 }
  0x8e   : > { %v295_v15 = vpop.permute.xlu0 %294  ;;  %v314_v16 = vpop.permute.xlu1 %313  ;;  %v9707_v18 = vpack.c.bf16 %v467_v14, %v463_v10  ;;  %v9765_v54 = vsub.f32 %v277_v11, %v467_v14  ;;  %v566_v14 = vsub.f32 %v9747_v46, %v12255_v59 }
  0x8f   : > { %304 = vst.msk [vmem:[#allocation4 + $0x40] sm:$0xff] %vm261_vm0, %v295_v15  ;;  %v298_v20 = vsel %vm296_vm3, %v293_v9, %v295_v15 }
  0x90   : > { %8617 = vmatprep.subr.bf16.mxu0 %v9707_v18  ;;  %v471_v27 = vand.u32 4294901760, %v298_v20  ;;  %v12257_v10 = vand.u32 4294901760, %v9765_v54 }
  0x91   : > { %8619 = vmatpush1.bf16.msra.mxu0 %v9710_v19 }
  0x92   : > { %v316_v22 = vpop.permute.xlu0 %315  ;;  %v291_v23 = vpop.permute.xlu1 %290  ;;  %v437_v24 = vld [vmem:[#allocation4 + $0x28] sm:$0xff]  ;;  %v9791_v5 = vsub.f32 %v298_v20, %v471_v27  ;;  %v572_v29 = vsub.f32 %v9765_v54, %v12257_v10 }
  0x93   : > { %v319_v25 = vsel %vm317_vm4, %v314_v16, %v316_v22  ;;  %325 = vst.msk [vmem:[#allocation4 + $0x58] sm:$0xff] %vm261_vm0, %v316_v22  ;;  %v1140_v26 = vand.u32 4294901760, %v437_v24  ;;  %v297_v30 = vsel %vm296_vm3, %v291_v23, %v293_v9  ;;  %v9800_v9 = vand.u32 4294901760, %v9768_v57 }
  0x94   : > { %v475_v28 = vand.u32 4294901760, %v319_v25  ;;  %v473_v38 = vand.u32 4294901760, %v297_v30  ;;  %v1224_v22 = vsub.f32 %v9755_v50, %v12251_v1  ;;  %v561_v23 = vand.u32 4294901760, %v9789_v2 }
  0x95   : > { %v9721_v31 = vpack.c.bf16 %v1140_v26, %v1137_v21  ;;  %v9776_v60 = vsub.f32 %v437_v24, %v1140_v26  ;;  %12366 = vst [vmem:[#allocation5_spill] sm:$0xff] %v9800_v9  ;;  %v578_v21 = vsub.f32 %v9752_v49, %v12252_v63 }
  0x96   : > { %v312_v32 = vpop.permute.xlu0 %311  ;;  %v335_v33 = vpop.permute.xlu1 %334  ;;  %v9723_v34 = vpack.c.bf16 %v475_v28, %v471_v27  ;;  %v9731_v37 = vld [vmem:[#allocation4 + $0x40] sm:$0xff]  ;;  %v9803_v11 = vsub.f32 %v319_v25, %v475_v28  ;;  %v9808_v13 = vsub.f32 %v297_v30, %v473_v38  ;;  %v549_v28 = vsub.f32 %v9768_v57, %v9800_v9 }
  0x97   : > { %v9726_v35 = vsel %vm317_vm4, %v312_v32, %v314_v16  ;;  %8714 = vmatpush3.bf16.msra.mxu1 %v9721_v31  ;;  %v1143_v47 = vand.u32 4294901760, %v9731_v37  ;;  %v12253_v20 = vand.u32 4294901760, %v9776_v60  ;;  %v12254_v30 = vand.u32 4294901760, %v9791_v5 }
  0x98   : > { %8715 = vmatprep.subr.bf16.mxu1 %v12260_v3  ;;  %8621 = vmatprep.subr.bf16.mxu0 %v9723_v34  ;;  %v477_v39 = vand.u32 4294901760, %v9726_v35  ;;  %v12256_v36 = vand.u32 4294901760, %v9803_v11 }
  0x9a   : > { %v337_v41 = vpop.permute.xlu0 %336  ;;  %v356_v42 = vpop.permute.xlu1 %355  ;;  %v9738_v43 = vld [vmem:[#allocation4 + $0x58] sm:$0xff]  ;;  %v9742_v44 = vpack.c.bf16 %v477_v39, %v473_v38  ;;  %v12258_v38 = vand.u32 4294901760, %v9808_v13  ;;  %v9853_v2 = vsub.f32 %v9726_v35, %v477_v39  ;;  %v584_v35 = vsub.f32 %v9791_v5, %v12254_v30 }
  0x9b   : > { %346 = vst.msk [vmem:[#allocation4 + $0x70] sm:$0xff] %vm261_vm0, %v337_v41  ;;  %v1146_v48 = vand.u32 4294901760, %v9738_v43  ;;  %v9758_v51 = vsel %vm338_vm6, %v335_v33, %v337_v41  ;;  %v1231_v41 = vsub.f32 %v9776_v60, %v12253_v20  ;;  %v596_v39 = vsub.f32 %v9803_v11, %v12256_v36 }
  0x9c   : > { %8623 = vmatpush1.bf16.msra.mxu0 %v9742_v44  ;;  %v479_v61 = vand.u32 4294901760, %v9758_v51  ;;  %v12265_v10 = vand.u32 4294901760, %v9853_v2 }
  0x9d   : > { %v9762_v52 = vpack.c.bf16 %v1146_v48, %v1143_v47  ;;  %v9884_v30 = vsub.f32 %v9738_v43, %v1146_v48  ;;  %v597_v53 = vand.u32 4294901760, %v596_v39 }
  0x9e   : > { %v358_v55 = vpop.permute.xlu0 %357  ;;  %v333_v56 = vpop.permute.xlu1 %332 }
  0x9f   : > { %v9771_v58 = vsel %vm359_vm7, %v356_v42, %v358_v55  ;;  %367 = vst.msk [vmem:[#allocation4 + $0x88] sm:$0xff] %vm261_vm0, %v358_v55  ;;  %8717 = vmatpush3.bf16.msra.mxu1 %v9762_v52  ;;  %v9783_v0 = vsel %vm338_vm6, %v333_v56, %v335_v33  ;;  %v579_v55 = vand.u32 4294901760, %v578_v21  ;;  %v9848_v56 = vsub.f32 %v9731_v37, %v1143_v47 }
  0xa0   : > { %8718 = vmatprep.subr.bf16.mxu1 %v12260_v3  ;;  %v483_v62 = vand.u32 4294901760, %v9771_v58  ;;  %v481_v16 = vand.u32 4294901760, %v9783_v0  ;;  %v1225_v37 = vand.u32 4294901760, %v1224_v22  ;;  %v573_v47 = vand.u32 4294901760, %v572_v29 }
  0xa1   : > { %v12264_v36 = vand.u32 4294901760, %v9848_v56 }
  0xa2   : > { %v354_v6 = vpop.permute.xlu0 %353  ;;  %v377_v7 = vpop.permute.xlu1 %376  ;;  %v9797_v8 = vpack.c.bf16 %v483_v62, %v479_v61  ;;  %v9813_v15 = vld [vmem:[#allocation4 + $0x70] sm:$0xff]  ;;  %v8632_v48 = vpack.c.bf16 %v573_v47, %v561_v23  ;;  %v9912_v23 = vsub.f32 %v9783_v0, %v481_v16 }
  0xa3   : > { %v9806_v12 = vsel %vm359_vm7, %v354_v6, %v356_v42  ;;  %v1149_v32 = vand.u32 4294901760, %v9813_v15  ;;  %v567_v42 = vand.u32 4294901760, %v566_v14  ;;  %v9862_v14 = vand.u32 4294901760, %v549_v28 }
  0xa4   : > { %8625 = vmatprep.subr.bf16.mxu0 %v9797_v8  ;;  %v485_v17 = vand.u32 4294901760, %v9806_v12 }
  0xa5   : > { %v9879_v29 = vpack.c.bf16 %v579_v55, %v567_v42 }
  0xa6   : > { %v379_v24 = vpop.permute.xlu0 %378  ;;  %v398_v25 = vpop.permute.xlu1 %397  ;;  %v9826_v26 = vld [vmem:[#allocation4 + $0x88] sm:$0xff]  ;;  %v9830_v27 = vpack.c.bf16 %v485_v17, %v481_v16  ;;  %v9904_v4 = vsub.f32 %v9806_v12, %v485_v17  ;;  %v602_v17 = vsub.f32 %v9853_v2, %v12265_v10 }
  0xa7   : > { %388 = vst.msk [vmem:[#allocation4 + $0xa0] sm:$0xff] %vm261_vm0, %v379_v24  ;;  %v1152_v33 = vand.u32 4294901760, %v9826_v26  ;;  %v382_v6 = vsel %vm380_vm8, %v377_v7, %v379_v24  ;;  %v9876_v24 = vsub.f32 %v9808_v13, %v12258_v38  ;;  %v9892_v38 = vsub.f32 %v9758_v51, %v479_v61 }
  0xa8   : > { %8627 = vmatpush1.bf16.msra.mxu0 %v9830_v27  ;;  %v487_v22 = vand.u32 4294901760, %v382_v6 }
  0xa9   : > { %v9860_v1 = vpack.c.bf16 %v1152_v33, %v1149_v32  ;;  %v9935_v10 = vsub.f32 %v9826_v26, %v1152_v33  ;;  %v9951_v26 = vsub.f32 %v9813_v15, %v1149_v32  ;;  %v12372_v15 = vand.u32 4294901760, %v9884_v30 }
  0xaa   : > { %v400_v63 = vpop.permute.xlu0 %399  ;;  %v375_v20 = vpop.permute.xlu1 %374  ;;  %v12374_v9 = vand.u32 4294901760, %v9892_v38 }
  0xab   : > { %v403_v21 = vsel %vm401_vm9, %v398_v25, %v400_v63  ;;  %409 = vst.msk [vmem:[#allocation4 + $0xb8] sm:$0xff] %vm261_vm0, %v400_v63  ;;  %8720 = vmatpush3.bf16.msra.mxu1 %v9860_v1  ;;  %v1232_v63 = vand.u32 4294901760, %v1231_v41  ;;  %v381_v59 = vsel %vm380_vm8, %v375_v20, %v377_v7  ;;  %v9897_v41 = vsub.f32 %v9771_v58, %v483_v62 }
  0xac   : > { %8721 = vmatprep.subr.bf16.mxu1 %v12260_v3  ;;  %v491_v28 = vand.u32 4294901760, %v403_v21  ;;  %v585_v20 = vand.u32 4294901760, %v584_v35  ;;  %v591_v3 = vand.u32 4294901760, %v9876_v24  ;;  %v489_v61 = vand.u32 4294901760, %v381_v59 }
  0xad   : > { %v9907_v62 = vpack.c.bf16 %v1232_v63, %v1225_v37  ;;  %v1245_v32 = vsub.f32 %v9884_v30, %v12372_v15  ;;  %v12376_v15 = vand.u32 4294901760, %v9912_v23 }
  0xae   : > { %v396_v42 = vpop.permute.xlu0 %395  ;;  %v419_v55 = vpop.permute.xlu1 %418  ;;  %v9899_v43 = vpack.c.bf16 %v491_v28, %v487_v22  ;;  %v452_v51 = vld [vmem:[#allocation4 + $0xa0] sm:$0xff]  ;;  %v9923_v39 = vsub.f32 %v403_v21, %v491_v28  ;;  %v9937_v21 = vsub.f32 %v382_v6, %v487_v22  ;;  %v12371_v6 = vand.u32 4294901760, %v9897_v41 }
  0xaf   : > { %v402_v7 = vsel %vm401_vm9, %v396_v42, %v398_v25  ;;  %v9917_v25 = vsub.f32 %v9848_v56, %v12264_v36  ;;  %v1155_v36 = vand.u32 4294901760, %v452_v51 }
  0xb0   : > { %8629 = vmatprep.subr.bf16.mxu0 %v9899_v43  ;;  %v493_v58 = vand.u32 4294901760, %v402_v7  ;;  %v620_v22 = vsub.f32 %v9897_v41, %v12371_v6  ;;  %v608_v6 = vsub.f32 %v9892_v38, %v12374_v9 }
  0xb2   : > { %v421_v47 = vpop.permute.xlu0 %420  ;;  %v417_v35 = vpop.permute.xlu1 %416  ;;  %v455_v37 = vld [vmem:[#allocation4 + $0xb8] sm:$0xff]  ;;  %v9925_v24 = vpack.c.bf16 %v493_v58, %v489_v61  ;;  %v621_v0 = vand.u32 4294901760, %v620_v22  ;;  %v609_v22 = vand.u32 4294901760, %v608_v6 }
  0xb3   : > { %v424_v63 = vsel %vm422_vm10, %v419_v55, %v421_v47  ;;  %430 = vst.msk [vmem:[#allocation4 + $0xd0] sm:$0xff] %vm261_vm0, %v421_v47  ;;  %v423_v42 = vsel %vm422_vm10, %v417_v35, %v419_v55  ;;  %v1158_v12 = vand.u32 4294901760, %v455_v37  ;;  %v9945_v47 = vsub.f32 %v402_v7, %v493_v58 }
  0xb4   : > { %12367 = vst [vmem:[#allocation6_spill] sm:$0xff] %v9925_v24  ;;  %8631 = vmatpush1.bf16.msra.mxu0 %v9925_v24  ;;  %v9940_v28 = vand.u32 4294901760, %v424_v63  ;;  %v603_v55 = vand.u32 4294901760, %v602_v17  ;;  %v9954_v33 = vand.u32 4294901760, %v423_v42  ;;  %v9961_v7 = vsub.f32 %v381_v59, %v489_v61 }
  0xb5   : > { %v9943_v16 = vpack.c.bf16 %v1158_v12, %v1155_v36  ;;  %v8636_v58 = vpack.c.bf16 %v597_v53, %v585_v20  ;;  %v1239_v17 = vand.u32 4294901760, %v9917_v25  ;;  %v12373_v35 = vmov 0.0  }
  0xb6   : > { %12368 = vst [vmem:[#allocation7_spill] sm:$0xff] %v9940_v28  ;;  %496 = vmatprep.subr.mxu0 %v9940_v28  ;;  %12370 = vst [vmem:[#allocation9_spill] sm:$0xff] %v9954_v33  ;;  %v12375_v59 = vand.u32 4294901760, %v9904_v4  ;;  %v9977_v61 = vsub.f32 %v455_v37, %v1158_v12  ;;  %v8638_v25 = vpack.c.bf16 %v603_v55, %v591_v3  ;;  %v12377_v20 = vand.u32 4294901760, %v9923_v39 }
  0xb7   : > { %12369 = vst [vmem:[#allocation8_spill] sm:$0xff] %v9943_v16  ;;  %8723 = vmatpush3.bf16.msra.mxu1 %v9943_v16  ;;  %v614_v16 = vsub.f32 %v9912_v23, %v12376_v15  ;;  %v9993_v3 = vsub.f32 %v452_v51, %v1155_v36  ;;  %v1246_v55 = vand.u32 4294901760, %v1245_v32  ;;  %v12378_v15 = vand.u32 4294901760, %v9935_v10 }
  0xb8   : > { %8002 = vmatprep.subr.mxu1 %v12373_v35  ;;  %498 = vmatpush1.msra.mxu0 %v9954_v33  ;;  %v626_v53 = vsub.f32 %v9904_v4, %v12375_v59  ;;  %v644_v12 = vsub.f32 %v9923_v39, %v12377_v20  ;;  %v12379_v20 = vand.u32 4294901760, %v9937_v21  ;;  %v10006_v36 = vsub.f32 %v423_v42, %v9954_v33 }
  0xb9   : > { %8633 = vmatprep.subr.bf16.mxu0 %v8632_v48  ;;  %551 = vmatmul.mubr.f32.vlgmr.msra.gmra.mrb[0].mxu0 %v9862_v14  ;;  %v9990_v48 = vsub.f32 %v424_v63, %v9940_v28  ;;  %v1259_v59 = vsub.f32 %v9935_v10, %v12378_v15  ;;  %v615_v51 = vand.u32 4294901760, %v614_v16  ;;  %v12380_v32 = vand.u32 4294901760, %v9945_v47 }
  0xba   : > { %v458_v24 = vld [vmem:[#allocation4 + $0xd0] sm:$0xff]  ;;  %8635 = vmatpush1.bf16.msra.mxu0 %v9879_v29  ;;  %711 = vmatprep.mubr.f32.mxu0 %v12373_v35  ;;  %v627_v9 = vand.u32 4294901760, %v626_v53  ;;  %v632_v63 = vsub.f32 %v9937_v21, %v12379_v20  ;;  %v12381_v29 = vmov 0.0|0.0   ;;  %v8640_v53 = vpack.c.bf16 %v621_v0, %v609_v22 }
  0xbb   : > { %v9995_v37 = vand.u32 4294901760, %v458_v24  ;;  %8637 = vmatprep.subr.bf16.mxu0 %v8636_v58  ;;  %v650_v6 = vsub.f32 %v9945_v47, %v12380_v32  ;;  %v12382_v15 = vand.u32 4294901760, %v9951_v26  ;;  %v645_v28 = vand.u32 4294901760, %v644_v12 }
  0xbc   : > { %v12383_v58 = vand.u32 4294901760, %v9961_v7  ;;  %v1260_v0 = vand.u32 4294901760, %v1259_v59  ;;  %v8642_v22 = vpack.c.bf16 %v627_v9, %v615_v51  ;;  %v633_v33 = vand.u32 4294901760, %v632_v63 }
  0xbd   : > { %8003 = vmatpush3.msra.mxu1 %v9995_v37  ;;  %v1252_v20 = vsub.f32 %v9951_v26, %v12382_v15  ;;  %v10025_v12 = vsub.f32 %v458_v24, %v9995_v37  ;;  %v12384_v15 = vand.u32 4294901760, %v9977_v61  ;;  %v12386_v24 = vand.u32 4294901760, %v9993_v3 }
  0xbe   : > { %8724 = vmatprep.subr.bf16.mxu1 %v12381_v29  ;;  %8005 = vmatmul.mubr.f32.vlgmr.msra.gmra.mrb[0].mxu1 %v9862_v14  ;;  %v638_v32 = vsub.f32 %v9961_v7, %v12383_v58  ;;  %v8728_v14 = vpack.c.bf16 %v1246_v55, %v1239_v17  ;;  %v661_v58 = vand.u32 4294901760, %v10006_v36  ;;  %v8644_v42 = vpack.c.bf16 %v645_v28, %v633_v33 }
  0xbf   : > { %8726 = vmatpush3.bf16.msra.mxu1 %v9907_v62  ;;  %8639 = vmatpush1.bf16.msra.mxu0 %v8638_v25  ;;  %v1273_v62 = vsub.f32 %v9977_v61, %v12384_v15  ;;  %v651_v25 = vand.u32 4294901760, %v650_v6  ;;  %v1253_v16 = vand.u32 4294901760, %v1252_v20  ;;  %v12385_v17 = vand.u32 4294901760, %v9990_v48 }
  0xc0   : > { %8727 = vmatprep.subr.bf16.mxu1 %v12381_v29  ;;  %8641 = vmatprep.subr.bf16.mxu0 %v8640_v53  ;;  %v1266_v59 = vsub.f32 %v9993_v3, %v12386_v24  ;;  %v639_v55 = vand.u32 4294901760, %v638_v32  ;;  %v1279_v53 = vand.u32 4294901760, %v10025_v12  ;;  %v662_v28 = vsub.f32 %v10006_v36, %v661_v58 }
  0xc1   : > { %8025 = vmatprep.mubr.msk.f32.mxu1 %vm9601_vm1, %v12373_v35  ;;  %v656_v9 = vsub.f32 %v9990_v48, %v12385_v17  ;;  %v8731_v63 = vpack.c.bf16 %v1260_v0, %v1253_v16  ;;  %v1274_v51 = vand.u32 4294901760, %v1273_v62  ;;  %v8650_v0 = vpack.c.bf16 %v9752_v49, %v9747_v46 }
  0xc2   : > { %v8646_v6 = vpack.c.bf16 %v651_v25, %v639_v55  ;;  %v1267_v20 = vand.u32 4294901760, %v1266_v59  ;;  %v663_v16 = vand.u32 4294901760, %v662_v28  ;;  %v8652_v15 = vpack.c.bf16 %v9803_v11, %v9791_v5  ;;  %v12389_v28 = vld [vmem:[#allocation8_spill] sm:$0xff] }
  0xc3   : > { %8729 = vmatpush3.bf16.msra.mxu1 %v8728_v14  ;;  %8643 = vmatpush1.bf16.msra.mxu0 %v8642_v22  ;;  %v657_v33 = vand.u32 4294901760, %v656_v9  ;;  %v8648_v14 = vpack.c.bf16 %v9765_v54, %v9736_v40  ;;  %v8737_v62 = vpack.c.bf16 %v9776_v60, %v9755_v50  ;;  %v8654_v25 = vpack.c.bf16 %v9853_v2, %v9808_v13 }
  0xc4   : > { %8730 = vmatprep.subr.bf16.mxu1 %v12381_v29  ;;  %8645 = vmatprep.subr.bf16.mxu0 %v8644_v42  ;;  %v8734_v32 = vpack.c.bf16 %v1274_v51, %v1267_v20  ;;  %v1280_v42 = vsub.f32 %v10025_v12, %v1279_v53  ;;  %v8656_v17 = vpack.c.bf16 %v9897_v41, %v9892_v38  ;;  %v12391_v20 = vand.u32 4294901760, %v9765_v54 }
  0xc5   : > { %v8740_v9 = vpack.c.bf16 %v9884_v30, %v9848_v56  ;;  %v8658_v24 = vpack.c.bf16 %v9904_v4, %v9912_v23  ;;  %v8660_v59 = vpack.c.bf16 %v9923_v39, %v9937_v21  ;;  %v8743_v55 = vpack.c.bf16 %v9935_v10, %v9951_v26 }
  0xc6   : > { %v1281_v22 = vand.u32 4294901760, %v1280_v42  ;;  %v8746_v51 = vpack.c.bf16 %v9977_v61, %v9993_v3  ;;  %v12392_v42 = vld [vmem:[#allocation9_spill] sm:$0xff]  ;;  %v12398_v54 = vand.u32 4294901760, %v9755_v50  ;;  %v12404_v50 = vand.u32 4294901760, %v9848_v56 }
  0xc7   : > { %8732 = vmatpush3.bf16.msra.mxu1 %v8731_v63  ;;  %8647 = vmatpush1.bf16.msra.mxu0 %v8646_v6  ;;  %v8662_v63 = vpack.c.bf16 %v9945_v47, %v9961_v7  ;;  %v12388_v6 = vld [vmem:[#allocation7_spill] sm:$0xff]  ;;  %v12410_v56 = vand.u32 4294901760, %v9951_v26  ;;  %v12416_v26 = vand.u32 4294901760, %v9990_v48 }
  0xc8   : > { %8733 = vmatprep.subr.bf16.mxu1 %v12381_v29  ;;  %658 = vmatprep.subr.mxu0 %v657_v33  ;;  %v12390_v33 = vand.u32 4294901760, %v9736_v40 }
  0xcb   : > { %8735 = vmatpush3.bf16.msra.mxu1 %v8734_v32  ;;  %664 = vmatpush1.msra.mxu0 %v663_v16  ;;  %v8680_v32 = vpack.c.bf16 %v12391_v20, %v12390_v33  ;;  %v12393_v16 = vand.u32 4294901760, %v9747_v46  ;;  %v12399_v46 = vand.u32 4294901760, %v9776_v60  ;;  %v12405_v60 = vand.u32 4294901760, %v9884_v30 }
  0xcc   : > { %8023 = vmatprep.subr.mxu1 %v12373_v35  ;;  %8649 = vmatprep.subr.bf16.mxu0 %v8648_v14  ;;  %v12394_v14 = vand.u32 4294901760, %v9752_v49  ;;  %v12400_v49 = vand.u32 4294901760, %v9808_v13  ;;  %v12411_v30 = vand.u32 4294901760, %v9935_v10 }
  0xcd   : > { %713 = vmatmul.mubr.f32.vlgmr.msra.gmra.mrb[0].mxu0 %v9744_v45  ;;  %v8764_v13 = vpack.c.bf16 %v12405_v60, %v12404_v50 }
  0xce   : > { %8651 = vmatpush1.bf16.msra.mxu0 %v8650_v0  ;;  %819 = vmatprep.mubr.f32.mxu0 %v12373_v35  ;;  %v8682_v0 = vpack.c.bf16 %v12394_v14, %v12393_v16 }
  0xcf   : > { %8024 = vmatpush3.msra.mxu1 %v1281_v22  ;;  %8653 = vmatprep.subr.bf16.mxu0 %v8652_v15  ;;  %v12395_v22 = vld [vmem:[#allocation5_spill] sm:$0xff]  ;;  %v12396_v15 = vand.u32 4294901760, %v9791_v5  ;;  %v12401_v5 = vand.u32 4294901760, %v9853_v2  ;;  %v12406_v2 = vand.u32 4294901760, %v9912_v23  ;;  %v12412_v23 = vand.u32 4294901760, %v9961_v7 }
  0xd0   : > { %8736 = vmatprep.subr.bf16.mxu1 %v12381_v29  ;;  %8026 = vmatmul.mubr.f32.vlgmr.msra.gmra.mrb[0].mxu1 %v9744_v45 }
  0xd1   : > { %8738 = vmatpush3.bf16.msra.mxu1 %v8737_v62  ;;  %8046 = vmatprep.mubr.msk.f32.mxu1 %vm9601_vm1, %v12373_v35  ;;  %v12397_v62 = vand.u32 4294901760, %v9803_v11  ;;  %v8686_v11 = vpack.c.bf16 %v12401_v5, %v12400_v49 }
  0xd2   : > { %8739 = vmatprep.subr.bf16.mxu1 %v12381_v29  ;;  %8655 = vmatpush1.bf16.msra.mxu0 %v8654_v25  ;;  %v8761_v25 = vpack.c.bf16 %v12399_v46, %v12398_v54 }
  0xd3   : > { %8657 = vmatprep.subr.bf16.mxu0 %v8656_v17  ;;  %v8684_v40 = vpack.c.bf16 %v12397_v62, %v12396_v15  ;;  %v12402_v17 = vand.u32 4294901760, %v9892_v38 }
  0xd5   : > { %8741 = vmatpush3.bf16.msra.mxu1 %v8740_v9  ;;  %v12403_v9 = vand.u32 4294901760, %v9897_v41  ;;  %v12408_v41 = vand.u32 4294901760, %v9937_v21  ;;  %v12415_v21 = vand.u32 4294901760, %v9977_v61 }
  0xd6   : > { %8742 = vmatprep.subr.bf16.mxu1 %v12381_v29  ;;  %8659 = vmatpush1.bf16.msra.mxu0 %v8658_v24 }
  0xd7   : > { %8661 = vmatprep.subr.bf16.mxu0 %v8660_v59  ;;  %v8688_v24 = vpack.c.bf16 %v12403_v9, %v12402_v17  ;;  %v12407_v59 = vand.u32 4294901760, %v9904_v4  ;;  %v12413_v4 = vand.u32 4294901760, %v9945_v47  ;;  %v7680_v17 = vld [vmem:[%s12246_s1 + $0x8] sm:$0xff] }
  0xd9   : > { %8744 = vmatpush3.bf16.msra.mxu1 %v8743_v55  ;;  %v8690_v38 = vpack.c.bf16 %v12407_v59, %v12406_v2  ;;  %v12409_v55 = vand.u32 4294901760, %v9923_v39  ;;  %v8694_v33 = vpack.c.bf16 %v12413_v4, %v12412_v23  ;;  %v12414_v39 = vand.u32 4294901760, %v9993_v3  ;;  %v1924_v4 = vld [vmem:[#allocation2 + $0x8] sm:$0xff] }
  0xda   : > { %8745 = vmatprep.subr.bf16.mxu1 %v12381_v29  ;;  %8663 = vmatpush1.bf16.msra.mxu0 %v8662_v63 }
  0xdb   : > { %769 = vmatprep.subr.mxu0 %v9990_v48  ;;  %v8692_v63 = vpack.c.bf16 %v12409_v55, %v12408_v41  ;;  %v8770_v20 = vpack.c.bf16 %v12415_v21, %v12414_v39  ;;  %v1941_v41 = vsel %vm459_vm5, %v7680_v17, 0 }
  0xdc   : > { %v10282_v23 = vand.u32 4294901760, %v1941_v41 }
  0xdd   : > { %8747 = vmatpush3.bf16.msra.mxu1 %v8746_v51  ;;  %v8767_v51 = vpack.c.bf16 %v12411_v30, %v12410_v56 }
  0xde   : > { %8044 = vmatprep.subr.mxu1 %v12373_v35  ;;  %772 = vmatpush1.msra.mxu0 %v10006_v36 }
  0xdf   : > { %8665 = vmatprep.subr.bf16.mxu0 %v9707_v18  ;;  %822 = vmatmul.mubr.f32.vlgmr.msra.gmra.mrb[0].mxu0 %v9768_v57 }
  0xe0   : > { %8667 = vmatpush1.bf16.msra.mxu0 %v9710_v19  ;;  %910 = vmatprep.mubr.f32.mxu0 %v12373_v35 }
  0xe1   : > { %8045 = vmatpush3.msra.mxu1 %v10025_v12  ;;  %8669 = vmatprep.subr.bf16.mxu0 %v9723_v34 }
  0xe2   : > { %8748 = vmatprep.subr.bf16.mxu1 %v12381_v29  ;;  %8047 = vmatmul.mubr.f32.vlgmr.msra.gmra.mrb[0].mxu1 %v9768_v57  ;;  %v12387_v57 = vld [vmem:[#allocation6_spill] sm:$0xff] }
  0xe3   : > { %8750 = vmatpush3.bf16.msra.mxu1 %v9721_v31  ;;  %8067 = vmatprep.mubr.msk.f32.mxu1 %vm9601_vm1, %v12373_v35 }
  0xe4   : > { %8751 = vmatprep.subr.bf16.mxu1 %v12381_v29  ;;  %8671 = vmatpush1.bf16.msra.mxu0 %v9742_v44 }
  0xe5   : > { %8673 = vmatprep.subr.bf16.mxu0 %v9797_v8 }
  0xe7   : > { %8753 = vmatpush3.bf16.msra.mxu1 %v9762_v52 }
  0xe8   : > { %8754 = vmatprep.subr.bf16.mxu1 %v12381_v29  ;;  %8675 = vmatpush1.bf16.msra.mxu0 %v9830_v27 }
  0xe9   : > { %8677 = vmatprep.subr.bf16.mxu0 %v9899_v43 }
  0xeb   : > { %8756 = vmatpush3.bf16.msra.mxu1 %v9860_v1 }
  0xec   : > { %8757 = vmatprep.subr.bf16.mxu1 %v12381_v29  ;;  %8679 = vmatpush1.bf16.msra.mxu0 %v12387_v57 }
  0xed   : > { %861 = vmatprep.subr.mxu0 %v12388_v6 }
  0xef   : > { %8759 = vmatpush3.bf16.msra.mxu1 %v12389_v28 }
  0xf0   : > { %8065 = vmatprep.subr.mxu1 %v12373_v35  ;;  %863 = vmatpush1.msra.mxu0 %v12392_v42 }
  0xf1   : > { %8681 = vmatprep.subr.bf16.mxu0 %v8680_v32  ;;  %914 = vmatmul.mubr.f32.vlgmr.msra.gmra.mrb[0].mxu0 %v12395_v22 }
  0xf2   : > { %8683 = vmatpush1.bf16.msra.mxu0 %v8682_v0  ;;  %1038 = vmatprep.mubr.f32.mxu0 %v12373_v35 }
  0xf3   : > { %8066 = vmatpush3.msra.mxu1 %v9995_v37  ;;  %8685 = vmatprep.subr.bf16.mxu0 %v8684_v40 }
  0xf4   : > { %8760 = vmatprep.subr.bf16.mxu1 %v12381_v29  ;;  %8068 = vmatmul.mubr.f32.vlgmr.msra.gmra.mrb[0].mxu1 %v12395_v22 }
  0xf5   : > { %8762 = vmatpush3.bf16.msra.mxu1 %v8761_v25  ;;  %8088 = vmatprep.mubr.msk.f32.mxu1 %vm9601_vm1, %v12373_v35 }
  0xf6   : > { %8763 = vmatprep.subr.bf16.mxu1 %v12381_v29  ;;  %8687 = vmatpush1.bf16.msra.mxu0 %v8686_v11 }
  0xf7   : > { %8689 = vmatprep.subr.bf16.mxu0 %v8688_v24 }
  0xf9   : > { %8765 = vmatpush3.bf16.msra.mxu1 %v8764_v13 }
  0xfa   : > { %8766 = vmatprep.subr.bf16.mxu1 %v12381_v29  ;;  %8691 = vmatpush1.bf16.msra.mxu0 %v8690_v38 }
  0xfb   : > { %8693 = vmatprep.subr.bf16.mxu0 %v8692_v63  ;;  %v1923_v63 = vld [vmem:[#allocation2] sm:$0xff] }
  0xfd   : > { %8768 = vmatpush3.bf16.msra.mxu1 %v8767_v51 }
  0xfe   : > { %8769 = vmatprep.subr.bf16.mxu1 %v12381_v29  ;;  %8695 = vmatpush1.bf16.msra.mxu0 %v8694_v33 }
  0xff   : > { %987 = vmatprep.subr.mxu0 %v12416_v26 }
 0x101   : > { %8771 = vmatpush3.bf16.msra.mxu1 %v8770_v20 }
 0x102   : > { %8086 = vmatprep.subr.mxu1 %v12373_v35  ;;  %991 = vmatpush1.msra.mxu0 %v661_v58 }
 0x103   : > { %8697 = vmatprep.subr.bf16.mxu0 %v9707_v18  ;;  %1040 = vmatmul.mubr.f32.vlgmr.msra.gmra.mrb[0].mxu0 %v9744_v45  ;;  %v1690_v18 = vlaneseq }
 0x104   : > { %8699 = vmatpush1.bf16.msra.mxu0 %v9710_v19  ;;  %1128 = vmatprep.mubr.f32.mxu0 %v12373_v35 }
 0x105   : > { %8087 = vmatpush3.msra.mxu1 %v1279_v53  ;;  %8701 = vmatprep.subr.bf16.mxu0 %v9723_v34  ;;  %v1691_v19 = vshrl.u32 %v1690_v18, 7  ;;  %v246_v34 = vld [vmem:[%s12247_s2] sm:$0x7] }
 0x106   : > { %8772 = vmatprep.subr.bf16.mxu1 %v12381_v29  ;;  %8089 = vmatmul.mubr.f32.vlgmr.msra.gmra.mrb[0].mxu1 %v9744_v45 }
 0x107   : > { %8774 = vmatpush3.bf16.msra.mxu1 %v9721_v31  ;;  %8109 = vmatprep.mubr.msk.f32.mxu1 %vm9601_vm1, %v12373_v35  ;;  %v1692_v31 = vsub.s32 0, %v1691_v19 }
 0x108   : > { %8775 = vmatprep.subr.bf16.mxu1 %v12381_v29  ;;  %8703 = vmatpush1.bf16.msra.mxu0 %v9742_v44  ;;  %v1696_v44 = vsub.s32 1, %v1691_v19 }
 0x109   : > { %8705 = vmatprep.subr.bf16.mxu0 %v9797_v8 }
 0x10a   : > { %v10211_v10 = vrot.slane %v246_v34, %v1696_v44 }
 0x10b   : > { %8777 = vmatpush3.bf16.msra.mxu1 %v9762_v52  ;;  %v1700_v52 = vsub.s32 2, %v1691_v19  ;;  %v1925_v19 = vld [vmem:[#allocation2 + $0x10] sm:$0xff] }
 0x10c   : > { %8778 = vmatprep.subr.bf16.mxu1 %v12381_v29  ;;  %8707 = vmatpush1.bf16.msra.mxu0 %v9830_v27  ;;  %12418 = vst [vmem:[#allocation7_spill] sm:$0xff] %v10211_v10 }
 0x10d   : > { %8709 = vmatprep.subr.bf16.mxu0 %v9899_v43  ;;  %v10213_v43 = vrot.slane %v246_v34, %v1700_v52 }
 0x10f   : > { %8780 = vmatpush3.bf16.msra.mxu1 %v9860_v1  ;;  %v10209_v1 = vrot.slane %v246_v34, %v1692_v31  ;;  %12419 = vst [vmem:[#allocation8_spill] sm:$0xff] %v10213_v43 }
 0x110   : > { %8781 = vmatprep.subr.bf16.mxu1 %v12381_v29  ;;  %8711 = vmatpush1.bf16.msra.mxu0 %v12387_v57 }
 0x111   : > { %1079 = vmatprep.subr.mxu0 %v12388_v6  ;;  %12417 = vst [vmem:[#allocation6_spill] sm:$0xff] %v10209_v1 }
 0x113   : > { %8783 = vmatpush3.bf16.msra.mxu1 %v12389_v28 }
 0x114   : > { %8107 = vmatprep.subr.mxu1 %v12373_v35  ;;  %1081 = vmatpush1.msra.mxu0 %v12392_v42 }
 0x115   : > { %1130 = vmatmul.mubr.f32.vlgmr.msra.gmra.mrb[0].mxu0 %v9744_v45 }
 0x116   : > { %2025 = vmatprep.mubr.f32.mxu0 %v12373_v35 }
 0x117   : > { %8108 = vmatpush3.msra.mxu1 %v9995_v37 }
 0x118   : > { %8110 = vmatmul.mubr.f32.vlgmr.msra.gmra.mrb[0].mxu1 %v9744_v45  ;;  %8880 = vmatprep.subr.bf16.mxu1 %v12381_v29 }
 0x119   : > { %8130 = vmatprep.mubr.msk.f32.mxu1 %vm9601_vm1, %v12373_v35 }
 0x1e8   : > { %v1131_v8 = vpop.f32.mrb[0].mxu0 }
 0x1e9   : > { %v1686_v45 = vmax.f32 %v1131_v8, 0.0  ;;  %v1133_v27 = vpop.f32.mrb[1].mxu0 }
 0x1ea   : > { %v1687_v47 = vmax.f32 %v1133_v27, 0.0 }
 0x1eb   : > { %v1682_v7 = vpop.f32.mrb[0].mxu1  ;;  %v1705_v61 = vmul.f32 %v10209_v1, %v1686_v45 }
 0x1ec   : > { %v1688_v48 = vmax.f32 %v1682_v7, 0.0  ;;  %v8111_v3 = vpop.f32.mrb[1].mxu1  ;;  %v1706_v37 = vmul.f32 %v10211_v10, %v1687_v47 }
 0x1ed   : > { %1711 = vrot.lane.b32.xlu0 %v1705_v61, %s9602_s11  ;;  %v10298_v61 = vsub.f32 %v1941_v41, %v10282_v23 }
 0x1ee   : > { %v1707_v36 = vmul.f32 %v10213_v43, %v1688_v48  ;;  %1713 = vrot.lane.b32.xlu1 %v1706_v37, %s9602_s11 }
 0x1f1   : > { %1715 = vrot.lane.b32.xlu0 %v1707_v36, %s9602_s11 }
 0x25f   : > { %v1712_v12 = vpop.permute.xlu0 %1711 }
 0x260   : > { %1724 = vst.msk [vmem:[#allocation3] sm:$0xff] %vm1723_vm11, %v1712_v12  ;;  %v1714_v58 = vpop.permute.xlu1 %1713 }
 0x261   : > { %v1718_v32 = vsel %vm1717_vm13, %v1712_v12, %v1714_v58 }
 0x262   : > { %v1943_v40 = vand.u32 4294901760, %v1718_v32 }
 0x263   : > { %v1716_v53 = vpop.permute.xlu0 %1715 }
 0x264   : > { %v1719_v57 = vsel %vm1717_vm13, %v1714_v58, %v1716_v53  ;;  %v10262_v50 = vsub.f32 %v1718_v32, %v1943_v40 }
 0x265   : > { %1727 = vst.msk [vmem:[#allocation3 + $0x10] sm:$0xff] %vm1726_vm12, %v1719_v57 }
 0x266   : > { %v12282_v26 = vand.u32 4294901760, %v10262_v50 }
 0x267   : > { %v1728_v6 = vld [vmem:[#allocation3] sm:$0xff] }
 0x268   : > { %1760 = vrot.lane.b32.xlu0 %v1728_v6, %s9593_s25  ;;  %1740 = vrot.lane.b32.xlu1 %v1728_v6, %s9591_s24  ;;  %v1945_v25 = vand.u32 4294901760, %v1728_v6 }
 0x26a   : > { %v10268_v38 = vsub.f32 %v1728_v6, %v1945_v25 }
 0x26c   : > { %v1730_v28 = vld [vmem:[#allocation3 + $0x10] sm:$0xff]  ;;  %1800 = vrot.lane.b32.xlu0 %v1728_v6, %s9595_s27  ;;  %1780 = vrot.lane.b32.xlu1 %v1728_v6, %s9594_s26  ;;  %v12279_v18 = vand.u32 4294901760, %v10268_v38 }
 0x26d   : > { %1733 = vst.msk [vmem:[#allocation4 + $0x10] sm:$0xff] %vm261_vm0, %v1730_v28 }
 0x270   : > { %1840 = vrot.lane.b32.xlu0 %v1728_v6, %s9597_s29  ;;  %1820 = vrot.lane.b32.xlu1 %v1728_v6, %s9596_s28 }
 0x274   : > { %1744 = vrot.lane.b32.xlu0 %v1730_v28, %s9591_s24  ;;  %1742 = vrot.lane.b32.xlu1 %v1718_v32, %s9591_s24  ;;  %v1898_v62 = vld [vmem:[#allocation4 + $0x10] sm:$0xff] }
 0x275   : > { %v2617_v11 = vand.u32 4294901760, %v1898_v62 }
 0x277   : > { %v10272_v55 = vsub.f32 %v1898_v62, %v2617_v11 }
 0x278   : > { %1762 = vrot.lane.b32.xlu0 %v1718_v32, %s9593_s25  ;;  %1764 = vrot.lane.b32.xlu1 %v1730_v28, %s9593_s25 }
 0x279   : > { %v12277_v52 = vand.u32 4294901760, %v10272_v55 }
 0x27c   : > { %1782 = vrot.lane.b32.xlu0 %v1718_v32, %s9594_s26  ;;  %1784 = vrot.lane.b32.xlu1 %v1730_v28, %s9594_s26 }
 0x280   : > { %1802 = vrot.lane.b32.xlu0 %v1718_v32, %s9595_s27  ;;  %1804 = vrot.lane.b32.xlu1 %v1730_v28, %s9595_s27 }
 0x284   : > { %1822 = vrot.lane.b32.xlu0 %v1718_v32, %s9596_s28  ;;  %1824 = vrot.lane.b32.xlu1 %v1730_v28, %s9596_s28 }
 0x288   : > { %1842 = vrot.lane.b32.xlu0 %v1718_v32, %s9597_s29  ;;  %1844 = vrot.lane.b32.xlu1 %v1730_v28, %s9597_s29 }
 0x28c   : > { %1862 = vrot.lane.b32.xlu0 %v1718_v32, %s9598_s30  ;;  %1864 = vrot.lane.b32.xlu1 %v1730_v28, %s9598_s30 }
 0x290   : > { %1882 = vrot.lane.b32.xlu0 %v1718_v32, %s9600_s6  ;;  %1860 = vrot.lane.b32.xlu1 %v1728_v6, %s9598_s30  ;;  %v2046_v32 = vsub.f32 %v10268_v38, %v12279_v18 }
 0x294   : > { %1880 = vrot.lane.b32.xlu0 %v1728_v6, %s9600_s6  ;;  %1884 = vrot.lane.b32.xlu1 %v1730_v28, %s9600_s6  ;;  %v10316_v6 = vsub.f32 %v10272_v55, %v12277_v52  ;;  %v2040_v28 = vsub.f32 %v10262_v50, %v12282_v26 }
 0x298   : > { %1929 = vrot.lane.b32.xlu1 %v1923_v63, %s9595_s27  ;;  %1931 = vrot.lane.b32.xlu0 %v1924_v4, %s9595_s27 }
 0x29c   : > { %1933 = vrot.lane.b32.xlu1 %v1925_v19, %s9595_s27 }
 0x2da   : > { %v1761_v42 = vpop.permute.xlu0 %1760  ;;  %v1741_v16 = vpop.permute.xlu1 %1740 }
 0x2de   : > { %v10250_v14 = vpop.permute.xlu0 %1800  ;;  %v1781_v0 = vpop.permute.xlu1 %1780 }
 0x2e2   : > { %v10252_v22 = vpop.permute.xlu0 %1840  ;;  %v10254_v15 = vpop.permute.xlu1 %1820 }
 0x2e6   : > { %v1745_v54 = vpop.permute.xlu0 %1744  ;;  %v1743_v46 = vpop.permute.xlu1 %1742 }
 0x2e7   : > { %1753 = vst.msk [vmem:[#allocation4 + $0x28] sm:$0xff] %vm261_vm0, %v1745_v54  ;;  %v1746_v49 = vsel %vm275_vm2, %v1741_v16, %v1743_v46  ;;  %v1747_v5 = vsel %vm275_vm2, %v1743_v46, %v1745_v54 }
 0x2e8   : > { %v1947_v9 = vand.u32 4294901760, %v1747_v5  ;;  %v1949_v24 = vand.u32 4294901760, %v1746_v49 }
 0x2ea   : > { %v1763_v60 = vpop.permute.xlu0 %1762  ;;  %v1765_v13 = vpop.permute.xlu1 %1764  ;;  %v10264_v2 = vpack.c.bf16 %v1947_v9, %v1943_v40  ;;  %v10266_v59 = vpack.c.bf16 %v1949_v24, %v1945_v25  ;;  %v10279_v51 = vsub.f32 %v1747_v5, %v1947_v9  ;;  %v10285_v20 = vsub.f32 %v1746_v49, %v1949_v24 }
 0x2eb   : > { %1773 = vst.msk [vmem:[#allocation4 + $0x40] sm:$0xff] %vm261_vm0, %v1765_v13  ;;  %v10276_v56 = vsel %vm296_vm3, %v1761_v42, %v1763_v60  ;;  %v1767_v30 = vsel %vm296_vm3, %v1763_v60, %v1765_v13 }
 0x2ec   : > { %8785 = vmatprep.subr.bf16.mxu0 %v10264_v2  ;;  %v1951_v8 = vand.u32 4294901760, %v1767_v30  ;;  %v1953_v27 = vand.u32 4294901760, %v10276_v56  ;;  %v12280_v48 = vand.u32 4294901760, %v10279_v51  ;;  %v12278_v58 = vand.u32 4294901760, %v10285_v20 }
 0x2ed   : > { %8787 = vmatpush1.bf16.msra.mxu0 %v10266_v59 }
 0x2ee   : > { %v1783_v33 = vpop.permute.xlu0 %1782  ;;  %v1785_v39 = vpop.permute.xlu1 %1784  ;;  %v1901_v21 = vld [vmem:[#allocation4 + $0x28] sm:$0xff]  ;;  %v2052_v62 = vsub.f32 %v10279_v51, %v12280_v48  ;;  %v10338_v49 = vsub.f32 %v1767_v30, %v1951_v8  ;;  %v2058_v5 = vsub.f32 %v10285_v20, %v12278_v58  ;;  %v10358_v4 = vsub.f32 %v10276_v56, %v1953_v27 }
 0x2ef   : > { %v1786_v31 = vsel %vm317_vm4, %v1781_v0, %v1783_v33  ;;  %v1787_v34 = vsel %vm317_vm4, %v1783_v33, %v1785_v39  ;;  %1793 = vst.msk [vmem:[#allocation4 + $0x58] sm:$0xff] %vm261_vm0, %v1785_v39  ;;  %v2620_v44 = vand.u32 4294901760, %v1901_v21  ;;  %v10333_v0 = vand.u32 4294901760, %v10298_v61 }
 0x2f0   : > { %v1955_v45 = vand.u32 4294901760, %v1787_v34  ;;  %v1957_v47 = vand.u32 4294901760, %v1786_v31  ;;  %v2053_v33 = vand.u32 4294901760, %v2052_v62 }
 0x2f1   : > { %v10295_v7 = vpack.c.bf16 %v2620_v44, %v2617_v11  ;;  %v10309_v53 = vsub.f32 %v1901_v21, %v2620_v44  ;;  %12420 = vst [vmem:[#allocation9_spill] sm:$0xff] %v10333_v0  ;;  %v2059_v44 = vand.u32 4294901760, %v2058_v5 }
 0x2f2   : > { %v1803_v3 = vpop.permute.xlu0 %1802  ;;  %v1805_v37 = vpop.permute.xlu1 %1804  ;;  %v10302_v36 = vpack.c.bf16 %v1955_v45, %v1951_v8  ;;  %v10304_v12 = vpack.c.bf16 %v1957_v47, %v1953_v27  ;;  %v1904_v57 = vld [vmem:[#allocation4 + $0x40] sm:$0xff]  ;;  %v12281_v8 = vand.u32 4294901760, %v10338_v49 }
 0x2f3   : > { %1813 = vst.msk [vmem:[#allocation4 + $0x70] sm:$0xff] %vm261_vm0, %v1805_v37  ;;  %8882 = vmatpush3.bf16.msra.mxu1 %v10295_v7  ;;  %v10326_v42 = vsel %vm338_vm6, %v10250_v14, %v1803_v3  ;;  %v10329_v16 = vsel %vm338_vm6, %v1803_v3, %v1805_v37  ;;  %v2623_v25 = vand.u32 4294901760, %v1904_v57  ;;  %v10340_v14 = vsub.f32 %v1787_v34, %v1955_v45 }
 0x2f4   : > { %8883 = vmatprep.subr.bf16.mxu1 %v12381_v29  ;;  %8789 = vmatprep.subr.bf16.mxu0 %v10302_v36  ;;  %v12276_v24 = vand.u32 4294901760, %v10309_v53  ;;  %v1959_v60 = vand.u32 4294901760, %v10329_v16  ;;  %v1961_v41 = vand.u32 4294901760, %v10326_v42  ;;  %v10372_v45 = vsub.f32 %v1786_v31, %v1957_v47 }
 0x2f5   : > { %8791 = vmatpush1.bf16.msra.mxu0 %v10304_v12  ;;  %v2041_v3 = vand.u32 4294901760, %v2040_v28  ;;  %v2047_v37 = vand.u32 4294901760, %v2046_v32  ;;  %v12285_v62 = vand.u32 4294901760, %v10340_v14  ;;  %v2705_v31 = vand.u32 4294901760, %v10316_v6 }
 0x2f6   : > { %v1823_v40 = vpop.permute.xlu0 %1822  ;;  %v1825_v54 = vpop.permute.xlu1 %1824  ;;  %v1907_v46 = vld [vmem:[#allocation4 + $0x58] sm:$0xff]  ;;  %v2711_v56 = vsub.f32 %v10309_v53, %v12276_v24  ;;  %v2064_v28 = vsub.f32 %v10338_v49, %v12281_v8 }
 0x2f7   : > { %v10347_v11 = vsel %vm359_vm7, %v10254_v15, %v1823_v40  ;;  %v1827_v17 = vsel %vm359_vm7, %v1823_v40, %v1825_v54  ;;  %1833 = vst.msk [vmem:[#allocation4 + $0x88] sm:$0xff] %vm261_vm0, %v1825_v54  ;;  %v2626_v9 = vand.u32 4294901760, %v1907_v46  ;;  %v2029_v15 = vsub.f32 %v10298_v61, %v10333_v0 }
 0x2f8   : > { %v1963_v13 = vand.u32 4294901760, %v1827_v17  ;;  %v1965_v63 = vand.u32 4294901760, %v10347_v11  ;;  %v10378_v54 = vsub.f32 %v1904_v57, %v2623_v25  ;;  %v10384_v58 = vpack.c.bf16 %v2053_v33, %v2041_v3 }
 0x2f9   : > { %v10355_v30 = vpack.c.bf16 %v2626_v9, %v2623_v25  ;;  %v10381_v5 = vand.u32 4294901760, %v2029_v15  ;;  %v10386_v18 = vpack.c.bf16 %v2059_v44, %v2047_v37  ;;  %v2712_v6 = vand.u32 4294901760, %v2711_v56 }
 0x2fa   : > { %v1843_v39 = vpop.permute.xlu0 %1842  ;;  %v1845_v21 = vpop.permute.xlu1 %1844  ;;  %v10362_v19 = vpack.c.bf16 %v1963_v13, %v1959_v60  ;;  %v10364_v34 = vpack.c.bf16 %v1965_v63, %v1961_v41  ;;  %v1910_v27 = vld [vmem:[#allocation4 + $0x70] sm:$0xff]  ;;  %v2076_v33 = vsub.f32 %v10340_v14, %v12285_v62  ;;  %v10400_v37 = vsub.f32 %v1907_v46, %v2626_v9 }
 0x2fb   : > { %1853 = vst.msk [vmem:[#allocation4 + $0xa0] sm:$0xff] %vm261_vm0, %v1845_v21  ;;  %8885 = vmatpush3.bf16.msra.mxu1 %v10355_v30  ;;  %v1847_v40 = vsel %vm380_vm8, %v1843_v39, %v1845_v21  ;;  %v2629_v25 = vand.u32 4294901760, %v1910_v27  ;;  %v1846_v3 = vsel %vm380_vm8, %v10252_v22, %v1843_v39  ;;  %v10406_v56 = vsub.f32 %v10329_v16, %v1959_v60 }
 0x2fc   : > { %8886 = vmatprep.subr.bf16.mxu1 %v12381_v29  ;;  %8793 = vmatprep.subr.bf16.mxu0 %v10362_v19  ;;  %v1967_v21 = vand.u32 4294901760, %v1847_v40  ;;  %v10408_v43 = vsub.f32 %v1827_v17, %v1963_v13  ;;  %v10411_v62 = vsub.f32 %v10326_v42, %v1961_v41  ;;  %v10417_v46 = vpack.c.bf16 %v2712_v6, %v2705_v31 }
 0x2fd   : > { %8795 = vmatpush1.bf16.msra.mxu0 %v10364_v34  ;;  %v2065_v9 = vand.u32 4294901760, %v2064_v28  ;;  %v12423_v39 = vand.u32 4294901760, %v10358_v4  ;;  %v10425_v16 = vsub.f32 %v10347_v11, %v1965_v63  ;;  %v1969_v17 = vand.u32 4294901760, %v1846_v3 }
 0x2fe   : > { %v1863_v47 = vpop.permute.xlu0 %1862  ;;  %v1865_v24 = vpop.permute.xlu1 %1864  ;;  %v1913_v52 = vld [vmem:[#allocation4 + $0x88] sm:$0xff]  ;;  %v2077_v13 = vand.u32 4294901760, %v2076_v33  ;;  %v10429_v41 = vsub.f32 %v1910_v27, %v2629_v25  ;;  %v12424_v31 = vand.u32 4294901760, %v10378_v54  ;;  %v12425_v11 = vand.u32 4294901760, %v10372_v45 }
 0x2ff   : > { %v1867_v32 = vsel %vm401_vm9, %v1863_v47, %v1865_v24  ;;  %1873 = vst.msk [vmem:[#allocation4 + $0xb8] sm:$0xff] %vm261_vm0, %v1865_v24  ;;  %v2632_v15 = vand.u32 4294901760, %v1913_v52  ;;  %v10422_v24 = vsub.f32 %v10358_v4, %v12423_v39  ;;  %v10440_v10 = vsub.f32 %v1847_v40, %v1967_v21 }
 0x300   : > { %v1971_v48 = vand.u32 4294901760, %v1867_v32  ;;  %v2082_v63 = vsub.f32 %v10372_v45, %v12425_v11 }
 0x301   : > { %v10402_v8 = vpack.c.bf16 %v2632_v15, %v2629_v25  ;;  %v10450_v11 = vsub.f32 %v1913_v52, %v2632_v15  ;;  %v12430_v15 = vand.u32 4294901760, %v10408_v43 }
 0x302   : > { %v1883_v26 = vpop.permute.xlu0 %1882  ;;  %v1861_v57 = vpop.permute.xlu1 %1860  ;;  %v10413_v44 = vpack.c.bf16 %v1971_v48, %v1967_v21  ;;  %v1916_v42 = vld [vmem:[#allocation4 + $0xa0] sm:$0xff]  ;;  %v10442_v1 = vsub.f32 %v1867_v32, %v1971_v48  ;;  %v12432_v32 = vand.u32 4294901760, %v10425_v16 }
 0x303   : > { %12421 = vst [vmem:[#allocation5_spill] sm:$0xff] %v10402_v8  ;;  %v1866_v22 = vsel %vm401_vm9, %v1861_v57, %v1863_v47  ;;  %8888 = vmatpush3.bf16.msra.mxu1 %v10402_v8  ;;  %v10434_v47 = vsub.f32 %v10378_v54, %v12424_v31  ;;  %v2635_v28 = vand.u32 4294901760, %v1916_v42  ;;  %v12433_v8 = vand.u32 4294901760, %v10411_v62 }
 0x304   : > { %12422 = vst [vmem:[#allocation10_spill] sm:$0xff] %v10413_v44  ;;  %8889 = vmatprep.subr.bf16.mxu1 %v12381_v29  ;;  %8797 = vmatprep.subr.bf16.mxu0 %v10413_v44  ;;  %v1973_v60 = vand.u32 4294901760, %v1866_v22 }
 0x306   : > { %v1881_v57 = vpop.permute.xlu0 %1880  ;;  %v1885_v6 = vpop.permute.xlu1 %1884  ;;  %v1919_v39 = vld [vmem:[#allocation4 + $0xb8] sm:$0xff]  ;;  %v10444_v27 = vpack.c.bf16 %v1973_v60, %v1969_v17  ;;  %v10459_v25 = vsub.f32 %v1866_v22, %v1973_v60  ;;  %v10473_v22 = vsub.f32 %v1846_v3, %v1969_v17  ;;  %v2071_v60 = vand.u32 4294901760, %v10422_v24 }
 0x307   : > { %v1886_v33 = vsel %vm422_vm10, %v1881_v57, %v1883_v26  ;;  %v1887_v31 = vsel %vm422_vm10, %v1883_v26, %v1885_v6  ;;  %1893 = vst.msk [vmem:[#allocation4 + $0xd0] sm:$0xff] %vm261_vm0, %v1885_v6  ;;  %v2638_v0 = vand.u32 4294901760, %v1919_v39  ;;  %v8804_v57 = vpack.c.bf16 %v2077_v13, %v2065_v9 }
 0x308   : > { %12426 = vst [vmem:[#allocation11_spill] sm:$0xff] %v10444_v27  ;;  %8799 = vmatpush1.bf16.msra.mxu0 %v10444_v27  ;;  %v10453_v40 = vand.u32 4294901760, %v1887_v31  ;;  %v12428_v26 = vand.u32 4294901760, %v10400_v37  ;;  %v10465_v52 = vand.u32 4294901760, %v1886_v33  ;;  %v2100_v27 = vsub.f32 %v10408_v43, %v12430_v15 }
 0x309   : > { %v10457_v21 = vpack.c.bf16 %v2638_v0, %v2635_v28  ;;  %v2719_v9 = vand.u32 4294901760, %v10434_v47  ;;  %v2083_v13 = vand.u32 4294901760, %v2082_v63  ;;  %v2106_v3 = vsub.f32 %v10425_v16, %v12432_v32 }
 0x30a   : > { %v2725_v6 = vsub.f32 %v10400_v37, %v12428_v26  ;;  %1976 = vmatprep.subr.mxu0 %v10453_v40  ;;  %12429 = vst [vmem:[#allocation13_spill] sm:$0xff] %v10465_v52  ;;  %v12431_v26 = vand.u32 4294901760, %v10406_v56  ;;  %v10487_v47 = vsub.f32 %v1919_v39, %v2638_v0  ;;  %v2101_v48 = vand.u32 4294901760, %v2100_v27 }
 0x30b   : > { %12427 = vst [vmem:[#allocation12_spill] sm:$0xff] %v10457_v21  ;;  %8891 = vmatpush3.bf16.msra.mxu1 %v10457_v21  ;;  %v2094_v32 = vsub.f32 %v10411_v62, %v12433_v8  ;;  %v12434_v0 = vand.u32 4294901760, %v10442_v1  ;;  %v12302_v27 = vand.u32 4294901760, %v10473_v22  ;;  %v12435_v8 = vand.u32 4294901760, %v10450_v11 }
 0x30c   : > { %8128 = vmatprep.subr.mxu1 %v12373_v35  ;;  %1978 = vmatpush1.msra.mxu0 %v10465_v52  ;;  %v2088_v15 = vsub.f32 %v10406_v56, %v12431_v26  ;;  %v2726_v24 = vand.u32 4294901760, %v2725_v6  ;;  %v10504_v6 = vsub.f32 %v1916_v42, %v2635_v28  ;;  %v2107_v44 = vand.u32 4294901760, %v2106_v3 }
 0x30d   : > { %8801 = vmatprep.subr.bf16.mxu0 %v10384_v58  ;;  %2031 = vmatmul.mubr.f32.vlgmr.msra.gmra.mrb[2].mxu0 %v10381_v5  ;;  %v2124_v39 = vsub.f32 %v10442_v1, %v12434_v0  ;;  %v10501_v58 = vsub.f32 %v1887_v31, %v10453_v40  ;;  %v2739_v17 = vsub.f32 %v10450_v11, %v12435_v8  ;;  %v12436_v0 = vand.u32 4294901760, %v10440_v10 }
 0x30e   : > { %v1922_v26 = vld [vmem:[#allocation4 + $0xd0] sm:$0xff]  ;;  %8803 = vmatpush1.bf16.msra.mxu0 %v10386_v18  ;;  %2191 = vmatprep.mubr.f32.mxu0 %v12373_v35  ;;  %v8806_v18 = vpack.c.bf16 %v2083_v13, %v2071_v60  ;;  %v2089_v63 = vand.u32 4294901760, %v2088_v15  ;;  %v10517_v42 = vsub.f32 %v1886_v33, %v10465_v52  ;;  %v12437_v28 = vand.u32 4294901760, %v10429_v41 }
 0x30f   : > { %v10506_v21 = vand.u32 4294901760, %v1922_v26  ;;  %8805 = vmatprep.subr.bf16.mxu0 %v8804_v57  ;;  %v2112_v31 = vsub.f32 %v10440_v10, %v12436_v0  ;;  %v12438_v13 = vand.u32 4294901760, %v10459_v25  ;;  %v2095_v8 = vand.u32 4294901760, %v2094_v32 }
 0x310   : > { %v2732_v57 = vsub.f32 %v10429_v41, %v12437_v28  ;;  %v8808_v3 = vpack.c.bf16 %v2101_v48, %v2089_v63  ;;  %v2125_v0 = vand.u32 4294901760, %v2124_v39  ;;  %v2135_v33 = vand.u32 4294901760, %v10501_v58 }
 0x311   : > { %8129 = vmatpush3.msra.mxu1 %v10506_v21  ;;  %v2130_v15 = vsub.f32 %v10459_v25, %v12438_v13  ;;  %v2118_v60 = vsub.f32 %v10473_v22, %v12302_v27  ;;  %v8896_v13 = vpack.c.bf16 %v2726_v24, %v2719_v9  ;;  %v2740_v52 = vand.u32 4294901760, %v2739_v17 }
 0x312   : > { %8892 = vmatprep.subr.bf16.mxu1 %v12381_v29  ;;  %8131 = vmatmul.mubr.f32.vlgmr.msra.gmra.mrb[2].mxu1 %v10381_v5  ;;  %v8810_v5 = vpack.c.bf16 %v2107_v44, %v2095_v8  ;;  %v2113_v48 = vand.u32 4294901760, %v2112_v31  ;;  %v10536_v63 = vsub.f32 %v1922_v26, %v10506_v21  ;;  %v12439_v32 = vand.u32 4294901760, %v10487_v47 }
 0x313   : > { %8894 = vmatpush3.bf16.msra.mxu1 %v10417_v46  ;;  %8807 = vmatpush1.bf16.msra.mxu0 %v8806_v18  ;;  %v2131_v39 = vand.u32 4294901760, %v2130_v15  ;;  %v2141_v18 = vand.u32 4294901760, %v10517_v42  ;;  %v2733_v27 = vand.u32 4294901760, %v2732_v57  ;;  %v2136_v44 = vsub.f32 %v10501_v58, %v2135_v33 }
 0x314   : > { %8895 = vmatprep.subr.bf16.mxu1 %v12381_v29  ;;  %8809 = vmatprep.subr.bf16.mxu0 %v8808_v3  ;;  %v2753_v46 = vsub.f32 %v10487_v47, %v12439_v32  ;;  %v8812_v28 = vpack.c.bf16 %v2125_v0, %v2113_v48  ;;  %v12440_v9 = vand.u32 4294901760, %v10504_v6  ;;  %v2119_v24 = vand.u32 4294901760, %v2118_v60 }
 0x315   : > { %8151 = vmatprep.mubr.msk.f32.mxu1 %vm9601_vm1, %v12373_v35  ;;  %v8899_v26 = vpack.c.bf16 %v2740_v52, %v2733_v27  ;;  %v2759_v57 = vand.u32 4294901760, %v10536_v63  ;;  %v2142_v3 = vsub.f32 %v10517_v42, %v2141_v18  ;;  %v2137_v8 = vand.u32 4294901760, %v2136_v44 }
 0x316   : > { %v2746_v17 = vsub.f32 %v10504_v6, %v12440_v9  ;;  %v2754_v31 = vand.u32 4294901760, %v2753_v46  ;;  %v8814_v15 = vpack.c.bf16 %v2131_v39, %v2119_v24  ;;  %v8820_v48 = vpack.c.bf16 %v10340_v14, %v10338_v49 }
 0x317   : > { %8897 = vmatpush3.bf16.msra.mxu1 %v8896_v13  ;;  %8811 = vmatpush1.bf16.msra.mxu0 %v8810_v5  ;;  %v2760_v52 = vsub.f32 %v10536_v63, %v2759_v57  ;;  %v2143_v27 = vand.u32 4294901760, %v2142_v3  ;;  %v8818_v13 = vpack.c.bf16 %v10285_v20, %v10268_v38  ;;  %v8905_v32 = vpack.c.bf16 %v10309_v53, %v10272_v55  ;;  %v12443_v3 = vld [vmem:[#allocation11_spill] sm:$0xff] }
 0x318   : > { %8898 = vmatprep.subr.bf16.mxu1 %v12381_v29  ;;  %8813 = vmatprep.subr.bf16.mxu0 %v8812_v28  ;;  %v2747_v0 = vand.u32 4294901760, %v2746_v17  ;;  %v8816_v28 = vpack.c.bf16 %v10279_v51, %v10262_v50  ;;  %v8822_v46 = vpack.c.bf16 %v10372_v45, %v10358_v4  ;;  %v8824_v39 = vpack.c.bf16 %v10408_v43, %v10406_v56 }
 0x319   : > { %v2761_v5 = vand.u32 4294901760, %v2760_v52  ;;  %v8908_v44 = vpack.c.bf16 %v10400_v37, %v10378_v54  ;;  %v8826_v9 = vpack.c.bf16 %v10425_v16, %v10411_v62  ;;  %v8828_v17 = vpack.c.bf16 %v10442_v1, %v10440_v10 }
 0x31a   : > { %v8902_v60 = vpack.c.bf16 %v2754_v31, %v2747_v0  ;;  %v8911_v24 = vpack.c.bf16 %v10450_v11, %v10429_v41  ;;  %v8914_v31 = vpack.c.bf16 %v10487_v47, %v10504_v6  ;;  %v12445_v0 = vand.u32 4294901760, %v10262_v50 }
 0x31b   : > { %8900 = vmatpush3.bf16.msra.mxu1 %v8899_v26  ;;  %8815 = vmatpush1.bf16.msra.mxu0 %v8814_v15  ;;  %v8830_v26 = vpack.c.bf16 %v10459_v25, %v10473_v22  ;;  %v12441_v15 = vld [vmem:[#allocation10_spill] sm:$0xff] }
 0x31c   : > { %8901 = vmatprep.subr.bf16.mxu1 %v12381_v29  ;;  %2138 = vmatprep.subr.mxu0 %v2137_v8  ;;  %v12444_v8 = vld [vmem:[#allocation12_spill] sm:$0xff] }
 0x31f   : > { %8903 = vmatpush3.bf16.msra.mxu1 %v8902_v60  ;;  %2144 = vmatpush1.msra.mxu0 %v2143_v27  ;;  %v12446_v60 = vand.u32 4294901760, %v10279_v51  ;;  %v12447_v27 = vld [vmem:[#allocation13_spill] sm:$0xff]  ;;  %v12453_v51 = vand.u32 4294901760, %v10272_v55  ;;  %v12459_v55 = vand.u32 4294901760, %v10378_v54  ;;  %v12465_v54 = vand.u32 4294901760, %v10429_v41 }
 0x320   : > { %8149 = vmatprep.subr.mxu1 %v12373_v35  ;;  %8817 = vmatprep.subr.bf16.mxu0 %v8816_v28  ;;  %v12448_v28 = vand.u32 4294901760, %v10268_v38  ;;  %v12454_v38 = vand.u32 4294901760, %v10309_v53  ;;  %v12460_v53 = vand.u32 4294901760, %v10400_v37  ;;  %v12466_v37 = vand.u32 4294901760, %v10450_v11 }
 0x321   : > { %2193 = vmatmul.mubr.f32.vlgmr.msra.gmra.mrb[2].mxu0 %v10282_v23  ;;  %v8848_v52 = vpack.c.bf16 %v12446_v60, %v12445_v0 }
 0x322   : > { %8819 = vmatpush1.bf16.msra.mxu0 %v8818_v13  ;;  %2299 = vmatprep.mubr.f32.mxu0 %v12373_v35  ;;  %v12449_v13 = vand.u32 4294901760, %v10285_v20  ;;  %v12455_v20 = vand.u32 4294901760, %v10358_v4  ;;  %v8932_v4 = vpack.c.bf16 %v12460_v53, %v12459_v55  ;;  %v8935_v0 = vpack.c.bf16 %v12466_v37, %v12465_v54 }
 0x323   : > { %8150 = vmatpush3.msra.mxu1 %v2761_v5  ;;  %8821 = vmatprep.subr.bf16.mxu0 %v8820_v48  ;;  %v12450_v48 = vld [vmem:[#allocation9_spill] sm:$0xff] }
 0x324   : > { %8904 = vmatprep.subr.bf16.mxu1 %v12381_v29  ;;  %8152 = vmatmul.mubr.f32.vlgmr.msra.gmra.mrb[2].mxu1 %v10282_v23  ;;  %v8850_v5 = vpack.c.bf16 %v12449_v13, %v12448_v28 }
 0x325   : > { %8906 = vmatpush3.bf16.msra.mxu1 %v8905_v32  ;;  %8172 = vmatprep.mubr.msk.f32.mxu1 %vm9601_vm1, %v12373_v35  ;;  %v12451_v32 = vand.u32 4294901760, %v10338_v49  ;;  %v12456_v49 = vand.u32 4294901760, %v10372_v45  ;;  %v12461_v45 = vand.u32 4294901760, %v10411_v62  ;;  %v12467_v62 = vand.u32 4294901760, %v10473_v22  ;;  %v12471_v22 = vld [vmem:[#allocation6_spill] sm:$0xff] }
 0x326   : > { %8907 = vmatprep.subr.bf16.mxu1 %v12381_v29  ;;  %8823 = vmatpush1.bf16.msra.mxu0 %v8822_v46  ;;  %v12452_v46 = vand.u32 4294901760, %v10340_v14 }
 0x327   : > { %8825 = vmatprep.subr.bf16.mxu0 %v8824_v39  ;;  %v8929_v39 = vpack.c.bf16 %v12454_v38, %v12453_v51  ;;  %v8854_v14 = vpack.c.bf16 %v12456_v49, %v12455_v20 }
 0x328   : > { %v8852_v50 = vpack.c.bf16 %v12452_v46, %v12451_v32 }
 0x329   : > { %8909 = vmatpush3.bf16.msra.mxu1 %v8908_v44  ;;  %v12457_v44 = vand.u32 4294901760, %v10406_v56 }
 0x32a   : > { %8910 = vmatprep.subr.bf16.mxu1 %v12381_v29  ;;  %8827 = vmatpush1.bf16.msra.mxu0 %v8826_v9  ;;  %v12458_v9 = vand.u32 4294901760, %v10408_v43  ;;  %v12463_v43 = vand.u32 4294901760, %v10440_v10  ;;  %v12470_v10 = vand.u32 4294901760, %v10487_v47 }
 0x32b   : > { %8829 = vmatprep.subr.bf16.mxu0 %v8828_v17 }
 0x32c   : > { %v8856_v17 = vpack.c.bf16 %v12458_v9, %v12457_v44  ;;  %v7681_v9 = vld [vmem:[%s12246_s1 + $0x10] sm:$0xff] }
 0x32d   : > { %8912 = vmatpush3.bf16.msra.mxu1 %v8911_v24  ;;  %v12462_v24 = vand.u32 4294901760, %v10425_v16  ;;  %v12468_v16 = vand.u32 4294901760, %v10459_v25 }
 0x32e   : > { %8913 = vmatprep.subr.bf16.mxu1 %v12381_v29  ;;  %8831 = vmatpush1.bf16.msra.mxu0 %v8830_v26  ;;  %v12464_v26 = vand.u32 4294901760, %v10442_v1  ;;  %v12469_v1 = vand.u32 4294901760, %v10504_v6  ;;  %v12472_v6 = vld [vmem:[#allocation7_spill] sm:$0xff] }
 0x32f   : > { %2249 = vmatprep.subr.mxu0 %v10501_v58  ;;  %v8858_v56 = vpack.c.bf16 %v12462_v24, %v12461_v45  ;;  %v8862_v60 = vpack.c.bf16 %v12468_v16, %v12467_v62 }
 0x331   : > { %8915 = vmatpush3.bf16.msra.mxu1 %v8914_v31  ;;  %v8860_v31 = vpack.c.bf16 %v12464_v26, %v12463_v43  ;;  %v3385_v26 = vsel %vm459_vm5, %v7681_v9, 0 }
 0x332   : > { %8170 = vmatprep.subr.mxu1 %v12373_v35  ;;  %2252 = vmatpush1.msra.mxu0 %v10517_v42  ;;  %v10784_v62 = vand.u32 4294901760, %v3385_v26 }
 0x333   : > { %8833 = vmatprep.subr.bf16.mxu0 %v10264_v2  ;;  %2302 = vmatmul.mubr.f32.vlgmr.msra.gmra.mrb[2].mxu0 %v10298_v61 }
 0x334   : > { %8835 = vmatpush1.bf16.msra.mxu0 %v10266_v59  ;;  %2390 = vmatprep.mubr.f32.mxu0 %v12373_v35 }
 0x335   : > { %8171 = vmatpush3.msra.mxu1 %v10536_v63  ;;  %8837 = vmatprep.subr.bf16.mxu0 %v10302_v36 }
 0x336   : > { %8916 = vmatprep.subr.bf16.mxu1 %v12381_v29  ;;  %8173 = vmatmul.mubr.f32.vlgmr.msra.gmra.mrb[2].mxu1 %v10298_v61  ;;  %v12442_v61 = vld [vmem:[#allocation5_spill] sm:$0xff] }
 0x337   : > { %8918 = vmatpush3.bf16.msra.mxu1 %v10295_v7  ;;  %8193 = vmatprep.mubr.msk.f32.mxu1 %vm9601_vm1, %v12373_v35 }
 0x338   : > { %8919 = vmatprep.subr.bf16.mxu1 %v12381_v29  ;;  %8839 = vmatpush1.bf16.msra.mxu0 %v10304_v12 }
 0x339   : > { %8841 = vmatprep.subr.bf16.mxu0 %v10362_v19 }
 0x33b   : > { %8921 = vmatpush3.bf16.msra.mxu1 %v10355_v30 }
 0x33c   : > { %8922 = vmatprep.subr.bf16.mxu1 %v12381_v29  ;;  %8843 = vmatpush1.bf16.msra.mxu0 %v10364_v34 }
 0x33d   : > { %8845 = vmatprep.subr.bf16.mxu0 %v12441_v15 }
 0x33f   : > { %8924 = vmatpush3.bf16.msra.mxu1 %v12442_v61 }
 0x340   : > { %8925 = vmatprep.subr.bf16.mxu1 %v12381_v29  ;;  %8847 = vmatpush1.bf16.msra.mxu0 %v12443_v3 }
 0x341   : > { %2341 = vmatprep.subr.mxu0 %v10453_v40 }
 0x343   : > { %8927 = vmatpush3.bf16.msra.mxu1 %v12444_v8 }
 0x344   : > { %8191 = vmatprep.subr.mxu1 %v12373_v35  ;;  %2343 = vmatpush1.msra.mxu0 %v12447_v27 }
 0x345   : > { %8849 = vmatprep.subr.bf16.mxu0 %v8848_v52  ;;  %2394 = vmatmul.mubr.f32.vlgmr.msra.gmra.mrb[2].mxu0 %v12450_v48  ;;  %v8938_v52 = vpack.c.bf16 %v12470_v10, %v12469_v1 }
 0x346   : > { %8851 = vmatpush1.bf16.msra.mxu0 %v8850_v5  ;;  %2518 = vmatprep.mubr.f32.mxu0 %v12373_v35 }
 0x347   : > { %8192 = vmatpush3.msra.mxu1 %v10506_v21  ;;  %8853 = vmatprep.subr.bf16.mxu0 %v8852_v50 }
 0x348   : > { %8928 = vmatprep.subr.bf16.mxu1 %v12381_v29  ;;  %8194 = vmatmul.mubr.f32.vlgmr.msra.gmra.mrb[2].mxu1 %v12450_v48 }
 0x349   : > { %8930 = vmatpush3.bf16.msra.mxu1 %v8929_v39  ;;  %8214 = vmatprep.mubr.msk.f32.mxu1 %vm9601_vm1, %v12373_v35 }
 0x34a   : > { %8931 = vmatprep.subr.bf16.mxu1 %v12381_v29  ;;  %8855 = vmatpush1.bf16.msra.mxu0 %v8854_v14 }
 0x34b   : > { %8857 = vmatprep.subr.bf16.mxu0 %v8856_v17 }
 0x34d   : > { %8933 = vmatpush3.bf16.msra.mxu1 %v8932_v4 }
 0x34e   : > { %8934 = vmatprep.subr.bf16.mxu1 %v12381_v29  ;;  %8859 = vmatpush1.bf16.msra.mxu0 %v8858_v56 }
 0x34f   : > { %8861 = vmatprep.subr.bf16.mxu0 %v8860_v31 }
 0x351   : > { %8936 = vmatpush3.bf16.msra.mxu1 %v8935_v0 }
 0x352   : > { %8937 = vmatprep.subr.bf16.mxu1 %v12381_v29  ;;  %8863 = vmatpush1.bf16.msra.mxu0 %v8862_v60 }
 0x353   : > { %2467 = vmatprep.subr.mxu0 %v2135_v33  ;;  %v12473_v33 = vld [vmem:[#allocation8_spill] sm:$0xff] }
 0x355   : > { %8939 = vmatpush3.bf16.msra.mxu1 %v8938_v52 }
 0x356   : > { %8212 = vmatprep.subr.mxu1 %v12373_v35  ;;  %2471 = vmatpush1.msra.mxu0 %v2141_v18 }
 0x357   : > { %8865 = vmatprep.subr.bf16.mxu0 %v10264_v2  ;;  %2520 = vmatmul.mubr.f32.vlgmr.msra.gmra.mrb[2].mxu0 %v10282_v23  ;;  %v1930_v2 = vpop.permute.xlu1 %1929 }
 0x358   : > { %8867 = vmatpush1.bf16.msra.mxu0 %v10266_v59  ;;  %2608 = vmatprep.mubr.f32.mxu0 %v12373_v35  ;;  %v1932_v59 = vpop.permute.xlu0 %1931 }
 0x359   : > { %8213 = vmatpush3.msra.mxu1 %v2759_v57  ;;  %8869 = vmatprep.subr.bf16.mxu0 %v10302_v36  ;;  %v1935_v36 = vsel %vm338_vm6, %v1930_v2, %v1932_v59 }
 0x35a   : > { %8940 = vmatprep.subr.bf16.mxu1 %v12381_v29  ;;  %8215 = vmatmul.mubr.f32.vlgmr.msra.gmra.mrb[2].mxu1 %v10282_v23 }
 0x35b   : > { %8942 = vmatpush3.bf16.msra.mxu1 %v10295_v7  ;;  %8235 = vmatprep.mubr.msk.f32.mxu1 %vm9601_vm1, %v12373_v35  ;;  %v1934_v7 = vpop.permute.xlu1 %1933 }
 0x35c   : > { %8943 = vmatprep.subr.bf16.mxu1 %v12381_v29  ;;  %8871 = vmatpush1.bf16.msra.mxu0 %v10304_v12  ;;  %v1936_v12 = vsel %vm338_vm6, %v1932_v59, %v1934_v7 }
 0x35d   : > { %8873 = vmatprep.subr.bf16.mxu0 %v10362_v19 }
 0x35f   : > { %8945 = vmatpush3.bf16.msra.mxu1 %v10355_v30 }
 0x360   : > { %8946 = vmatprep.subr.bf16.mxu1 %v12381_v29  ;;  %8875 = vmatpush1.bf16.msra.mxu0 %v10364_v34 }
 0x361   : > { %8877 = vmatprep.subr.bf16.mxu0 %v12441_v15 }
 0x363   : > { %8948 = vmatpush3.bf16.msra.mxu1 %v12442_v61 }
 0x364   : > { %8949 = vmatprep.subr.bf16.mxu1 %v12381_v29  ;;  %8879 = vmatpush1.bf16.msra.mxu0 %v12443_v3 }
 0x365   : > { %2559 = vmatprep.subr.mxu0 %v10453_v40 }
 0x367   : > { %8951 = vmatpush3.bf16.msra.mxu1 %v12444_v8 }
 0x368   : > { %8233 = vmatprep.subr.mxu1 %v12373_v35  ;;  %2561 = vmatpush1.msra.mxu0 %v12447_v27 }
 0x369   : > { %2610 = vmatmul.mubr.f32.vlgmr.msra.gmra.mrb[2].mxu0 %v10282_v23 }
 0x36a   : > { %3469 = vmatprep.mubr.f32.mxu0 %v12373_v35 }
 0x36b   : > { %8234 = vmatpush3.msra.mxu1 %v10506_v21 }
 0x36c   : > { %8236 = vmatmul.mubr.f32.vlgmr.msra.gmra.mrb[2].mxu1 %v10282_v23  ;;  %9048 = vmatprep.subr.bf16.mxu1 %v12381_v29 }
 0x36d   : > { %8256 = vmatprep.mubr.msk.f32.mxu1 %vm9601_vm1, %v12373_v35 }
 0x43c   : > { %v2611_v30 = vpop.f32.mrb[2].mxu0 }
 0x43d   : > { %v9456_v19 = vadd.f32 %v2611_v30, %v1935_v36  ;;  %v2613_v34 = vpop.f32.mrb[3].mxu0 }
 0x43e   : > { %v9457_v41 = vadd.f32 %v2613_v34, %v1936_v12 }
 0x43f   : > { %v3162_v25 = vpop.f32.mrb[2].mxu1  ;;  %v3166_v11 = vmax.f32 %v9456_v19, 0.0 }
 0x440   : > { %v9458_v40 = vadd.f32 %v3162_v25, %v1934_v7  ;;  %v8237_v23 = vpop.f32.mrb[3].mxu1  ;;  %v3167_v21 = vmax.f32 %v9457_v41, 0.0 }
 0x441   : > { %v3169_v47 = vmul.f32 %v3166_v11, %v12471_v22  ;;  %v10797_v11 = vsub.f32 %v3385_v26, %v10784_v62 }
 0x442   : > { %v3168_v58 = vmax.f32 %v9458_v40, 0.0  ;;  %v3170_v42 = vmul.f32 %v3167_v21, %v12472_v6 }
 0x443   : > { %3175 = vrot.lane.b32.xlu0 %v3169_v47, %s9602_s11 }
 0x444   : > { %3177 = vrot.lane.b32.xlu1 %v3170_v42, %s9602_s11  ;;  %v3171_v63 = vmul.f32 %v3168_v58, %v12473_v33 }
 0x447   : > { %3179 = vrot.lane.b32.xlu0 %v3171_v63, %s9602_s11 }
 0x4b5   : > { %v3176_v18 = vpop.permute.xlu0 %3175 }
 0x4b6   : > { %3186 = vst.msk [vmem:[#allocation2] sm:$0xff] %vm1723_vm11, %v3176_v18  ;;  %v3178_v57 = vpop.permute.xlu1 %3177 }
 0x4b7   : > { %v3181_v15 = vsel %vm1717_vm13, %v3176_v18, %v3178_v57 }
 0x4b8   : > { %3187 = vst [vmem:[#allocation2 + $0x8] sm:$0xff] %v3181_v15  ;;  %v3387_v51 = vand.u32 4294901760, %v3181_v15 }
 0x4b9   : > { %v3180_v61 = vpop.permute.xlu0 %3179 }
 0x4ba   : > { %v3182_v3 = vsel %vm1717_vm13, %v3178_v57, %v3180_v61  ;;  %v10766_v53 = vsub.f32 %v3181_v15, %v3387_v51 }
 0x4bb   : > { %3188 = vst.msk [vmem:[#allocation2 + $0x10] sm:$0xff] %vm1726_vm12, %v3182_v3 }
 0x4bc   : > { %v12309_v52 = vand.u32 4294901760, %v10766_v53 }
 0x4bd   : > { %v3215_v8 = vld [vmem:[#allocation2] sm:$0xff] }
 0x4be   : > { %3221 = vrot.lane.b32.xlu0 %v3215_v8, %s9593_s25  ;;  %3201 = vrot.lane.b32.xlu1 %v3215_v8, %s9591_s24  ;;  %v3389_v20 = vand.u32 4294901760, %v3215_v8 }
 0x4c0   : > { %v10772_v43 = vsub.f32 %v3215_v8, %v3389_v20 }
 0x4c2   : > { %3261 = vrot.lane.b32.xlu0 %v3215_v8, %s9595_s27  ;;  %3241 = vrot.lane.b32.xlu1 %v3215_v8, %s9594_s26  ;;  %v3197_v27 = vld [vmem:[#allocation2 + $0x10] sm:$0xff]  ;;  %v12306_v2 = vand.u32 4294901760, %v10772_v43 }
 0x4c3   : > { %3194 = vst.msk [vmem:[#allocation4 + $0x10] sm:$0xff] %vm261_vm0, %v3197_v27 }
 0x4c4   : > { %v3490_v61 = vsub.f32 %v10772_v43, %v12306_v2 }
 0x4c6   : > { %3301 = vrot.lane.b32.xlu0 %v3215_v8, %s9597_s29  ;;  %3281 = vrot.lane.b32.xlu1 %v3215_v8, %s9596_s28 }
 0x4ca   : > { %3205 = vrot.lane.b32.xlu0 %v3197_v27, %s9591_s24  ;;  %3203 = vrot.lane.b32.xlu1 %v3181_v15, %s9591_s24  ;;  %v3359_v50 = vld [vmem:[#allocation4 + $0x10] sm:$0xff] }
 0x4cb   : > { %v4061_v44 = vand.u32 4294901760, %v3359_v50 }
 0x4cd   : > { %v10776_v31 = vsub.f32 %v3359_v50, %v4061_v44 }
 0x4ce   : > { %3223 = vrot.lane.b32.xlu0 %v3181_v15, %s9593_s25  ;;  %3225 = vrot.lane.b32.xlu1 %v3197_v27, %s9593_s25 }
 0x4cf   : > { %v12304_v12 = vand.u32 4294901760, %v10776_v31 }
 0x4d1   : > { %v10814_v57 = vsub.f32 %v10776_v31, %v12304_v12 }
 0x4d2   : > { %3243 = vrot.lane.b32.xlu0 %v3181_v15, %s9594_s26  ;;  %3245 = vrot.lane.b32.xlu1 %v3197_v27, %s9594_s26 }
 0x4d6   : > { %3263 = vrot.lane.b32.xlu0 %v3181_v15, %s9595_s27  ;;  %3265 = vrot.lane.b32.xlu1 %v3197_v27, %s9595_s27 }
 0x4da   : > { %3283 = vrot.lane.b32.xlu0 %v3181_v15, %s9596_s28  ;;  %3285 = vrot.lane.b32.xlu1 %v3197_v27, %s9596_s28 }
 0x4de   : > { %3303 = vrot.lane.b32.xlu0 %v3181_v15, %s9597_s29  ;;  %3305 = vrot.lane.b32.xlu1 %v3197_v27, %s9597_s29 }
 0x4e2   : > { %3323 = vrot.lane.b32.xlu0 %v3181_v15, %s9598_s30  ;;  %3325 = vrot.lane.b32.xlu1 %v3197_v27, %s9598_s30 }
 0x4e6   : > { %3343 = vrot.lane.b32.xlu0 %v3181_v15, %s9600_s6  ;;  %3321 = vrot.lane.b32.xlu1 %v3215_v8, %s9598_s30  ;;  %v3484_v15 = vsub.f32 %v10766_v53, %v12309_v52 }
 0x4ea   : > { %3341 = vrot.lane.b32.xlu0 %v3215_v8, %s9600_s6  ;;  %3345 = vrot.lane.b32.xlu1 %v3197_v27, %s9600_s6  ;;  %v10831_v27 = vand.u32 4294901760, %v10797_v11 }
 0x4ec   : > { %12474 = vst [vmem:[#allocation10_spill] sm:$0xff] %v10831_v27 }
 0x530   : > { %v3222_v28 = vpop.permute.xlu0 %3221  ;;  %v3202_v13 = vpop.permute.xlu1 %3201 }
 0x534   : > { %v10754_v5 = vpop.permute.xlu0 %3261  ;;  %v3242_v48 = vpop.permute.xlu1 %3241 }
 0x538   : > { %v10756_v32 = vpop.permute.xlu0 %3301  ;;  %v10758_v46 = vpop.permute.xlu1 %3281 }
 0x53c   : > { %v3206_v38 = vpop.permute.xlu0 %3205  ;;  %v3204_v39 = vpop.permute.xlu1 %3203 }
 0x53d   : > { %3214 = vst.msk [vmem:[#allocation4 + $0x28] sm:$0xff] %vm261_vm0, %v3206_v38  ;;  %v3207_v49 = vsel %vm275_vm2, %v3202_v13, %v3204_v39  ;;  %v3208_v14 = vsel %vm275_vm2, %v3204_v39, %v3206_v38 }
 0x53e   : > { %v3391_v17 = vand.u32 4294901760, %v3208_v14  ;;  %v3393_v55 = vand.u32 4294901760, %v3207_v49 }
 0x540   : > { %v3224_v4 = vpop.permute.xlu0 %3223  ;;  %v3226_v45 = vpop.permute.xlu1 %3225  ;;  %v10768_v24 = vpack.c.bf16 %v3391_v17, %v3387_v51  ;;  %v10770_v56 = vpack.c.bf16 %v3393_v55, %v3389_v20  ;;  %v10781_v0 = vsub.f32 %v3208_v14, %v3391_v17  ;;  %v10786_v10 = vsub.f32 %v3207_v49, %v3393_v55 }
 0x541   : > { %3234 = vst.msk [vmem:[#allocation4 + $0x40] sm:$0xff] %vm261_vm0, %v3226_v45  ;;  %v3227_v54 = vsel %vm296_vm3, %v3222_v28, %v3224_v4  ;;  %v3228_v37 = vsel %vm296_vm3, %v3224_v4, %v3226_v45 }
 0x542   : > { %8953 = vmatprep.subr.bf16.mxu0 %v10768_v24  ;;  %v3395_v30 = vand.u32 4294901760, %v3228_v37  ;;  %v3397_v34 = vand.u32 4294901760, %v3227_v54  ;;  %v12307_v40 = vand.u32 4294901760, %v10781_v0  ;;  %v12305_v42 = vand.u32 4294901760, %v10786_v10 }
 0x543   : > { %8955 = vmatpush1.bf16.msra.mxu0 %v10770_v56 }
 0x544   : > { %v3244_v16 = vpop.permute.xlu0 %3243  ;;  %v3246_v60 = vpop.permute.xlu1 %3245  ;;  %v3362_v1 = vld [vmem:[#allocation4 + $0x28] sm:$0xff]  ;;  %v3496_v28 = vsub.f32 %v10781_v0, %v12307_v40  ;;  %v10836_v38 = vsub.f32 %v3228_v37, %v3395_v30  ;;  %v3502_v39 = vsub.f32 %v10786_v10, %v12305_v42  ;;  %v10855_v26 = vsub.f32 %v3227_v54, %v3397_v34 }
 0x545   : > { %v3247_v59 = vsel %vm317_vm4, %v3242_v48, %v3244_v16  ;;  %v3248_v7 = vsel %vm317_vm4, %v3244_v16, %v3246_v60  ;;  %3254 = vst.msk [vmem:[#allocation4 + $0x58] sm:$0xff] %vm261_vm0, %v3246_v60  ;;  %v4064_v36 = vand.u32 4294901760, %v3362_v1 }
 0x546   : > { %v3399_v19 = vand.u32 4294901760, %v3248_v7  ;;  %v3401_v41 = vand.u32 4294901760, %v3247_v59  ;;  %v3497_v37 = vand.u32 4294901760, %v3496_v28 }
 0x547   : > { %v10794_v25 = vpack.c.bf16 %v4064_v36, %v4061_v44  ;;  %v10807_v63 = vsub.f32 %v3362_v1, %v4064_v36  ;;  %v3503_v36 = vand.u32 4294901760, %v3502_v39 }
 0x548   : > { %v3264_v23 = vpop.permute.xlu0 %3263  ;;  %v3266_v21 = vpop.permute.xlu1 %3265  ;;  %v10800_v47 = vpack.c.bf16 %v3399_v19, %v3395_v30  ;;  %v10802_v58 = vpack.c.bf16 %v3401_v41, %v3397_v34  ;;  %v3365_v18 = vld [vmem:[#allocation4 + $0x40] sm:$0xff]  ;;  %v12308_v30 = vand.u32 4294901760, %v10836_v38 }
 0x549   : > { %3274 = vst.msk [vmem:[#allocation4 + $0x70] sm:$0xff] %vm261_vm0, %v3266_v21  ;;  %9050 = vmatpush3.bf16.msra.mxu1 %v10794_v25  ;;  %v10824_v3 = vsel %vm338_vm6, %v10754_v5, %v3264_v23  ;;  %v10827_v8 = vsel %vm338_vm6, %v3264_v23, %v3266_v21  ;;  %v4067_v51 = vand.u32 4294901760, %v3365_v18  ;;  %v10838_v5 = vsub.f32 %v3248_v7, %v3399_v19 }
 0x54a   : > { %9051 = vmatprep.subr.bf16.mxu1 %v12381_v29  ;;  %8957 = vmatprep.subr.bf16.mxu0 %v10800_v47  ;;  %v12303_v44 = vand.u32 4294901760, %v10807_v63  ;;  %v3403_v9 = vand.u32 4294901760, %v10827_v8  ;;  %v3405_v55 = vand.u32 4294901760, %v10824_v3  ;;  %v10869_v19 = vsub.f32 %v3247_v59, %v3401_v41 }
 0x54b   : > { %8959 = vmatpush1.bf16.msra.mxu0 %v10802_v58  ;;  %v3485_v23 = vand.u32 4294901760, %v3484_v15  ;;  %v3491_v21 = vand.u32 4294901760, %v3490_v61  ;;  %v12310_v28 = vand.u32 4294901760, %v10838_v5  ;;  %v4149_v59 = vand.u32 4294901760, %v10814_v57 }
 0x54c   : > { %v3284_v13 = vpop.permute.xlu0 %3283  ;;  %v3286_v48 = vpop.permute.xlu1 %3285  ;;  %v3368_v50 = vld [vmem:[#allocation4 + $0x58] sm:$0xff]  ;;  %v4155_v54 = vsub.f32 %v10807_v63, %v12303_v44  ;;  %v3508_v15 = vsub.f32 %v10836_v38, %v12308_v30 }
 0x54d   : > { %v10845_v20 = vsel %vm359_vm7, %v10758_v46, %v3284_v13  ;;  %v3288_v49 = vsel %vm359_vm7, %v3284_v13, %v3286_v48  ;;  %3294 = vst.msk [vmem:[#allocation4 + $0x88] sm:$0xff] %vm261_vm0, %v3286_v48  ;;  %v4070_v14 = vand.u32 4294901760, %v3368_v50  ;;  %v3473_v46 = vsub.f32 %v10797_v11, %v10831_v27 }
 0x54e   : > { %v3407_v17 = vand.u32 4294901760, %v3288_v49  ;;  %v3409_v4 = vand.u32 4294901760, %v10845_v20  ;;  %v10875_v48 = vsub.f32 %v3365_v18, %v4067_v51  ;;  %v10881_v42 = vpack.c.bf16 %v3497_v37, %v3485_v23 }
 0x54f   : > { %v10853_v45 = vpack.c.bf16 %v4070_v14, %v4067_v51  ;;  %v10878_v39 = vand.u32 4294901760, %v3473_v46  ;;  %v10883_v2 = vpack.c.bf16 %v3503_v36, %v3491_v21  ;;  %v4156_v57 = vand.u32 4294901760, %v4155_v54 }
 0x550   : > { %v3304_v16 = vpop.permute.xlu0 %3303  ;;  %v3306_v60 = vpop.permute.xlu1 %3305  ;;  %v10859_v1 = vpack.c.bf16 %v3407_v17, %v3403_v9  ;;  %v10861_v7 = vpack.c.bf16 %v3409_v4, %v3405_v55  ;;  %v3371_v34 = vld [vmem:[#allocation4 + $0x70] sm:$0xff]  ;;  %v3520_v37 = vsub.f32 %v10838_v5, %v12310_v28  ;;  %v10897_v21 = vsub.f32 %v3368_v50, %v4070_v14 }
 0x551   : > { %3314 = vst.msk [vmem:[#allocation4 + $0xa0] sm:$0xff] %vm261_vm0, %v3306_v60  ;;  %9053 = vmatpush3.bf16.msra.mxu1 %v10853_v45  ;;  %v3308_v13 = vsel %vm380_vm8, %v3304_v16, %v3306_v60  ;;  %v4073_v51 = vand.u32 4294901760, %v3371_v34  ;;  %v3307_v23 = vsel %vm380_vm8, %v10756_v32, %v3304_v16  ;;  %v10903_v54 = vsub.f32 %v10827_v8, %v3403_v9 }
 0x552   : > { %9054 = vmatprep.subr.bf16.mxu1 %v12381_v29  ;;  %8961 = vmatprep.subr.bf16.mxu0 %v10859_v1  ;;  %v3411_v60 = vand.u32 4294901760, %v3308_v13  ;;  %v10905_v33 = vsub.f32 %v3288_v49, %v3407_v17  ;;  %v10908_v28 = vsub.f32 %v10824_v3, %v3405_v55  ;;  %v10914_v50 = vpack.c.bf16 %v4156_v57, %v4149_v59 }
 0x553   : > { %8963 = vmatpush1.bf16.msra.mxu0 %v10861_v7  ;;  %v3509_v14 = vand.u32 4294901760, %v3508_v15  ;;  %v12477_v16 = vand.u32 4294901760, %v10855_v26  ;;  %v10922_v8 = vsub.f32 %v10845_v20, %v3409_v4  ;;  %v3413_v49 = vand.u32 4294901760, %v3307_v23 }
 0x554   : > { %v3324_v41 = vpop.permute.xlu0 %3323  ;;  %v3326_v44 = vpop.permute.xlu1 %3325  ;;  %v3374_v12 = vld [vmem:[#allocation4 + $0x88] sm:$0xff]  ;;  %v3521_v17 = vand.u32 4294901760, %v3520_v37  ;;  %v10926_v55 = vsub.f32 %v3371_v34, %v4073_v51  ;;  %v12478_v59 = vand.u32 4294901760, %v10875_v48  ;;  %v12479_v20 = vand.u32 4294901760, %v10869_v19 }
 0x555   : > { %v3328_v61 = vsel %vm401_vm9, %v3324_v41, %v3326_v44  ;;  %3334 = vst.msk [vmem:[#allocation4 + $0xb8] sm:$0xff] %vm261_vm0, %v3326_v44  ;;  %v4076_v46 = vand.u32 4294901760, %v3374_v12  ;;  %v10919_v44 = vsub.f32 %v10855_v26, %v12477_v16  ;;  %v10937_v6 = vsub.f32 %v3308_v13, %v3411_v60 }
 0x556   : > { %v3415_v40 = vand.u32 4294901760, %v3328_v61  ;;  %v3526_v4 = vsub.f32 %v10869_v19, %v12479_v20 }
 0x557   : > { %v10899_v30 = vpack.c.bf16 %v4076_v46, %v4073_v51  ;;  %v10947_v20 = vsub.f32 %v3374_v12, %v4076_v46  ;;  %v12484_v46 = vand.u32 4294901760, %v10905_v33 }
 0x558   : > { %v3344_v52 = vpop.permute.xlu0 %3343  ;;  %v3322_v18 = vpop.permute.xlu1 %3321  ;;  %v10910_v36 = vpack.c.bf16 %v3415_v40, %v3411_v60  ;;  %v3377_v3 = vld [vmem:[#allocation4 + $0xa0] sm:$0xff]  ;;  %v10939_v22 = vsub.f32 %v3328_v61, %v3415_v40  ;;  %v12486_v61 = vand.u32 4294901760, %v10922_v8 }
 0x559   : > { %12475 = vst [vmem:[#allocation5_spill] sm:$0xff] %v10899_v30  ;;  %v3327_v32 = vsel %vm401_vm9, %v3322_v18, %v3324_v41  ;;  %9056 = vmatpush3.bf16.msra.mxu1 %v10899_v30  ;;  %v10931_v41 = vsub.f32 %v10875_v48, %v12478_v59  ;;  %v4079_v15 = vand.u32 4294901760, %v3377_v3  ;;  %v12487_v30 = vand.u32 4294901760, %v10908_v28 }
 0x55a   : > { %12476 = vst [vmem:[#allocation11_spill] sm:$0xff] %v10910_v36  ;;  %9057 = vmatprep.subr.bf16.mxu1 %v12381_v29  ;;  %8965 = vmatprep.subr.bf16.mxu0 %v10910_v36  ;;  %v3417_v9 = vand.u32 4294901760, %v3327_v32 }
 0x55c   : > { %v3342_v18 = vpop.permute.xlu0 %3341  ;;  %v3346_v57 = vpop.permute.xlu1 %3345  ;;  %v3380_v16 = vld [vmem:[#allocation4 + $0xb8] sm:$0xff]  ;;  %v10941_v34 = vpack.c.bf16 %v3417_v9, %v3413_v49  ;;  %v10956_v51 = vsub.f32 %v3327_v32, %v3417_v9  ;;  %v10970_v32 = vsub.f32 %v3307_v23, %v3413_v49  ;;  %v3515_v9 = vand.u32 4294901760, %v10919_v44 }
 0x55d   : > { %v3347_v37 = vsel %vm422_vm10, %v3342_v18, %v3344_v52  ;;  %v3348_v59 = vsel %vm422_vm10, %v3344_v52, %v3346_v57  ;;  %3354 = vst.msk [vmem:[#allocation4 + $0xd0] sm:$0xff] %vm261_vm0, %v3346_v57  ;;  %v4082_v27 = vand.u32 4294901760, %v3380_v16  ;;  %v8972_v18 = vpack.c.bf16 %v3521_v17, %v3509_v14 }
 0x55e   : > { %12480 = vst [vmem:[#allocation12_spill] sm:$0xff] %v10941_v34  ;;  %8967 = vmatpush1.bf16.msra.mxu0 %v10941_v34  ;;  %v10950_v13 = vand.u32 4294901760, %v3348_v59  ;;  %v12482_v52 = vand.u32 4294901760, %v10897_v21  ;;  %v10962_v12 = vand.u32 4294901760, %v3347_v37  ;;  %v3544_v34 = vsub.f32 %v10905_v33, %v12484_v46 }
 0x55f   : > { %v10954_v60 = vpack.c.bf16 %v4082_v27, %v4079_v15  ;;  %v4163_v14 = vand.u32 4294901760, %v10931_v41  ;;  %v3527_v17 = vand.u32 4294901760, %v3526_v4  ;;  %v3550_v23 = vsub.f32 %v10922_v8, %v12486_v61 }
 0x560   : > { %v4169_v57 = vsub.f32 %v10897_v21, %v12482_v52  ;;  %3420 = vmatprep.subr.mxu0 %v10950_v13  ;;  %12483 = vst [vmem:[#allocation9_spill] sm:$0xff] %v10962_v12  ;;  %v12485_v52 = vand.u32 4294901760, %v10903_v54  ;;  %v10984_v41 = vsub.f32 %v3380_v16, %v4082_v27  ;;  %v3545_v40 = vand.u32 4294901760, %v3544_v34 }
 0x561   : > { %12481 = vst [vmem:[#allocation13_spill] sm:$0xff] %v10954_v60  ;;  %9059 = vmatpush3.bf16.msra.mxu1 %v10954_v60  ;;  %v3538_v61 = vsub.f32 %v10908_v28, %v12487_v30  ;;  %v12488_v27 = vand.u32 4294901760, %v10939_v22  ;;  %v12323_v34 = vand.u32 4294901760, %v10970_v32  ;;  %v12489_v30 = vand.u32 4294901760, %v10947_v20 }
 0x562   : > { %8254 = vmatprep.subr.mxu1 %v12373_v35  ;;  %3422 = vmatpush1.msra.mxu0 %v10962_v12  ;;  %v3532_v46 = vsub.f32 %v10903_v54, %v12485_v52  ;;  %v4170_v44 = vand.u32 4294901760, %v4169_v57  ;;  %v11001_v57 = vsub.f32 %v3377_v3, %v4079_v15  ;;  %v3551_v36 = vand.u32 4294901760, %v3550_v23 }
 0x563   : > { %8969 = vmatprep.subr.bf16.mxu0 %v10881_v42  ;;  %3475 = vmatmul.mubr.f32.vlgmr.msra.gmra.mrb[4].mxu0 %v10878_v39  ;;  %v3568_v16 = vsub.f32 %v10939_v22, %v12488_v27  ;;  %v10998_v42 = vsub.f32 %v3348_v59, %v10950_v13  ;;  %v4183_v49 = vsub.f32 %v10947_v20, %v12489_v30  ;;  %v12490_v27 = vand.u32 4294901760, %v10937_v6 }
 0x564   : > { %v3383_v52 = vld [vmem:[#allocation4 + $0xd0] sm:$0xff]  ;;  %8971 = vmatpush1.bf16.msra.mxu0 %v10883_v2  ;;  %3635 = vmatprep.mubr.f32.mxu0 %v12373_v35  ;;  %v8974_v2 = vpack.c.bf16 %v3527_v17, %v3515_v9  ;;  %v3533_v4 = vand.u32 4294901760, %v3532_v46  ;;  %v11014_v3 = vsub.f32 %v3347_v37, %v10962_v12  ;;  %v12491_v15 = vand.u32 4294901760, %v10926_v55 }
 0x565   : > { %v11003_v60 = vand.u32 4294901760, %v3383_v52  ;;  %8973 = vmatprep.subr.bf16.mxu0 %v8972_v18  ;;  %v3556_v59 = vsub.f32 %v10937_v6, %v12490_v27  ;;  %v12492_v17 = vand.u32 4294901760, %v10956_v51  ;;  %v3539_v30 = vand.u32 4294901760, %v3538_v61 }
 0x566   : > { %v4176_v18 = vsub.f32 %v10926_v55, %v12491_v15  ;;  %v8976_v23 = vpack.c.bf16 %v3545_v40, %v3533_v4  ;;  %v3569_v27 = vand.u32 4294901760, %v3568_v16  ;;  %v3579_v37 = vand.u32 4294901760, %v10998_v42 }
 0x567   : > { %8255 = vmatpush3.msra.mxu1 %v11003_v60  ;;  %v3574_v46 = vsub.f32 %v10956_v51, %v12492_v17  ;;  %v3562_v9 = vsub.f32 %v10970_v32, %v12323_v34  ;;  %v9064_v17 = vpack.c.bf16 %v4170_v44, %v4163_v14  ;;  %v4184_v12 = vand.u32 4294901760, %v4183_v49 }
 0x568   : > { %9060 = vmatprep.subr.bf16.mxu1 %v12381_v29  ;;  %8257 = vmatmul.mubr.f32.vlgmr.msra.gmra.mrb[4].mxu1 %v10878_v39  ;;  %v8978_v39 = vpack.c.bf16 %v3551_v36, %v3539_v30  ;;  %v3557_v40 = vand.u32 4294901760, %v3556_v59  ;;  %v11033_v4 = vsub.f32 %v3383_v52, %v11003_v60  ;;  %v12493_v61 = vand.u32 4294901760, %v10984_v41 }
 0x569   : > { %9062 = vmatpush3.bf16.msra.mxu1 %v10914_v50  ;;  %8975 = vmatpush1.bf16.msra.mxu0 %v8974_v2  ;;  %v3575_v16 = vand.u32 4294901760, %v3574_v46  ;;  %v3585_v2 = vand.u32 4294901760, %v11014_v3  ;;  %v4177_v34 = vand.u32 4294901760, %v4176_v18  ;;  %v3580_v36 = vsub.f32 %v10998_v42, %v3579_v37 }
 0x56a   : > { %9063 = vmatprep.subr.bf16.mxu1 %v12381_v29  ;;  %8977 = vmatprep.subr.bf16.mxu0 %v8976_v23  ;;  %v4197_v50 = vsub.f32 %v10984_v41, %v12493_v61  ;;  %v8980_v15 = vpack.c.bf16 %v3569_v27, %v3557_v40  ;;  %v12494_v14 = vand.u32 4294901760, %v11001_v57  ;;  %v3563_v44 = vand.u32 4294901760, %v3562_v9 }
 0x56b   : > { %8277 = vmatprep.mubr.msk.f32.mxu1 %vm9601_vm1, %v12373_v35  ;;  %v9067_v52 = vpack.c.bf16 %v4184_v12, %v4177_v34  ;;  %v4203_v18 = vand.u32 4294901760, %v11033_v4  ;;  %v3586_v23 = vsub.f32 %v11014_v3, %v3585_v2  ;;  %v3581_v30 = vand.u32 4294901760, %v3580_v36 }
 0x56c   : > { %v4190_v49 = vsub.f32 %v11001_v57, %v12494_v14  ;;  %v4198_v59 = vand.u32 4294901760, %v4197_v50  ;;  %v8982_v46 = vpack.c.bf16 %v3575_v16, %v3563_v44  ;;  %v8988_v40 = vpack.c.bf16 %v10838_v5, %v10836_v38 }
 0x56d   : > { %9065 = vmatpush3.bf16.msra.mxu1 %v9064_v17  ;;  %8979 = vmatpush1.bf16.msra.mxu0 %v8978_v39  ;;  %v4204_v12 = vsub.f32 %v11033_v4, %v4203_v18  ;;  %v3587_v34 = vand.u32 4294901760, %v3586_v23  ;;  %v8986_v17 = vpack.c.bf16 %v10786_v10, %v10772_v43  ;;  %v9073_v61 = vpack.c.bf16 %v10807_v63, %v10776_v31  ;;  %v12497_v23 = vld [vmem:[#allocation12_spill] sm:$0xff] }
 0x56e   : > { %9066 = vmatprep.subr.bf16.mxu1 %v12381_v29  ;;  %8981 = vmatprep.subr.bf16.mxu0 %v8980_v15  ;;  %v4191_v27 = vand.u32 4294901760, %v4190_v49  ;;  %v8984_v15 = vpack.c.bf16 %v10781_v0, %v10766_v53  ;;  %v8990_v50 = vpack.c.bf16 %v10869_v19, %v10855_v26  ;;  %v8992_v16 = vpack.c.bf16 %v10905_v33, %v10903_v54 }
 0x56f   : > { %v4205_v39 = vand.u32 4294901760, %v4204_v12  ;;  %v9076_v36 = vpack.c.bf16 %v10897_v21, %v10875_v48  ;;  %v8994_v14 = vpack.c.bf16 %v10922_v8, %v10908_v28  ;;  %v8996_v49 = vpack.c.bf16 %v10939_v22, %v10937_v6 }
 0x570   : > { %v9070_v9 = vpack.c.bf16 %v4198_v59, %v4191_v27  ;;  %v9079_v44 = vpack.c.bf16 %v10947_v20, %v10926_v55  ;;  %v9082_v59 = vpack.c.bf16 %v10984_v41, %v11001_v57  ;;  %v12499_v27 = vand.u32 4294901760, %v10766_v53 }
 0x571   : > { %9068 = vmatpush3.bf16.msra.mxu1 %v9067_v52  ;;  %8983 = vmatpush1.bf16.msra.mxu0 %v8982_v46  ;;  %v8998_v52 = vpack.c.bf16 %v10956_v51, %v10970_v32  ;;  %v12495_v46 = vld [vmem:[#allocation11_spill] sm:$0xff] }
 0x572   : > { %9069 = vmatprep.subr.bf16.mxu1 %v12381_v29  ;;  %3582 = vmatprep.subr.mxu0 %v3581_v30  ;;  %v12498_v30 = vld [vmem:[#allocation13_spill] sm:$0xff] }
 0x575   : > { %9071 = vmatpush3.bf16.msra.mxu1 %v9070_v9  ;;  %3588 = vmatpush1.msra.mxu0 %v3587_v34  ;;  %v12500_v9 = vand.u32 4294901760, %v10781_v0  ;;  %v12501_v34 = vld [vmem:[#allocation9_spill] sm:$0xff]  ;;  %v12507_v0 = vand.u32 4294901760, %v10776_v31  ;;  %v12513_v31 = vand.u32 4294901760, %v10875_v48  ;;  %v12519_v48 = vand.u32 4294901760, %v10926_v55 }
 0x576   : > { %8275 = vmatprep.subr.mxu1 %v12373_v35  ;;  %8985 = vmatprep.subr.bf16.mxu0 %v8984_v15  ;;  %v12502_v15 = vand.u32 4294901760, %v10772_v43  ;;  %v12508_v43 = vand.u32 4294901760, %v10807_v63  ;;  %v12514_v63 = vand.u32 4294901760, %v10897_v21  ;;  %v12520_v21 = vand.u32 4294901760, %v10947_v20 }
 0x577   : > { %3637 = vmatmul.mubr.f32.vlgmr.msra.gmra.mrb[4].mxu0 %v10784_v62  ;;  %v9016_v12 = vpack.c.bf16 %v12500_v9, %v12499_v27 }
 0x578   : > { %8987 = vmatpush1.bf16.msra.mxu0 %v8986_v17  ;;  %3743 = vmatprep.mubr.f32.mxu0 %v12373_v35  ;;  %v12503_v17 = vand.u32 4294901760, %v10786_v10  ;;  %v12509_v10 = vand.u32 4294901760, %v10855_v26  ;;  %v9100_v26 = vpack.c.bf16 %v12514_v63, %v12513_v31  ;;  %v9103_v27 = vpack.c.bf16 %v12520_v21, %v12519_v48 }
 0x579   : > { %8276 = vmatpush3.msra.mxu1 %v4205_v39  ;;  %8989 = vmatprep.subr.bf16.mxu0 %v8988_v40  ;;  %v12504_v40 = vld [vmem:[#allocation10_spill] sm:$0xff] }
 0x57a   : > { %9072 = vmatprep.subr.bf16.mxu1 %v12381_v29  ;;  %8278 = vmatmul.mubr.f32.vlgmr.msra.gmra.mrb[4].mxu1 %v10784_v62  ;;  %v9018_v39 = vpack.c.bf16 %v12503_v17, %v12502_v15 }
 0x57b   : > { %9074 = vmatpush3.bf16.msra.mxu1 %v9073_v61  ;;  %8298 = vmatprep.mubr.msk.f32.mxu1 %vm9601_vm1, %v12373_v35  ;;  %v12505_v61 = vand.u32 4294901760, %v10836_v38  ;;  %v12510_v38 = vand.u32 4294901760, %v10869_v19  ;;  %v12515_v19 = vand.u32 4294901760, %v10908_v28  ;;  %v12521_v28 = vand.u32 4294901760, %v10970_v32 }
 0x57c   : > { %9075 = vmatprep.subr.bf16.mxu1 %v12381_v29  ;;  %8991 = vmatpush1.bf16.msra.mxu0 %v8990_v50  ;;  %v12506_v50 = vand.u32 4294901760, %v10838_v5 }
 0x57d   : > { %8993 = vmatprep.subr.bf16.mxu0 %v8992_v16  ;;  %v9097_v16 = vpack.c.bf16 %v12508_v43, %v12507_v0  ;;  %v9022_v5 = vpack.c.bf16 %v12510_v38, %v12509_v10 }
 0x57e   : > { %v9020_v53 = vpack.c.bf16 %v12506_v50, %v12505_v61 }
 0x57f   : > { %9077 = vmatpush3.bf16.msra.mxu1 %v9076_v36  ;;  %v12511_v36 = vand.u32 4294901760, %v10903_v54 }
 0x580   : > { %9078 = vmatprep.subr.bf16.mxu1 %v12381_v29  ;;  %8995 = vmatpush1.bf16.msra.mxu0 %v8994_v14  ;;  %v12512_v14 = vand.u32 4294901760, %v10905_v33  ;;  %v12517_v33 = vand.u32 4294901760, %v10937_v6  ;;  %v12524_v6 = vand.u32 4294901760, %v10984_v41 }
 0x581   : > { %8997 = vmatprep.subr.bf16.mxu0 %v8996_v49 }
 0x582   : > { %v9024_v49 = vpack.c.bf16 %v12512_v14, %v12511_v36 }
 0x583   : > { %9080 = vmatpush3.bf16.msra.mxu1 %v9079_v44  ;;  %v12516_v44 = vand.u32 4294901760, %v10922_v8  ;;  %v12522_v8 = vand.u32 4294901760, %v10956_v51  ;;  %v12526_v51 = vld [vmem:[#allocation7_spill] sm:$0xff] }
 0x584   : > { %9081 = vmatprep.subr.bf16.mxu1 %v12381_v29  ;;  %8999 = vmatpush1.bf16.msra.mxu0 %v8998_v52  ;;  %v12518_v52 = vand.u32 4294901760, %v10939_v22  ;;  %v12523_v22 = vand.u32 4294901760, %v11001_v57 }
 0x585   : > { %3693 = vmatprep.subr.mxu0 %v10998_v42  ;;  %v9026_v54 = vpack.c.bf16 %v12516_v44, %v12515_v19  ;;  %v9030_v9 = vpack.c.bf16 %v12522_v8, %v12521_v28 }
 0x587   : > { %9083 = vmatpush3.bf16.msra.mxu1 %v9082_v59  ;;  %v9028_v59 = vpack.c.bf16 %v12518_v52, %v12517_v33 }
 0x588   : > { %8296 = vmatprep.subr.mxu1 %v12373_v35  ;;  %3696 = vmatpush1.msra.mxu0 %v11014_v3 }
 0x589   : > { %9001 = vmatprep.subr.bf16.mxu0 %v10768_v24  ;;  %3746 = vmatmul.mubr.f32.vlgmr.msra.gmra.mrb[4].mxu0 %v10797_v11 }
 0x58a   : > { %9003 = vmatpush1.bf16.msra.mxu0 %v10770_v56  ;;  %3834 = vmatprep.mubr.f32.mxu0 %v12373_v35 }
 0x58b   : > { %8297 = vmatpush3.msra.mxu1 %v11033_v4  ;;  %9005 = vmatprep.subr.bf16.mxu0 %v10800_v47  ;;  %v4829_v4 = vld [vmem:[#allocation2 + $0x8] sm:$0xff] }
 0x58c   : > { %9084 = vmatprep.subr.bf16.mxu1 %v12381_v29  ;;  %8299 = vmatmul.mubr.f32.vlgmr.msra.gmra.mrb[4].mxu1 %v10797_v11  ;;  %v12496_v11 = vld [vmem:[#allocation5_spill] sm:$0xff] }
 0x58d   : > { %9086 = vmatpush3.bf16.msra.mxu1 %v10794_v25  ;;  %8319 = vmatprep.mubr.msk.f32.mxu1 %vm9601_vm1, %v12373_v35 }
 0x58e   : > { %9087 = vmatprep.subr.bf16.mxu1 %v12381_v29  ;;  %9007 = vmatpush1.bf16.msra.mxu0 %v10802_v58 }
 0x58f   : > { %9009 = vmatprep.subr.bf16.mxu0 %v10859_v1 }
 0x591   : > { %9089 = vmatpush3.bf16.msra.mxu1 %v10853_v45 }
 0x592   : > { %9090 = vmatprep.subr.bf16.mxu1 %v12381_v29  ;;  %9011 = vmatpush1.bf16.msra.mxu0 %v10861_v7 }
 0x593   : > { %9013 = vmatprep.subr.bf16.mxu0 %v12495_v46 }
 0x595   : > { %9092 = vmatpush3.bf16.msra.mxu1 %v12496_v11 }
 0x596   : > { %9093 = vmatprep.subr.bf16.mxu1 %v12381_v29  ;;  %9015 = vmatpush1.bf16.msra.mxu0 %v12497_v23 }
 0x597   : > { %3785 = vmatprep.subr.mxu0 %v10950_v13 }
 0x599   : > { %9095 = vmatpush3.bf16.msra.mxu1 %v12498_v30 }
 0x59a   : > { %8317 = vmatprep.subr.mxu1 %v12373_v35  ;;  %3787 = vmatpush1.msra.mxu0 %v12501_v34 }
 0x59b   : > { %9017 = vmatprep.subr.bf16.mxu0 %v9016_v12  ;;  %3838 = vmatmul.mubr.f32.vlgmr.msra.gmra.mrb[4].mxu0 %v12504_v40  ;;  %v9106_v12 = vpack.c.bf16 %v12524_v6, %v12523_v22 }
 0x59c   : > { %9019 = vmatpush1.bf16.msra.mxu0 %v9018_v39  ;;  %3962 = vmatprep.mubr.f32.mxu0 %v12373_v35 }
 0x59d   : > { %8318 = vmatpush3.msra.mxu1 %v11003_v60  ;;  %9021 = vmatprep.subr.bf16.mxu0 %v9020_v53 }
 0x59e   : > { %9096 = vmatprep.subr.bf16.mxu1 %v12381_v29  ;;  %8320 = vmatmul.mubr.f32.vlgmr.msra.gmra.mrb[4].mxu1 %v12504_v40 }
 0x59f   : > { %9098 = vmatpush3.bf16.msra.mxu1 %v9097_v16  ;;  %8340 = vmatprep.mubr.msk.f32.mxu1 %vm9601_vm1, %v12373_v35  ;;  %v7682_v16 = vld [vmem:[%s12246_s1 + $0x18] sm:$0xff] }
 0x5a0   : > { %9099 = vmatprep.subr.bf16.mxu1 %v12381_v29  ;;  %9023 = vmatpush1.bf16.msra.mxu0 %v9022_v5 }
 0x5a1   : > { %9025 = vmatprep.subr.bf16.mxu0 %v9024_v49 }
 0x5a3   : > { %9101 = vmatpush3.bf16.msra.mxu1 %v9100_v26  ;;  %v4846_v26 = vsel %vm459_vm5, %v7682_v16, 0 }
 0x5a4   : > { %9102 = vmatprep.subr.bf16.mxu1 %v12381_v29  ;;  %9027 = vmatpush1.bf16.msra.mxu0 %v9026_v54  ;;  %v11282_v52 = vand.u32 4294901760, %v4846_v26 }
 0x5a5   : > { %9029 = vmatprep.subr.bf16.mxu0 %v9028_v59 }
 0x5a7   : > { %9104 = vmatpush3.bf16.msra.mxu1 %v9103_v27 }
 0x5a8   : > { %9105 = vmatprep.subr.bf16.mxu1 %v12381_v29  ;;  %9031 = vmatpush1.bf16.msra.mxu0 %v9030_v9 }
 0x5a9   : > { %3911 = vmatprep.subr.mxu0 %v3579_v37 }
 0x5ab   : > { %9107 = vmatpush3.bf16.msra.mxu1 %v9106_v12 }
 0x5ac   : > { %8338 = vmatprep.subr.mxu1 %v12373_v35  ;;  %3915 = vmatpush1.msra.mxu0 %v3585_v2  ;;  %v4828_v2 = vld [vmem:[#allocation2] sm:$0xff] }
 0x5ad   : > { %9033 = vmatprep.subr.bf16.mxu0 %v10768_v24  ;;  %3964 = vmatmul.mubr.f32.vlgmr.msra.gmra.mrb[4].mxu0 %v10784_v62 }
 0x5ae   : > { %9035 = vmatpush1.bf16.msra.mxu0 %v10770_v56  ;;  %4052 = vmatprep.mubr.f32.mxu0 %v12373_v35 }
 0x5af   : > { %8339 = vmatpush3.msra.mxu1 %v4203_v18  ;;  %9037 = vmatprep.subr.bf16.mxu0 %v10800_v47  ;;  %v4830_v18 = vld [vmem:[#allocation2 + $0x10] sm:$0xff] }
 0x5b0   : > { %9108 = vmatprep.subr.bf16.mxu1 %v12381_v29  ;;  %8341 = vmatmul.mubr.f32.vlgmr.msra.gmra.mrb[4].mxu1 %v10784_v62 }
 0x5b1   : > { %9110 = vmatpush3.bf16.msra.mxu1 %v10794_v25  ;;  %8361 = vmatprep.mubr.msk.f32.mxu1 %vm9601_vm1, %v12373_v35 }
 0x5b2   : > { %9111 = vmatprep.subr.bf16.mxu1 %v12381_v29  ;;  %9039 = vmatpush1.bf16.msra.mxu0 %v10802_v58 }
 0x5b3   : > { %9041 = vmatprep.subr.bf16.mxu0 %v10859_v1 }
 0x5b5   : > { %9113 = vmatpush3.bf16.msra.mxu1 %v10853_v45  ;;  %v12525_v45 = vld [vmem:[#allocation6_spill] sm:$0xff] }
 0x5b6   : > { %9114 = vmatprep.subr.bf16.mxu1 %v12381_v29  ;;  %9043 = vmatpush1.bf16.msra.mxu0 %v10861_v7 }
 0x5b7   : > { %9045 = vmatprep.subr.bf16.mxu0 %v12495_v46 }
 0x5b9   : > { %9116 = vmatpush3.bf16.msra.mxu1 %v12496_v11 }
 0x5ba   : > { %9117 = vmatprep.subr.bf16.mxu1 %v12381_v29  ;;  %9047 = vmatpush1.bf16.msra.mxu0 %v12497_v23 }
 0x5bb   : > { %4003 = vmatprep.subr.mxu0 %v10950_v13  ;;  %v12527_v13 = vld [vmem:[#allocation8_spill] sm:$0xff] }
 0x5bd   : > { %9119 = vmatpush3.bf16.msra.mxu1 %v12498_v30 }
 0x5be   : > { %8359 = vmatprep.subr.mxu1 %v12373_v35  ;;  %4005 = vmatpush1.msra.mxu0 %v12501_v34 }
 0x5bf   : > { %4054 = vmatmul.mubr.f32.vlgmr.msra.gmra.mrb[4].mxu0 %v10784_v62 }
 0x5c0   : > { %4930 = vmatprep.mubr.f32.mxu0 %v12373_v35 }
 0x5c1   : > { %8360 = vmatpush3.msra.mxu1 %v11003_v60 }
 0x5c2   : > { %8362 = vmatmul.mubr.f32.vlgmr.msra.gmra.mrb[4].mxu1 %v10784_v62  ;;  %9216 = vmatprep.subr.bf16.mxu1 %v12381_v29 }
 0x5c3   : > { %8382 = vmatprep.mubr.msk.f32.mxu1 %vm9601_vm1, %v12373_v35 }
 0x692   : > { %v4055_v24 = vpop.f32.mrb[4].mxu0 }
 0x693   : > { %v4610_v56 = vmax.f32 %v4055_v24, 0.0  ;;  %v4057_v25 = vpop.f32.mrb[5].mxu0 }
 0x694   : > { %v4611_v47 = vmax.f32 %v4057_v25, 0.0 }
 0x695   : > { %v4606_v58 = vpop.f32.mrb[4].mxu1  ;;  %v4613_v1 = vmul.f32 %v4610_v56, %v12525_v45 }
 0x696   : > { %v4612_v7 = vmax.f32 %v4606_v58, 0.0  ;;  %v8363_v55 = vpop.f32.mrb[5].mxu1  ;;  %v4614_v20 = vmul.f32 %v4611_v47, %v12526_v51 }
 0x697   : > { %4619 = vrot.lane.b32.xlu1 %v4613_v1, %s9602_s11  ;;  %v11295_v1 = vsub.f32 %v4846_v26, %v11282_v52 }
 0x698   : > { %v4615_v62 = vmul.f32 %v4612_v7, %v12527_v13  ;;  %4621 = vrot.lane.b32.xlu0 %v4614_v20, %s9602_s11 }
 0x69b   : > { %4623 = vrot.lane.b32.xlu1 %v4615_v62, %s9602_s11 }
 0x709   : > { %v4620_v60 = vpop.permute.xlu1 %4619 }
 0x70a   : > { %4630 = vst.msk [vmem:[#allocation3] sm:$0xff] %vm1723_vm11, %v4620_v60  ;;  %v4622_v32 = vpop.permute.xlu0 %4621 }
 0x70b   : > { %v4625_v41 = vsel %vm1717_vm13, %v4620_v60, %v4622_v32 }
 0x70c   : > { %v4848_v39 = vand.u32 4294901760, %v4625_v41 }
 0x70d   : > { %v4624_v42 = vpop.permute.xlu1 %4623 }
 0x70e   : > { %v4626_v57 = vsel %vm1717_vm13, %v4622_v32, %v4624_v42  ;;  %v11264_v5 = vsub.f32 %v4625_v41, %v4848_v39 }
 0x70f   : > { %4632 = vst.msk [vmem:[#allocation3 + $0x10] sm:$0xff] %vm1726_vm12, %v4626_v57 }
 0x710   : > { %v12330_v28 = vand.u32 4294901760, %v11264_v5 }
 0x711   : > { %v4659_v3 = vld [vmem:[#allocation3] sm:$0xff] }
 0x712   : > { %4665 = vrot.lane.b32.xlu1 %v4659_v3, %s9593_s25  ;;  %4645 = vrot.lane.b32.xlu0 %v4659_v3, %s9591_s24  ;;  %v4850_v50 = vand.u32 4294901760, %v4659_v3 }
 0x714   : > { %v11270_v63 = vsub.f32 %v4659_v3, %v4850_v50 }
 0x716   : > { %4705 = vrot.lane.b32.xlu1 %v4659_v3, %s9595_s27  ;;  %4685 = vrot.lane.b32.xlu0 %v4659_v3, %s9594_s26  ;;  %v4641_v37 = vld [vmem:[#allocation3 + $0x10] sm:$0xff]  ;;  %v12327_v8 = vand.u32 4294901760, %v11270_v63 }
 0x717   : > { %4638 = vst.msk [vmem:[#allocation4 + $0x10] sm:$0xff] %vm261_vm0, %v4641_v37 }
 0x71a   : > { %4745 = vrot.lane.b32.xlu1 %v4659_v3, %s9597_s29  ;;  %4725 = vrot.lane.b32.xlu0 %v4659_v3, %s9596_s28 }
 0x71e   : > { %4649 = vrot.lane.b32.xlu1 %v4641_v37, %s9591_s24  ;;  %4647 = vrot.lane.b32.xlu0 %v4625_v41, %s9591_s24  ;;  %v4803_v17 = vld [vmem:[#allocation4 + $0x10] sm:$0xff] }
 0x71f   : > { %v5522_v43 = vand.u32 4294901760, %v4803_v17 }
 0x721   : > { %v11274_v19 = vsub.f32 %v4803_v17, %v5522_v43 }
 0x722   : > { %4667 = vrot.lane.b32.xlu1 %v4625_v41, %s9593_s25  ;;  %4669 = vrot.lane.b32.xlu0 %v4641_v37, %s9593_s25 }
 0x723   : > { %v12325_v12 = vand.u32 4294901760, %v11274_v19 }
 0x725   : > { %v11312_v57 = vsub.f32 %v11274_v19, %v12325_v12 }
 0x726   : > { %4687 = vrot.lane.b32.xlu1 %v4625_v41, %s9594_s26  ;;  %4689 = vrot.lane.b32.xlu0 %v4641_v37, %s9594_s26 }
 0x72a   : > { %4707 = vrot.lane.b32.xlu1 %v4625_v41, %s9595_s27  ;;  %4709 = vrot.lane.b32.xlu0 %v4641_v37, %s9595_s27 }
 0x72e   : > { %4727 = vrot.lane.b32.xlu1 %v4625_v41, %s9596_s28  ;;  %4729 = vrot.lane.b32.xlu0 %v4641_v37, %s9596_s28 }
 0x732   : > { %4747 = vrot.lane.b32.xlu1 %v4625_v41, %s9597_s29  ;;  %4749 = vrot.lane.b32.xlu0 %v4641_v37, %s9597_s29 }
 0x736   : > { %4767 = vrot.lane.b32.xlu1 %v4625_v41, %s9598_s30  ;;  %4769 = vrot.lane.b32.xlu0 %v4641_v37, %s9598_s30 }
 0x73a   : > { %4787 = vrot.lane.b32.xlu1 %v4625_v41, %s9600_s6  ;;  %4765 = vrot.lane.b32.xlu0 %v4659_v3, %s9598_s30 }
 0x73e   : > { %4785 = vrot.lane.b32.xlu1 %v4659_v3, %s9600_s6  ;;  %4789 = vrot.lane.b32.xlu0 %v4641_v37, %s9600_s6  ;;  %v4945_v3 = vsub.f32 %v11264_v5, %v12330_v28  ;;  %v4951_v37 = vsub.f32 %v11270_v63, %v12327_v8 }
 0x742   : > { %4836 = vrot.lane.b32.xlu1 %v4829_v4, %s9595_s27  ;;  %4834 = vrot.lane.b32.xlu0 %v4828_v2, %s9595_s27 }
 0x746   : > { %4838 = vrot.lane.b32.xlu0 %v4830_v18, %s9595_s27  ;;  %v11329_v18 = vand.u32 4294901760, %v11295_v1 }
 0x748   : > { %12528 = vst [vmem:[#allocation11_spill] sm:$0xff] %v11329_v18 }
 0x784   : > { %v4666_v46 = vpop.permute.xlu1 %4665  ;;  %v4646_v11 = vpop.permute.xlu0 %4645 }
 0x788   : > { %v11252_v23 = vpop.permute.xlu1 %4705  ;;  %v4686_v30 = vpop.permute.xlu0 %4685 }
 0x78c   : > { %v11254_v34 = vpop.permute.xlu1 %4745  ;;  %v11256_v15 = vpop.permute.xlu0 %4725 }
 0x790   : > { %v4650_v40 = vpop.permute.xlu1 %4649  ;;  %v4648_v61 = vpop.permute.xlu0 %4647 }
 0x791   : > { %4658 = vst.msk [vmem:[#allocation4 + $0x28] sm:$0xff] %vm261_vm0, %v4650_v40  ;;  %v4651_v53 = vsel %vm275_vm2, %v4646_v11, %v4648_v61  ;;  %v4652_v0 = vsel %vm275_vm2, %v4648_v61, %v4650_v40 }
 0x792   : > { %v4852_v10 = vand.u32 4294901760, %v4652_v0  ;;  %v4854_v38 = vand.u32 4294901760, %v4651_v53 }
 0x794   : > { %v4668_v36 = vpop.permute.xlu1 %4667  ;;  %v4670_v14 = vpop.permute.xlu0 %4669  ;;  %v11266_v49 = vpack.c.bf16 %v4852_v10, %v4848_v39  ;;  %v11268_v31 = vpack.c.bf16 %v4854_v38, %v4850_v50  ;;  %v11279_v33 = vsub.f32 %v4652_v0, %v4852_v10  ;;  %v11284_v27 = vsub.f32 %v4651_v53, %v4854_v38 }
 0x795   : > { %4678 = vst.msk [vmem:[#allocation4 + $0x40] sm:$0xff] %vm261_vm0, %v4670_v14  ;;  %v4671_v44 = vsel %vm296_vm3, %v4666_v46, %v4668_v36  ;;  %v4672_v54 = vsel %vm296_vm3, %v4668_v36, %v4670_v14 }
 0x796   : > { %9121 = vmatprep.subr.bf16.mxu0 %v11266_v49  ;;  %v4856_v24 = vand.u32 4294901760, %v4672_v54  ;;  %v4858_v25 = vand.u32 4294901760, %v4671_v44  ;;  %v12328_v7 = vand.u32 4294901760, %v11279_v33  ;;  %v12326_v32 = vand.u32 4294901760, %v11284_v27 }
 0x797   : > { %9123 = vmatpush1.bf16.msra.mxu0 %v11268_v31 }
 0x798   : > { %v4688_v59 = vpop.permute.xlu1 %4687  ;;  %v4690_v48 = vpop.permute.xlu0 %4689  ;;  %v4806_v21 = vld [vmem:[#allocation4 + $0x28] sm:$0xff]  ;;  %v4957_v46 = vsub.f32 %v11279_v33, %v12328_v7  ;;  %v11334_v40 = vsub.f32 %v4672_v54, %v4856_v24  ;;  %v4963_v61 = vsub.f32 %v11284_v27, %v12326_v32  ;;  %v11353_v26 = vsub.f32 %v4671_v44, %v4858_v25 }
 0x799   : > { %v4691_v9 = vsel %vm317_vm4, %v4686_v30, %v4688_v59  ;;  %v4692_v22 = vsel %vm317_vm4, %v4688_v59, %v4690_v48  ;;  %4698 = vst.msk [vmem:[#allocation4 + $0x58] sm:$0xff] %vm261_vm0, %v4690_v48  ;;  %v5525_v6 = vand.u32 4294901760, %v4806_v21 }
 0x79a   : > { %v4860_v56 = vand.u32 4294901760, %v4692_v22  ;;  %v4862_v47 = vand.u32 4294901760, %v4691_v9  ;;  %v4958_v54 = vand.u32 4294901760, %v4957_v46 }
 0x79b   : > { %v11292_v58 = vpack.c.bf16 %v5525_v6, %v5522_v43  ;;  %v11305_v41 = vsub.f32 %v4806_v21, %v5525_v6  ;;  %v4964_v6 = vand.u32 4294901760, %v4963_v61 }
 0x79c   : > { %v4708_v55 = vpop.permute.xlu1 %4707  ;;  %v4710_v20 = vpop.permute.xlu0 %4709  ;;  %v11298_v62 = vpack.c.bf16 %v4860_v56, %v4856_v24  ;;  %v11300_v60 = vpack.c.bf16 %v4862_v47, %v4858_v25  ;;  %v4809_v42 = vld [vmem:[#allocation4 + $0x40] sm:$0xff]  ;;  %v12329_v24 = vand.u32 4294901760, %v11334_v40 }
 0x79d   : > { %4718 = vst.msk [vmem:[#allocation4 + $0x70] sm:$0xff] %vm261_vm0, %v4710_v20  ;;  %9218 = vmatpush3.bf16.msra.mxu1 %v11292_v58  ;;  %v11322_v4 = vsel %vm338_vm6, %v11252_v23, %v4708_v55  ;;  %v11325_v2 = vsel %vm338_vm6, %v4708_v55, %v4710_v20  ;;  %v5528_v39 = vand.u32 4294901760, %v4809_v42  ;;  %v11336_v23 = vsub.f32 %v4692_v22, %v4860_v56 }
 0x79e   : > { %9219 = vmatprep.subr.bf16.mxu1 %v12381_v29  ;;  %9125 = vmatprep.subr.bf16.mxu0 %v11298_v62  ;;  %v12324_v43 = vand.u32 4294901760, %v11305_v41  ;;  %v4864_v16 = vand.u32 4294901760, %v11325_v2  ;;  %v4866_v38 = vand.u32 4294901760, %v11322_v4  ;;  %v11367_v56 = vsub.f32 %v4691_v9, %v4862_v47 }
 0x79f   : > { %9127 = vmatpush1.bf16.msra.mxu0 %v11300_v60  ;;  %v4946_v55 = vand.u32 4294901760, %v4945_v3  ;;  %v4952_v20 = vand.u32 4294901760, %v4951_v37  ;;  %v12331_v46 = vand.u32 4294901760, %v11336_v23  ;;  %v5610_v9 = vand.u32 4294901760, %v11312_v57 }
 0x7a0   : > { %v4728_v11 = vpop.permute.xlu1 %4727  ;;  %v4730_v30 = vpop.permute.xlu0 %4729  ;;  %v4812_v17 = vld [vmem:[#allocation4 + $0x58] sm:$0xff]  ;;  %v5616_v44 = vsub.f32 %v11305_v41, %v12324_v43  ;;  %v4969_v3 = vsub.f32 %v11334_v40, %v12329_v24 }
 0x7a1   : > { %v11343_v50 = vsel %vm359_vm7, %v11256_v15, %v4728_v11  ;;  %v4732_v53 = vsel %vm359_vm7, %v4728_v11, %v4730_v30  ;;  %4738 = vst.msk [vmem:[#allocation4 + $0x88] sm:$0xff] %vm261_vm0, %v4730_v30  ;;  %v5531_v0 = vand.u32 4294901760, %v4812_v17  ;;  %v4934_v15 = vsub.f32 %v11295_v1, %v11329_v18 }
 0x7a2   : > { %v4868_v10 = vand.u32 4294901760, %v4732_v53  ;;  %v4870_v36 = vand.u32 4294901760, %v11343_v50  ;;  %v11373_v30 = vsub.f32 %v4809_v42, %v5528_v39  ;;  %v11379_v32 = vpack.c.bf16 %v4958_v54, %v4946_v55 }
 0x7a3   : > { %v11351_v14 = vpack.c.bf16 %v5531_v0, %v5528_v39  ;;  %v11376_v61 = vand.u32 4294901760, %v4934_v15  ;;  %v11381_v8 = vpack.c.bf16 %v4964_v6, %v4952_v20  ;;  %v5617_v57 = vand.u32 4294901760, %v5616_v44 }
 0x7a4   : > { %v4748_v59 = vpop.permute.xlu1 %4747  ;;  %v4750_v48 = vpop.permute.xlu0 %4749  ;;  %v11357_v21 = vpack.c.bf16 %v4868_v10, %v4864_v16  ;;  %v11359_v22 = vpack.c.bf16 %v4870_v36, %v4866_v38  ;;  %v4815_v25 = vld [vmem:[#allocation4 + $0x70] sm:$0xff]  ;;  %v4981_v54 = vsub.f32 %v11336_v23, %v12331_v46  ;;  %v11395_v20 = vsub.f32 %v4812_v17, %v5531_v0 }
 0x7a5   : > { %4758 = vst.msk [vmem:[#allocation4 + $0xa0] sm:$0xff] %vm261_vm0, %v4750_v48  ;;  %9221 = vmatpush3.bf16.msra.mxu1 %v11351_v14  ;;  %v4752_v11 = vsel %vm380_vm8, %v4748_v59, %v4750_v48  ;;  %v5534_v39 = vand.u32 4294901760, %v4815_v25  ;;  %v4751_v55 = vsel %vm380_vm8, %v11254_v34, %v4748_v59  ;;  %v11401_v44 = vsub.f32 %v11325_v2, %v4864_v16 }
 0x7a6   : > { %9222 = vmatprep.subr.bf16.mxu1 %v12381_v29  ;;  %9129 = vmatprep.subr.bf16.mxu0 %v11357_v21  ;;  %v4872_v48 = vand.u32 4294901760, %v4752_v11  ;;  %v11403_v13 = vsub.f32 %v4732_v53, %v4868_v10  ;;  %v11406_v46 = vsub.f32 %v11322_v4, %v4866_v38  ;;  %v11412_v17 = vpack.c.bf16 %v5617_v57, %v5610_v9 }
 0x7a7   : > { %9131 = vmatpush1.bf16.msra.mxu0 %v11359_v22  ;;  %v4970_v0 = vand.u32 4294901760, %v4969_v3  ;;  %v12531_v59 = vand.u32 4294901760, %v11353_v26  ;;  %v11420_v2 = vsub.f32 %v11343_v50, %v4870_v36  ;;  %v4874_v53 = vand.u32 4294901760, %v4751_v55 }
 0x7a8   : > { %v4768_v47 = vpop.permute.xlu1 %4767  ;;  %v4770_v43 = vpop.permute.xlu0 %4769  ;;  %v4818_v12 = vld [vmem:[#allocation4 + $0x88] sm:$0xff]  ;;  %v4982_v10 = vand.u32 4294901760, %v4981_v54  ;;  %v11424_v38 = vsub.f32 %v4815_v25, %v5534_v39  ;;  %v12532_v9 = vand.u32 4294901760, %v11373_v30  ;;  %v12533_v50 = vand.u32 4294901760, %v11367_v56 }
 0x7a9   : > { %v4772_v37 = vsel %vm401_vm9, %v4768_v47, %v4770_v43  ;;  %4778 = vst.msk [vmem:[#allocation4 + $0xb8] sm:$0xff] %vm261_vm0, %v4770_v43  ;;  %v5537_v15 = vand.u32 4294901760, %v4818_v12  ;;  %v11417_v43 = vsub.f32 %v11353_v26, %v12531_v59  ;;  %v11435_v51 = vsub.f32 %v4752_v11, %v4872_v48 }
 0x7aa   : > { %v4876_v7 = vand.u32 4294901760, %v4772_v37  ;;  %v4987_v36 = vsub.f32 %v11367_v56, %v12533_v50 }
 0x7ab   : > { %v11397_v24 = vpack.c.bf16 %v5537_v15, %v5534_v39  ;;  %v11445_v50 = vsub.f32 %v4818_v12, %v5537_v15  ;;  %v12538_v15 = vand.u32 4294901760, %v11403_v13 }
 0x7ac   : > { %v4788_v28 = vpop.permute.xlu1 %4787  ;;  %v4766_v42 = vpop.permute.xlu0 %4765  ;;  %v11408_v6 = vpack.c.bf16 %v4876_v7, %v4872_v48  ;;  %v4821_v4 = vld [vmem:[#allocation4 + $0xa0] sm:$0xff]  ;;  %v11437_v45 = vsub.f32 %v4772_v37, %v4876_v7  ;;  %v12540_v37 = vand.u32 4294901760, %v11420_v2 }
 0x7ad   : > { %12529 = vst [vmem:[#allocation5_spill] sm:$0xff] %v11397_v24  ;;  %v4771_v34 = vsel %vm401_vm9, %v4766_v42, %v4768_v47  ;;  %9224 = vmatpush3.bf16.msra.mxu1 %v11397_v24  ;;  %v11429_v47 = vsub.f32 %v11373_v30, %v12532_v9  ;;  %v5540_v3 = vand.u32 4294901760, %v4821_v4  ;;  %v12541_v24 = vand.u32 4294901760, %v11406_v46 }
 0x7ae   : > { %12530 = vst [vmem:[#allocation12_spill] sm:$0xff] %v11408_v6  ;;  %9225 = vmatprep.subr.bf16.mxu1 %v12381_v29  ;;  %9133 = vmatprep.subr.bf16.mxu0 %v11408_v6  ;;  %v4878_v16 = vand.u32 4294901760, %v4771_v34 }
 0x7b0   : > { %v4786_v42 = vpop.permute.xlu1 %4785  ;;  %v4790_v57 = vpop.permute.xlu0 %4789  ;;  %v4824_v59 = vld [vmem:[#allocation4 + $0xb8] sm:$0xff]  ;;  %v11439_v25 = vpack.c.bf16 %v4878_v16, %v4874_v53  ;;  %v11454_v39 = vsub.f32 %v4771_v34, %v4878_v16  ;;  %v11468_v34 = vsub.f32 %v4751_v55, %v4874_v53  ;;  %v4976_v16 = vand.u32 4294901760, %v11417_v43 }
 0x7b1   : > { %v4791_v54 = vsel %vm422_vm10, %v4786_v42, %v4788_v28  ;;  %v4792_v9 = vsel %vm422_vm10, %v4788_v28, %v4790_v57  ;;  %4798 = vst.msk [vmem:[#allocation4 + $0xd0] sm:$0xff] %vm261_vm0, %v4790_v57  ;;  %v5543_v18 = vand.u32 4294901760, %v4824_v59  ;;  %v9140_v42 = vpack.c.bf16 %v4982_v10, %v4970_v0 }
 0x7b2   : > { %12534 = vst [vmem:[#allocation13_spill] sm:$0xff] %v11439_v25  ;;  %9135 = vmatpush1.bf16.msra.mxu0 %v11439_v25  ;;  %v11448_v11 = vand.u32 4294901760, %v4792_v9  ;;  %v12536_v28 = vand.u32 4294901760, %v11395_v20  ;;  %v11460_v12 = vand.u32 4294901760, %v4791_v54  ;;  %v5005_v25 = vsub.f32 %v11403_v13, %v12538_v15 }
 0x7b3   : > { %v11452_v48 = vpack.c.bf16 %v5543_v18, %v5540_v3  ;;  %v5624_v0 = vand.u32 4294901760, %v11429_v47  ;;  %v4988_v10 = vand.u32 4294901760, %v4987_v36  ;;  %v5011_v55 = vsub.f32 %v11420_v2, %v12540_v37 }
 0x7b4   : > { %v5630_v57 = vsub.f32 %v11395_v20, %v12536_v28  ;;  %4881 = vmatprep.subr.mxu0 %v11448_v11  ;;  %12537 = vst [vmem:[#allocation10_spill] sm:$0xff] %v11460_v12  ;;  %v12539_v28 = vand.u32 4294901760, %v11401_v44  ;;  %v11482_v47 = vsub.f32 %v4824_v59, %v5543_v18  ;;  %v5006_v7 = vand.u32 4294901760, %v5005_v25 }
 0x7b5   : > { %12535 = vst [vmem:[#allocation9_spill] sm:$0xff] %v11452_v48  ;;  %9227 = vmatpush3.bf16.msra.mxu1 %v11452_v48  ;;  %v4999_v37 = vsub.f32 %v11406_v46, %v12541_v24  ;;  %v12542_v18 = vand.u32 4294901760, %v11437_v45  ;;  %v12344_v25 = vand.u32 4294901760, %v11468_v34  ;;  %v12543_v24 = vand.u32 4294901760, %v11445_v50 }
 0x7b6   : > { %8380 = vmatprep.subr.mxu1 %v12373_v35  ;;  %4883 = vmatpush1.msra.mxu0 %v11460_v12  ;;  %v4993_v15 = vsub.f32 %v11401_v44, %v12539_v28  ;;  %v5631_v43 = vand.u32 4294901760, %v5630_v57  ;;  %v11499_v57 = vsub.f32 %v4821_v4, %v5540_v3  ;;  %v5012_v6 = vand.u32 4294901760, %v5011_v55 }
 0x7b7   : > { %9137 = vmatprep.subr.bf16.mxu0 %v11379_v32  ;;  %4936 = vmatmul.mubr.f32.vlgmr.msra.gmra.mrb[6].mxu0 %v11376_v61  ;;  %v5029_v59 = vsub.f32 %v11437_v45, %v12542_v18  ;;  %v11496_v32 = vsub.f32 %v4792_v9, %v11448_v11  ;;  %v5644_v53 = vsub.f32 %v11445_v50, %v12543_v24  ;;  %v12544_v18 = vand.u32 4294901760, %v11435_v51 }
 0x7b8   : > { %v4827_v28 = vld [vmem:[#allocation4 + $0xd0] sm:$0xff]  ;;  %9139 = vmatpush1.bf16.msra.mxu0 %v11381_v8  ;;  %5096 = vmatprep.mubr.f32.mxu0 %v12373_v35  ;;  %v9142_v8 = vpack.c.bf16 %v4988_v10, %v4976_v16  ;;  %v4994_v36 = vand.u32 4294901760, %v4993_v15  ;;  %v11512_v4 = vsub.f32 %v4791_v54, %v11460_v12  ;;  %v12545_v3 = vand.u32 4294901760, %v11424_v38 }
 0x7b9   : > { %v11501_v48 = vand.u32 4294901760, %v4827_v28  ;;  %9141 = vmatprep.subr.bf16.mxu0 %v9140_v42  ;;  %v5017_v9 = vsub.f32 %v11435_v51, %v12544_v18  ;;  %v12546_v10 = vand.u32 4294901760, %v11454_v39  ;;  %v5000_v24 = vand.u32 4294901760, %v4999_v37 }
 0x7ba   : > { %v5637_v42 = vsub.f32 %v11424_v38, %v12545_v3  ;;  %v9144_v55 = vpack.c.bf16 %v5006_v7, %v4994_v36  ;;  %v5030_v18 = vand.u32 4294901760, %v5029_v59  ;;  %v5040_v54 = vand.u32 4294901760, %v11496_v32 }
 0x7bb   : > { %8381 = vmatpush3.msra.mxu1 %v11501_v48  ;;  %v5035_v15 = vsub.f32 %v11454_v39, %v12546_v10  ;;  %v5023_v16 = vsub.f32 %v11468_v34, %v12344_v25  ;;  %v9232_v10 = vpack.c.bf16 %v5631_v43, %v5624_v0  ;;  %v5645_v12 = vand.u32 4294901760, %v5644_v53 }
 0x7bc   : > { %9228 = vmatprep.subr.bf16.mxu1 %v12381_v29  ;;  %8383 = vmatmul.mubr.f32.vlgmr.msra.gmra.mrb[6].mxu1 %v11376_v61  ;;  %v9146_v61 = vpack.c.bf16 %v5012_v6, %v5000_v24  ;;  %v5018_v7 = vand.u32 4294901760, %v5017_v9  ;;  %v11531_v36 = vsub.f32 %v4827_v28, %v11501_v48  ;;  %v12547_v37 = vand.u32 4294901760, %v11482_v47 }
 0x7bd   : > { %9230 = vmatpush3.bf16.msra.mxu1 %v11412_v17  ;;  %9143 = vmatpush1.bf16.msra.mxu0 %v9142_v8  ;;  %v5036_v59 = vand.u32 4294901760, %v5035_v15  ;;  %v5046_v8 = vand.u32 4294901760, %v11512_v4  ;;  %v5638_v25 = vand.u32 4294901760, %v5637_v42  ;;  %v5041_v6 = vsub.f32 %v11496_v32, %v5040_v54 }
 0x7be   : > { %9231 = vmatprep.subr.bf16.mxu1 %v12381_v29  ;;  %9145 = vmatprep.subr.bf16.mxu0 %v9144_v55  ;;  %v5658_v17 = vsub.f32 %v11482_v47, %v12547_v37  ;;  %v9148_v3 = vpack.c.bf16 %v5030_v18, %v5018_v7  ;;  %v12548_v0 = vand.u32 4294901760, %v11499_v57  ;;  %v5024_v43 = vand.u32 4294901760, %v5023_v16 }
 0x7bf   : > { %8403 = vmatprep.mubr.msk.f32.mxu1 %vm9601_vm1, %v12373_v35  ;;  %v9235_v28 = vpack.c.bf16 %v5645_v12, %v5638_v25  ;;  %v5664_v42 = vand.u32 4294901760, %v11531_v36  ;;  %v5047_v55 = vsub.f32 %v11512_v4, %v5046_v8  ;;  %v5042_v24 = vand.u32 4294901760, %v5041_v6 }
 0x7c0   : > { %v5651_v53 = vsub.f32 %v11499_v57, %v12548_v0  ;;  %v5659_v9 = vand.u32 4294901760, %v5658_v17  ;;  %v9150_v15 = vpack.c.bf16 %v5036_v59, %v5024_v43  ;;  %v9156_v7 = vpack.c.bf16 %v11336_v23, %v11334_v40 }
 0x7c1   : > { %9233 = vmatpush3.bf16.msra.mxu1 %v9232_v10  ;;  %9147 = vmatpush1.bf16.msra.mxu0 %v9146_v61  ;;  %v5665_v12 = vsub.f32 %v11531_v36, %v5664_v42  ;;  %v5048_v25 = vand.u32 4294901760, %v5047_v55  ;;  %v9154_v10 = vpack.c.bf16 %v11284_v27, %v11270_v63  ;;  %v9241_v37 = vpack.c.bf16 %v11305_v41, %v11274_v19  ;;  %v12551_v55 = vld [vmem:[#allocation13_spill] sm:$0xff] }
 0x7c2   : > { %9234 = vmatprep.subr.bf16.mxu1 %v12381_v29  ;;  %9149 = vmatprep.subr.bf16.mxu0 %v9148_v3  ;;  %v5652_v18 = vand.u32 4294901760, %v5651_v53  ;;  %v9152_v3 = vpack.c.bf16 %v11279_v33, %v11264_v5  ;;  %v9158_v17 = vpack.c.bf16 %v11367_v56, %v11353_v26  ;;  %v9160_v59 = vpack.c.bf16 %v11403_v13, %v11401_v44 }
 0x7c3   : > { %v5666_v61 = vand.u32 4294901760, %v5665_v12  ;;  %v9244_v6 = vpack.c.bf16 %v11395_v20, %v11373_v30  ;;  %v9162_v0 = vpack.c.bf16 %v11420_v2, %v11406_v46  ;;  %v9164_v53 = vpack.c.bf16 %v11437_v45, %v11435_v51 }
 0x7c4   : > { %v9238_v16 = vpack.c.bf16 %v5659_v9, %v5652_v18  ;;  %v9247_v43 = vpack.c.bf16 %v11445_v50, %v11424_v38  ;;  %v9250_v9 = vpack.c.bf16 %v11482_v47, %v11499_v57  ;;  %v12553_v18 = vand.u32 4294901760, %v11264_v5 }
 0x7c5   : > { %9236 = vmatpush3.bf16.msra.mxu1 %v9235_v28  ;;  %9151 = vmatpush1.bf16.msra.mxu0 %v9150_v15  ;;  %v9166_v28 = vpack.c.bf16 %v11454_v39, %v11468_v34  ;;  %v12549_v15 = vld [vmem:[#allocation12_spill] sm:$0xff] }
 0x7c6   : > { %9237 = vmatprep.subr.bf16.mxu1 %v12381_v29  ;;  %5043 = vmatprep.subr.mxu0 %v5042_v24  ;;  %v12552_v24 = vld [vmem:[#allocation9_spill] sm:$0xff] }
 0x7c9   : > { %9239 = vmatpush3.bf16.msra.mxu1 %v9238_v16  ;;  %5049 = vmatpush1.msra.mxu0 %v5048_v25  ;;  %v12554_v16 = vand.u32 4294901760, %v11279_v33  ;;  %v12555_v25 = vld [vmem:[#allocation10_spill] sm:$0xff]  ;;  %v12561_v33 = vand.u32 4294901760, %v11274_v19  ;;  %v12567_v19 = vand.u32 4294901760, %v11373_v30  ;;  %v12573_v30 = vand.u32 4294901760, %v11424_v38 }
 0x7ca   : > { %8401 = vmatprep.subr.mxu1 %v12373_v35  ;;  %9153 = vmatprep.subr.bf16.mxu0 %v9152_v3  ;;  %v12556_v3 = vand.u32 4294901760, %v11270_v63  ;;  %v12562_v63 = vand.u32 4294901760, %v11305_v41  ;;  %v12568_v41 = vand.u32 4294901760, %v11395_v20  ;;  %v12574_v20 = vand.u32 4294901760, %v11445_v50 }
 0x7cb   : > { %5098 = vmatmul.mubr.f32.vlgmr.msra.gmra.mrb[6].mxu0 %v11282_v52  ;;  %v9184_v12 = vpack.c.bf16 %v12554_v16, %v12553_v18 }
 0x7cc   : > { %9155 = vmatpush1.bf16.msra.mxu0 %v9154_v10  ;;  %5204 = vmatprep.mubr.f32.mxu0 %v12373_v35  ;;  %v12557_v10 = vand.u32 4294901760, %v11284_v27  ;;  %v12563_v27 = vand.u32 4294901760, %v11353_v26  ;;  %v9268_v26 = vpack.c.bf16 %v12568_v41, %v12567_v19  ;;  %v9271_v18 = vpack.c.bf16 %v12574_v20, %v12573_v30 }
 0x7cd   : > { %8402 = vmatpush3.msra.mxu1 %v5666_v61  ;;  %9157 = vmatprep.subr.bf16.mxu0 %v9156_v7  ;;  %v12558_v7 = vld [vmem:[#allocation11_spill] sm:$0xff] }
 0x7ce   : > { %9240 = vmatprep.subr.bf16.mxu1 %v12381_v29  ;;  %8404 = vmatmul.mubr.f32.vlgmr.msra.gmra.mrb[6].mxu1 %v11282_v52  ;;  %v9186_v61 = vpack.c.bf16 %v12557_v10, %v12556_v3 }
 0x7cf   : > { %9242 = vmatpush3.bf16.msra.mxu1 %v9241_v37  ;;  %8424 = vmatprep.mubr.msk.f32.mxu1 %vm9601_vm1, %v12373_v35  ;;  %v12559_v37 = vand.u32 4294901760, %v11334_v40  ;;  %v12564_v40 = vand.u32 4294901760, %v11367_v56  ;;  %v12569_v56 = vand.u32 4294901760, %v11406_v46  ;;  %v12575_v46 = vand.u32 4294901760, %v11468_v34  ;;  %v12579_v34 = vld [vmem:[#allocation6_spill] sm:$0xff] }
 0x7d0   : > { %9243 = vmatprep.subr.bf16.mxu1 %v12381_v29  ;;  %9159 = vmatpush1.bf16.msra.mxu0 %v9158_v17  ;;  %v12560_v17 = vand.u32 4294901760, %v11336_v23 }
 0x7d1   : > { %9161 = vmatprep.subr.bf16.mxu0 %v9160_v59  ;;  %v9265_v59 = vpack.c.bf16 %v12562_v63, %v12561_v33  ;;  %v9190_v23 = vpack.c.bf16 %v12564_v40, %v12563_v27  ;;  %v7683_v40 = vld [vmem:[%s12246_s1 + $0x20] sm:$0xff] }
 0x7d2   : > { %v9188_v5 = vpack.c.bf16 %v12560_v17, %v12559_v37 }
 0x7d3   : > { %9245 = vmatpush3.bf16.msra.mxu1 %v9244_v6  ;;  %v12565_v6 = vand.u32 4294901760, %v11401_v44 }
 0x7d4   : > { %9246 = vmatprep.subr.bf16.mxu1 %v12381_v29  ;;  %9163 = vmatpush1.bf16.msra.mxu0 %v9162_v0  ;;  %v12566_v0 = vand.u32 4294901760, %v11403_v13  ;;  %v12571_v13 = vand.u32 4294901760, %v11435_v51  ;;  %v12578_v51 = vand.u32 4294901760, %v11482_v47 }
 0x7d5   : > { %9165 = vmatprep.subr.bf16.mxu0 %v9164_v53 }
 0x7d6   : > { %v9192_v53 = vpack.c.bf16 %v12566_v0, %v12565_v6 }
 0x7d7   : > { %9248 = vmatpush3.bf16.msra.mxu1 %v9247_v43  ;;  %v12570_v43 = vand.u32 4294901760, %v11420_v2  ;;  %v12576_v2 = vand.u32 4294901760, %v11454_v39 }
 0x7d8   : > { %9249 = vmatprep.subr.bf16.mxu1 %v12381_v29  ;;  %9167 = vmatpush1.bf16.msra.mxu0 %v9166_v28  ;;  %v12572_v28 = vand.u32 4294901760, %v11437_v45  ;;  %v12577_v45 = vand.u32 4294901760, %v11499_v57  ;;  %v12580_v57 = vld [vmem:[#allocation7_spill] sm:$0xff] }
 0x7d9   : > { %5154 = vmatprep.subr.mxu0 %v11496_v32  ;;  %v9194_v44 = vpack.c.bf16 %v12570_v43, %v12569_v56  ;;  %v9198_v16 = vpack.c.bf16 %v12576_v2, %v12575_v46  ;;  %v6290_v43 = vsel %vm459_vm5, %v7683_v40, 0 }
 0x7da   : > { %v11775_v20 = vand.u32 4294901760, %v6290_v43 }
 0x7db   : > { %9251 = vmatpush3.bf16.msra.mxu1 %v9250_v9  ;;  %v9196_v9 = vpack.c.bf16 %v12572_v28, %v12571_v13 }
 0x7dc   : > { %8422 = vmatprep.subr.mxu1 %v12373_v35  ;;  %5157 = vmatpush1.msra.mxu0 %v11512_v4 }
 0x7dd   : > { %9169 = vmatprep.subr.bf16.mxu0 %v11266_v49  ;;  %5207 = vmatmul.mubr.f32.vlgmr.msra.gmra.mrb[6].mxu0 %v11295_v1 }
 0x7de   : > { %9171 = vmatpush1.bf16.msra.mxu0 %v11268_v31  ;;  %5295 = vmatprep.mubr.f32.mxu0 %v12373_v35 }
 0x7df   : > { %8423 = vmatpush3.msra.mxu1 %v11531_v36  ;;  %9173 = vmatprep.subr.bf16.mxu0 %v11298_v62 }
 0x7e0   : > { %9252 = vmatprep.subr.bf16.mxu1 %v12381_v29  ;;  %8425 = vmatmul.mubr.f32.vlgmr.msra.gmra.mrb[6].mxu1 %v11295_v1  ;;  %v12550_v1 = vld [vmem:[#allocation5_spill] sm:$0xff] }
 0x7e1   : > { %9254 = vmatpush3.bf16.msra.mxu1 %v11292_v58  ;;  %8445 = vmatprep.mubr.msk.f32.mxu1 %vm9601_vm1, %v12373_v35 }
 0x7e2   : > { %9255 = vmatprep.subr.bf16.mxu1 %v12381_v29  ;;  %9175 = vmatpush1.bf16.msra.mxu0 %v11300_v60 }
 0x7e3   : > { %9177 = vmatprep.subr.bf16.mxu0 %v11357_v21 }
 0x7e5   : > { %9257 = vmatpush3.bf16.msra.mxu1 %v11351_v14 }
 0x7e6   : > { %9258 = vmatprep.subr.bf16.mxu1 %v12381_v29  ;;  %9179 = vmatpush1.bf16.msra.mxu0 %v11359_v22 }
 0x7e7   : > { %9181 = vmatprep.subr.bf16.mxu0 %v12549_v15 }
 0x7e9   : > { %9260 = vmatpush3.bf16.msra.mxu1 %v12550_v1 }
 0x7ea   : > { %9261 = vmatprep.subr.bf16.mxu1 %v12381_v29  ;;  %9183 = vmatpush1.bf16.msra.mxu0 %v12551_v55 }
 0x7eb   : > { %5246 = vmatprep.subr.mxu0 %v11448_v11 }
 0x7ed   : > { %9263 = vmatpush3.bf16.msra.mxu1 %v12552_v24 }
 0x7ee   : > { %8443 = vmatprep.subr.mxu1 %v12373_v35  ;;  %5248 = vmatpush1.msra.mxu0 %v12555_v25 }
 0x7ef   : > { %9185 = vmatprep.subr.bf16.mxu0 %v9184_v12  ;;  %5299 = vmatmul.mubr.f32.vlgmr.msra.gmra.mrb[6].mxu0 %v12558_v7  ;;  %v9274_v12 = vpack.c.bf16 %v12578_v51, %v12577_v45 }
 0x7f0   : > { %9187 = vmatpush1.bf16.msra.mxu0 %v9186_v61  ;;  %5423 = vmatprep.mubr.f32.mxu0 %v12373_v35 }
 0x7f1   : > { %8444 = vmatpush3.msra.mxu1 %v11501_v48  ;;  %9189 = vmatprep.subr.bf16.mxu0 %v9188_v5 }
 0x7f2   : > { %9264 = vmatprep.subr.bf16.mxu1 %v12381_v29  ;;  %8446 = vmatmul.mubr.f32.vlgmr.msra.gmra.mrb[6].mxu1 %v12558_v7 }
 0x7f3   : > { %9266 = vmatpush3.bf16.msra.mxu1 %v9265_v59  ;;  %8466 = vmatprep.mubr.msk.f32.mxu1 %vm9601_vm1, %v12373_v35 }
 0x7f4   : > { %9267 = vmatprep.subr.bf16.mxu1 %v12381_v29  ;;  %9191 = vmatpush1.bf16.msra.mxu0 %v9190_v23 }
 0x7f5   : > { %9193 = vmatprep.subr.bf16.mxu0 %v9192_v53 }
 0x7f7   : > { %9269 = vmatpush3.bf16.msra.mxu1 %v9268_v26 }
 0x7f8   : > { %9270 = vmatprep.subr.bf16.mxu1 %v12381_v29  ;;  %9195 = vmatpush1.bf16.msra.mxu0 %v9194_v44 }
 0x7f9   : > { %9197 = vmatprep.subr.bf16.mxu0 %v9196_v9 }
 0x7fb   : > { %9272 = vmatpush3.bf16.msra.mxu1 %v9271_v18 }
 0x7fc   : > { %9273 = vmatprep.subr.bf16.mxu1 %v12381_v29  ;;  %9199 = vmatpush1.bf16.msra.mxu0 %v9198_v16 }
 0x7fd   : > { %5372 = vmatprep.subr.mxu0 %v5040_v54  ;;  %v12581_v54 = vld [vmem:[#allocation8_spill] sm:$0xff] }
 0x7ff   : > { %9275 = vmatpush3.bf16.msra.mxu1 %v9274_v12 }
 0x800   : > { %8464 = vmatprep.subr.mxu1 %v12373_v35  ;;  %5376 = vmatpush1.msra.mxu0 %v5046_v8 }
 0x801   : > { %9201 = vmatprep.subr.bf16.mxu0 %v11266_v49  ;;  %5425 = vmatmul.mubr.f32.vlgmr.msra.gmra.mrb[6].mxu0 %v11282_v52  ;;  %v4835_v49 = vpop.permute.xlu0 %4834 }
 0x802   : > { %9203 = vmatpush1.bf16.msra.mxu0 %v11268_v31  ;;  %5513 = vmatprep.mubr.f32.mxu0 %v12373_v35  ;;  %v4837_v31 = vpop.permute.xlu1 %4836 }
 0x803   : > { %8465 = vmatpush3.msra.mxu1 %v5664_v42  ;;  %9205 = vmatprep.subr.bf16.mxu0 %v11298_v62  ;;  %v4840_v62 = vsel %vm338_vm6, %v4835_v49, %v4837_v31 }
 0x804   : > { %9276 = vmatprep.subr.bf16.mxu1 %v12381_v29  ;;  %8467 = vmatmul.mubr.f32.vlgmr.msra.gmra.mrb[6].mxu1 %v11282_v52 }
 0x805   : > { %9278 = vmatpush3.bf16.msra.mxu1 %v11292_v58  ;;  %8487 = vmatprep.mubr.msk.f32.mxu1 %vm9601_vm1, %v12373_v35  ;;  %v4839_v58 = vpop.permute.xlu0 %4838 }
 0x806   : > { %9279 = vmatprep.subr.bf16.mxu1 %v12381_v29  ;;  %9207 = vmatpush1.bf16.msra.mxu0 %v11300_v60 }
 0x807   : > { %9209 = vmatprep.subr.bf16.mxu0 %v11357_v21  ;;  %v4841_v21 = vsel %vm338_vm6, %v4837_v31, %v4839_v58 }
 0x809   : > { %9281 = vmatpush3.bf16.msra.mxu1 %v11351_v14 }
 0x80a   : > { %9282 = vmatprep.subr.bf16.mxu1 %v12381_v29  ;;  %9211 = vmatpush1.bf16.msra.mxu0 %v11359_v22 }
 0x80b   : > { %9213 = vmatprep.subr.bf16.mxu0 %v12549_v15 }
 0x80d   : > { %9284 = vmatpush3.bf16.msra.mxu1 %v12550_v1 }
 0x80e   : > { %9285 = vmatprep.subr.bf16.mxu1 %v12381_v29  ;;  %9215 = vmatpush1.bf16.msra.mxu0 %v12551_v55 }
 0x80f   : > { %5464 = vmatprep.subr.mxu0 %v11448_v11 }
 0x811   : > { %9287 = vmatpush3.bf16.msra.mxu1 %v12552_v24 }
 0x812   : > { %8485 = vmatprep.subr.mxu1 %v12373_v35  ;;  %5466 = vmatpush1.msra.mxu0 %v12555_v25 }
 0x813   : > { %5515 = vmatmul.mubr.f32.vlgmr.msra.gmra.mrb[6].mxu0 %v11282_v52 }
 0x814   : > { %6374 = vmatprep.mubr.f32.mxu0 %v12373_v35 }
 0x815   : > { %8486 = vmatpush3.msra.mxu1 %v11501_v48 }
 0x816   : > { %8488 = vmatmul.mubr.f32.vlgmr.msra.gmra.mrb[6].mxu1 %v11282_v52  ;;  %9384 = vmatprep.subr.bf16.mxu1 %v12381_v29 }
 0x817   : > { %8508 = vmatprep.mubr.msk.f32.mxu1 %vm9601_vm1, %v12373_v35 }
 0x8e6   : > { %v5516_v60 = vpop.f32.mrb[6].mxu0 }
 0x8e7   : > { %v9459_v14 = vadd.f32 %v5516_v60, %v4840_v62  ;;  %v5518_v22 = vpop.f32.mrb[7].mxu0 }
 0x8e8   : > { %v9460_v38 = vadd.f32 %v5518_v22, %v4841_v21 }
 0x8e9   : > { %v6067_v39 = vpop.f32.mrb[6].mxu1  ;;  %v6071_v50 = vmax.f32 %v9459_v14, 0.0 }
 0x8ea   : > { %v9461_v11 = vadd.f32 %v6067_v39, %v4839_v58  ;;  %v8489_v52 = vpop.f32.mrb[7].mxu1  ;;  %v6072_v48 = vmax.f32 %v9460_v38, 0.0  ;;  %v11794_v38 = vsub.f32 %v6290_v43, %v11775_v20 }
 0x8eb   : > { %v6074_v47 = vmul.f32 %v6071_v50, %v12579_v34 }
 0x8ec   : > { %v6073_v32 = vmax.f32 %v9461_v11, 0.0  ;;  %v6075_v4 = vmul.f32 %v6072_v48, %v12580_v57 }
 0x8ed   : > { %6080 = vrot.lane.b32.xlu1 %v6074_v47, %s9602_s11 }
 0x8ee   : > { %v6076_v36 = vmul.f32 %v6073_v32, %v12581_v54  ;;  %6082 = vrot.lane.b32.xlu0 %v6075_v4, %s9602_s11 }
 0x8f1   : > { %6084 = vrot.lane.b32.xlu1 %v6076_v36, %s9602_s11 }
 0x95f   : > { %v6081_v8 = vpop.permute.xlu1 %6080 }
 0x960   : > { %6091 = vst.msk [vmem:[#allocation2] sm:$0xff] %vm1723_vm11, %v6081_v8  ;;  %v6083_v42 = vpop.permute.xlu0 %6082 }
 0x961   : > { %v6086_v15 = vsel %vm1717_vm13, %v6081_v8, %v6083_v42 }
 0x962   : > { %6092 = vst [vmem:[#allocation2 + $0x8] sm:$0xff] %v6086_v15  ;;  %v6292_v27 = vand.u32 4294901760, %v6086_v15 }
 0x963   : > { %v6085_v1 = vpop.permute.xlu1 %6084 }
 0x964   : > { %v6087_v55 = vsel %vm1717_vm13, %v6083_v42, %v6085_v1  ;;  %v11769_v28 = vsub.f32 %v6086_v15, %v6292_v27 }
 0x965   : > { %6093 = vst.msk [vmem:[#allocation2 + $0x10] sm:$0xff] %vm1726_vm12, %v6087_v55  ;;  %v11824_v55 = vand.u32 4294901760, %v11794_v38 }
 0x966   : > { %v12351_v31 = vand.u32 4294901760, %v11769_v28 }
 0x967   : > { %v6120_v24 = vld [vmem:[#allocation2] sm:$0xff]  ;;  %12582 = vst [vmem:[#allocation12_spill] sm:$0xff] %v11824_v55 }
 0x968   : > { %6126 = vrot.lane.b32.xlu1 %v6120_v24, %s9593_s25  ;;  %6106 = vrot.lane.b32.xlu0 %v6120_v24, %s9591_s24  ;;  %v6294_v6 = vand.u32 4294901760, %v6120_v24 }
 0x96a   : > { %v11773_v30 = vsub.f32 %v6120_v24, %v6294_v6 }
 0x96c   : > { %6166 = vrot.lane.b32.xlu1 %v6120_v24, %s9595_s27  ;;  %6146 = vrot.lane.b32.xlu0 %v6120_v24, %s9594_s26  ;;  %v6102_v25 = vld [vmem:[#allocation2 + $0x10] sm:$0xff]  ;;  %v12348_v39 = vand.u32 4294901760, %v11773_v30 }
 0x96d   : > { %6099 = vst.msk [vmem:[#allocation4 + $0x10] sm:$0xff] %vm261_vm0, %v6102_v25 }
 0x970   : > { %6206 = vrot.lane.b32.xlu1 %v6120_v24, %s9597_s29  ;;  %6186 = vrot.lane.b32.xlu0 %v6120_v24, %s9596_s28 }
 0x974   : > { %6110 = vrot.lane.b32.xlu1 %v6102_v25, %s9591_s24  ;;  %6108 = vrot.lane.b32.xlu0 %v6086_v15, %s9591_s24  ;;  %v6264_v41 = vld [vmem:[#allocation4 + $0x10] sm:$0xff] }
 0x975   : > { %v6966_v9 = vand.u32 4294901760, %v6264_v41 }
 0x977   : > { %v11791_v22 = vsub.f32 %v6264_v41, %v6966_v9 }
 0x978   : > { %6128 = vrot.lane.b32.xlu1 %v6086_v15, %s9593_s25  ;;  %6130 = vrot.lane.b32.xlu0 %v6102_v25, %s9593_s25  ;;  %s237_s25 = scalar_lea.vmem %s12248_s3, %s9562_s20 }
 0x979   : > { %7534 = vst.msk [vmem:[%s237_s25] sm:$0xff] %vm1717_vm13, %v12373_v35 }
 0x97c   : > { %6148 = vrot.lane.b32.xlu1 %v6086_v15, %s9594_s26  ;;  %6150 = vrot.lane.b32.xlu0 %v6102_v25, %s9594_s26  ;;  %s7678_s26 = sshll.u32 %s12637_s19, 3 }
 0x97d   : > { %s241_s19 = scalar_lea.vmem %s12249_s4, %s7678_s26 }
 0x980   : > { %6168 = vrot.lane.b32.xlu1 %v6086_v15, %s9595_s27  ;;  %6170 = vrot.lane.b32.xlu0 %v6102_v25, %s9595_s27 }
 0x984   : > { %6188 = vrot.lane.b32.xlu1 %v6086_v15, %s9596_s28  ;;  %6190 = vrot.lane.b32.xlu0 %v6102_v25, %s9596_s28 }
 0x988   : > { %6208 = vrot.lane.b32.xlu1 %v6086_v15, %s9597_s29  ;;  %6210 = vrot.lane.b32.xlu0 %v6102_v25, %s9597_s29  ;;  %s245_s29 = scalar_lea.vmem %s12250_s5, %s7678_s26 }
 0x98c   : > { %6228 = vrot.lane.b32.xlu1 %v6086_v15, %s9598_s30  ;;  %6230 = vrot.lane.b32.xlu0 %v6102_v25, %s9598_s30 }
 0x990   : > { %6248 = vrot.lane.b32.xlu1 %v6086_v15, %s9600_s6  ;;  %6226 = vrot.lane.b32.xlu0 %v6120_v24, %s9598_s30  ;;  %v6389_v15 = vsub.f32 %v11769_v28, %v12351_v31 }
 0x994   : > { %6246 = vrot.lane.b32.xlu1 %v6120_v24, %s9600_s6  ;;  %6250 = vrot.lane.b32.xlu0 %v6102_v25, %s9600_s6  ;;  %v12346_v24 = vand.u32 4294901760, %v11791_v22  ;;  %v6395_v25 = vsub.f32 %v11773_v30, %v12348_v39 }
 0x9da   : > { %v6127_v3 = vpop.permute.xlu1 %6126  ;;  %v6107_v10 = vpop.permute.xlu0 %6106 }
 0x9de   : > { %v6167_v61 = vpop.permute.xlu1 %6166  ;;  %v6147_v7 = vpop.permute.xlu0 %6146 }
 0x9e2   : > { %v11749_v37 = vpop.permute.xlu1 %6206  ;;  %v11751_v17 = vpop.permute.xlu0 %6186 }
 0x9e6   : > { %v6111_v5 = vpop.permute.xlu1 %6110  ;;  %v6109_v33 = vpop.permute.xlu0 %6108 }
 0x9e7   : > { %6119 = vst.msk [vmem:[#allocation4 + $0x28] sm:$0xff] %vm261_vm0, %v6111_v5  ;;  %v6112_v63 = vsel %vm275_vm2, %v6107_v10, %v6109_v33  ;;  %v6113_v59 = vsel %vm275_vm2, %v6109_v33, %v6111_v5 }
 0x9e8   : > { %v6296_v23 = vand.u32 4294901760, %v6113_v59  ;;  %v6298_v0 = vand.u32 4294901760, %v6112_v63 }
 0x9ea   : > { %v6129_v53 = vpop.permute.xlu1 %6128  ;;  %v6131_v19 = vpop.permute.xlu0 %6130  ;;  %v11759_v26 = vpack.c.bf16 %v6296_v23, %v6292_v27  ;;  %v11761_v56 = vpack.c.bf16 %v6298_v0, %v6294_v6  ;;  %v11777_v16 = vsub.f32 %v6113_v59, %v6296_v23  ;;  %v11779_v45 = vsub.f32 %v6112_v63, %v6298_v0 }
 0x9eb   : > { %v11765_v44 = vsel %vm296_vm3, %v6127_v3, %v6129_v53  ;;  %v6133_v13 = vsel %vm296_vm3, %v6129_v53, %v6131_v19  ;;  %6139 = vst.msk [vmem:[#allocation4 + $0x40] sm:$0xff] %vm261_vm0, %v6131_v19 }
 0x9ec   : > { %9289 = vmatprep.subr.bf16.mxu0 %v11759_v26  ;;  %v6300_v58 = vand.u32 4294901760, %v6133_v13  ;;  %v6302_v60 = vand.u32 4294901760, %v11765_v44  ;;  %v12349_v47 = vand.u32 4294901760, %v11777_v16  ;;  %v12347_v32 = vand.u32 4294901760, %v11779_v45 }
 0x9ed   : > { %9291 = vmatpush1.bf16.msra.mxu0 %v11761_v56 }
 0x9ee   : > { %v6149_v18 = vpop.permute.xlu1 %6148  ;;  %v6151_v46 = vpop.permute.xlu0 %6150  ;;  %v6267_v2 = vld [vmem:[#allocation4 + $0x28] sm:$0xff]  ;;  %v11820_v1 = vsub.f32 %v6133_v13, %v6300_v58  ;;  %v6401_v33 = vsub.f32 %v11777_v16, %v12349_v47  ;;  %v6407_v63 = vsub.f32 %v11779_v45, %v12347_v32  ;;  %v11851_v43 = vsub.f32 %v11765_v44, %v6302_v60 }
 0x9ef   : > { %v11782_v51 = vsel %vm317_vm4, %v6147_v7, %v6149_v18  ;;  %v6153_v12 = vsel %vm317_vm4, %v6149_v18, %v6151_v46  ;;  %6159 = vst.msk [vmem:[#allocation4 + $0x58] sm:$0xff] %vm261_vm0, %v6151_v46  ;;  %v6969_v49 = vand.u32 4294901760, %v6267_v2  ;;  %v7053_v13 = vsub.f32 %v11791_v22, %v12346_v24 }
 0x9f0   : > { %v6304_v62 = vand.u32 4294901760, %v6153_v12  ;;  %v6306_v14 = vand.u32 4294901760, %v11782_v51  ;;  %v12585_v31 = vand.u32 4294901760, %v11851_v43 }
 0x9f1   : > { %v11789_v21 = vpack.c.bf16 %v6969_v49, %v6966_v9  ;;  %v11813_v8 = vsub.f32 %v6267_v2, %v6969_v49  ;;  %v12350_v49 = vand.u32 4294901760, %v11820_v1 }
 0x9f2   : > { %v6169_v50 = vpop.permute.xlu1 %6168  ;;  %v6171_v11 = vpop.permute.xlu0 %6170  ;;  %v11797_v52 = vpack.c.bf16 %v6304_v62, %v6300_v58  ;;  %v11801_v48 = vpack.c.bf16 %v6306_v14, %v6302_v60  ;;  %v6270_v42 = vld [vmem:[#allocation4 + $0x40] sm:$0xff]  ;;  %v11830_v5 = vsub.f32 %v6153_v12, %v6304_v62  ;;  %v6402_v12 = vand.u32 4294901760, %v6401_v33 }
 0x9f3   : > { %v11806_v4 = vsel %vm338_vm6, %v6167_v61, %v6169_v50  ;;  %v11809_v36 = vsel %vm338_vm6, %v6169_v50, %v6171_v11  ;;  %6179 = vst.msk [vmem:[#allocation4 + $0x70] sm:$0xff] %vm261_vm0, %v6171_v11  ;;  %9386 = vmatpush3.bf16.msra.mxu1 %v11789_v21  ;;  %v6972_v7 = vand.u32 4294901760, %v6270_v42  ;;  %v12345_v23 = vand.u32 4294901760, %v11813_v8 }
 0x9f4   : > { %9387 = vmatprep.subr.bf16.mxu1 %v12381_v29  ;;  %9293 = vmatprep.subr.bf16.mxu0 %v11797_v52  ;;  %v6308_v6 = vand.u32 4294901760, %v11809_v36  ;;  %v6310_v53 = vand.u32 4294901760, %v11806_v4  ;;  %v6390_v50 = vand.u32 4294901760, %v6389_v15  ;;  %v6408_v11 = vand.u32 4294901760, %v6407_v63 }
 0x9f5   : > { %9295 = vmatpush1.bf16.msra.mxu0 %v11801_v48  ;;  %v7060_v62 = vsub.f32 %v11813_v8, %v12345_v23  ;;  %v7054_v33 = vand.u32 4294901760, %v7053_v13 }
 0x9f6   : > { %v6189_v3 = vpop.permute.xlu1 %6188  ;;  %v6191_v10 = vpop.permute.xlu0 %6190  ;;  %v6273_v61 = vld [vmem:[#allocation4 + $0x58] sm:$0xff]  ;;  %v11886_v15 = vpack.c.bf16 %v6402_v12, %v6390_v50 }
 0x9f7   : > { %v11840_v59 = vsel %vm359_vm7, %v11751_v17, %v6189_v3  ;;  %v6193_v27 = vsel %vm359_vm7, %v6189_v3, %v6191_v10  ;;  %6199 = vst.msk [vmem:[#allocation4 + $0x88] sm:$0xff] %vm261_vm0, %v6191_v10  ;;  %v6975_v40 = vand.u32 4294901760, %v6273_v61  ;;  %v6378_v17 = vsub.f32 %v11794_v38, %v11824_v55 }
 0x9f8   : > { %v6312_v0 = vand.u32 4294901760, %v6193_v27  ;;  %v6314_v19 = vand.u32 4294901760, %v11840_v59  ;;  %v11876_v3 = vsub.f32 %v6270_v42, %v6972_v7  ;;  %v11881_v10 = vsub.f32 %v11782_v51, %v6306_v14 }
 0x9f9   : > { %v11848_v41 = vpack.c.bf16 %v6975_v40, %v6972_v7  ;;  %v11884_v32 = vand.u32 4294901760, %v6378_v17  ;;  %v6413_v42 = vsub.f32 %v11820_v1, %v12350_v49  ;;  %v11899_v12 = vsub.f32 %v6273_v61, %v6975_v40 }
 0x9fa   : > { %v6209_v9 = vpop.permute.xlu1 %6208  ;;  %v6211_v18 = vpop.permute.xlu0 %6210  ;;  %v11858_v46 = vpack.c.bf16 %v6312_v0, %v6308_v6  ;;  %v11860_v2 = vpack.c.bf16 %v6314_v19, %v6310_v53  ;;  %v6276_v60 = vld [vmem:[#allocation4 + $0x70] sm:$0xff]  ;;  %v11908_v54 = vsub.f32 %v6193_v27, %v6312_v0  ;;  %v11922_v49 = vsub.f32 %v11851_v43, %v12585_v31 }
 0x9fb   : > { %v11865_v44 = vsel %vm380_vm8, %v11749_v37, %v6209_v9  ;;  %v6213_v58 = vsel %vm380_vm8, %v6209_v9, %v6211_v18  ;;  %6219 = vst.msk [vmem:[#allocation4 + $0xa0] sm:$0xff] %vm261_vm0, %v6211_v18  ;;  %9389 = vmatpush3.bf16.msra.mxu1 %v11848_v41  ;;  %v12352_v37 = vand.u32 4294901760, %v11830_v5  ;;  %v6396_v9 = vand.u32 4294901760, %v6395_v25 }
 0x9fc   : > { %9390 = vmatprep.subr.bf16.mxu1 %v12381_v29  ;;  %9297 = vmatprep.subr.bf16.mxu0 %v11858_v46  ;;  %v6978_v14 = vand.u32 4294901760, %v6276_v60  ;;  %v7061_v25 = vand.u32 4294901760, %v7060_v62  ;;  %v6316_v13 = vand.u32 4294901760, %v6213_v58  ;;  %v11906_v62 = vsub.f32 %v11809_v36, %v6308_v6 }
 0x9fd   : > { %9299 = vmatpush1.bf16.msra.mxu0 %v11860_v2  ;;  %v11894_v47 = vpack.c.bf16 %v6408_v11, %v6396_v9  ;;  %v6425_v17 = vsub.f32 %v11830_v5, %v12352_v37  ;;  %v11911_v11 = vsub.f32 %v11806_v4, %v6310_v53  ;;  %v6414_v37 = vand.u32 4294901760, %v6413_v42 }
 0x9fe   : > { %v6229_v18 = vpop.permute.xlu1 %6228  ;;  %v6231_v23 = vpop.permute.xlu0 %6230  ;;  %v6279_v24 = vld [vmem:[#allocation4 + $0x88] sm:$0xff]  ;;  %v11917_v40 = vpack.c.bf16 %v7061_v25, %v7054_v33  ;;  %v11925_v36 = vsub.f32 %v11840_v59, %v6314_v19  ;;  %v6318_v27 = vand.u32 4294901760, %v11865_v44  ;;  %v11930_v53 = vsub.f32 %v6276_v60, %v6978_v14 }
 0x9ff   : > { %v6233_v51 = vsel %vm401_vm9, %v6229_v18, %v6231_v23  ;;  %6239 = vst.msk [vmem:[#allocation4 + $0xb8] sm:$0xff] %vm261_vm0, %v6231_v23  ;;  %v6981_v63 = vand.u32 4294901760, %v6279_v24  ;;  %v6426_v0 = vand.u32 4294901760, %v6425_v17  ;;  %v12586_v33 = vand.u32 4294901760, %v11876_v3 }
 0xa00   : > { %v6320_v39 = vand.u32 4294901760, %v6233_v51  ;;  %v12587_v59 = vand.u32 4294901760, %v11881_v10  ;;  %v11941_v57 = vsub.f32 %v6213_v58, %v6316_v13 }
 0xa01   : > { %v11901_v50 = vpack.c.bf16 %v6981_v63, %v6978_v14 }
 0xa02   : > { %v6249_v23 = vpop.permute.xlu1 %6248  ;;  %v6227_v7 = vpop.permute.xlu0 %6226  ;;  %v11913_v9 = vpack.c.bf16 %v6320_v39, %v6316_v13  ;;  %v6282_v4 = vld [vmem:[#allocation4 + $0xa0] sm:$0xff]  ;;  %v6431_v19 = vsub.f32 %v11881_v10, %v12587_v59  ;;  %v11943_v34 = vsub.f32 %v6233_v51, %v6320_v39  ;;  %v11951_v59 = vsub.f32 %v6279_v24, %v6981_v63 }
 0xa03   : > { %12583 = vst [vmem:[#allocation5_spill] sm:$0xff] %v11901_v50  ;;  %v6232_v61 = vsel %vm401_vm9, %v6227_v7, %v6229_v18  ;;  %9392 = vmatpush3.bf16.msra.mxu1 %v11901_v50  ;;  %v11935_v18 = vsub.f32 %v11876_v3, %v12586_v33  ;;  %v6984_v31 = vand.u32 4294901760, %v6282_v4  ;;  %v12592_v63 = vand.u32 4294901760, %v11908_v54 }
 0xa04   : > { %12584 = vst [vmem:[#allocation13_spill] sm:$0xff] %v11913_v9  ;;  %9393 = vmatprep.subr.bf16.mxu1 %v12381_v29  ;;  %9301 = vmatprep.subr.bf16.mxu0 %v11913_v9  ;;  %v6322_v6 = vand.u32 4294901760, %v6232_v61  ;;  %v12594_v39 = vand.u32 4294901760, %v11925_v36  ;;  %v12595_v50 = vand.u32 4294901760, %v11911_v11 }
 0xa06   : > { %v6247_v42 = vpop.permute.xlu1 %6246  ;;  %v6251_v7 = vpop.permute.xlu0 %6250  ;;  %v6285_v25 = vld [vmem:[#allocation4 + $0xb8] sm:$0xff]  ;;  %v11945_v60 = vpack.c.bf16 %v6322_v6, %v6318_v27  ;;  %v11960_v14 = vsub.f32 %v6232_v61, %v6322_v6  ;;  %v7068_v61 = vand.u32 4294901760, %v11935_v18  ;;  %v6420_v6 = vand.u32 4294901760, %v11922_v49 }
 0xa07   : > { %v6252_v17 = vsel %vm422_vm10, %v6247_v42, %v6249_v23  ;;  %v6253_v33 = vsel %vm422_vm10, %v6249_v23, %v6251_v7  ;;  %6259 = vst.msk [vmem:[#allocation4 + $0xd0] sm:$0xff] %vm261_vm0, %v6251_v7  ;;  %v6987_v55 = vand.u32 4294901760, %v6285_v25  ;;  %v9308_v42 = vpack.c.bf16 %v6426_v0, %v6414_v37 }
 0xa08   : > { %12588 = vst [vmem:[#allocation9_spill] sm:$0xff] %v11945_v60  ;;  %9303 = vmatpush1.bf16.msra.mxu0 %v11945_v60  ;;  %v11954_v58 = vand.u32 4294901760, %v6253_v33  ;;  %v12590_v23 = vand.u32 4294901760, %v11899_v12  ;;  %v11966_v24 = vand.u32 4294901760, %v6252_v17  ;;  %v6449_v60 = vsub.f32 %v11908_v54, %v12592_v63 }
 0xa09   : > { %v11958_v13 = vpack.c.bf16 %v6987_v55, %v6984_v31  ;;  %v11975_v37 = vsub.f32 %v11865_v44, %v6318_v27  ;;  %v6432_v0 = vand.u32 4294901760, %v6431_v19  ;;  %v6455_v44 = vsub.f32 %v11925_v36, %v12594_v39 }
 0xa0a   : > { %v7074_v7 = vsub.f32 %v11899_v12, %v12590_v23  ;;  %6325 = vmatprep.subr.mxu0 %v11954_v58  ;;  %12591 = vst [vmem:[#allocation11_spill] sm:$0xff] %v11966_v24  ;;  %v12593_v23 = vand.u32 4294901760, %v11906_v62  ;;  %v11989_v18 = vsub.f32 %v6285_v25, %v6987_v55  ;;  %v6450_v51 = vand.u32 4294901760, %v6449_v60 }
 0xa0b   : > { %12589 = vst [vmem:[#allocation10_spill] sm:$0xff] %v11958_v13  ;;  %9395 = vmatpush3.bf16.msra.mxu1 %v11958_v13  ;;  %v6443_v39 = vsub.f32 %v11911_v11, %v12595_v50  ;;  %v12596_v55 = vand.u32 4294901760, %v11943_v34  ;;  %v12365_v60 = vand.u32 4294901760, %v11975_v37  ;;  %v12597_v50 = vand.u32 4294901760, %v11951_v59 }
 0xa0c   : > { %8506 = vmatprep.subr.mxu1 %v12373_v35  ;;  %6327 = vmatpush1.msra.mxu0 %v11966_v24  ;;  %v6437_v63 = vsub.f32 %v11906_v62, %v12593_v23  ;;  %v7075_v49 = vand.u32 4294901760, %v7074_v7  ;;  %v12006_v7 = vsub.f32 %v6282_v4, %v6984_v31  ;;  %v6456_v9 = vand.u32 4294901760, %v6455_v44 }
 0xa0d   : > { %9305 = vmatprep.subr.bf16.mxu0 %v11886_v15  ;;  %6380 = vmatmul.mubr.f32.vlgmr.msra.gmra.mrb[8].mxu0 %v11884_v32  ;;  %v6473_v25 = vsub.f32 %v11943_v34, %v12596_v55  ;;  %v12003_v15 = vsub.f32 %v6253_v33, %v11954_v58  ;;  %v7088_v27 = vsub.f32 %v11951_v59, %v12597_v50  ;;  %v12598_v55 = vand.u32 4294901760, %v11941_v57 }
 0xa0e   : > { %v6288_v23 = vld [vmem:[#allocation4 + $0xd0] sm:$0xff]  ;;  %9307 = vmatpush1.bf16.msra.mxu0 %v11894_v47  ;;  %6540 = vmatprep.mubr.f32.mxu0 %v12373_v35  ;;  %v9310_v47 = vpack.c.bf16 %v6432_v0, %v6420_v6  ;;  %v6438_v19 = vand.u32 4294901760, %v6437_v63  ;;  %v12019_v4 = vsub.f32 %v6252_v17, %v11966_v24  ;;  %v12599_v31 = vand.u32 4294901760, %v11930_v53 }
 0xa0f   : > { %v12008_v13 = vand.u32 4294901760, %v6288_v23  ;;  %9309 = vmatprep.subr.bf16.mxu0 %v9308_v42  ;;  %v6461_v33 = vsub.f32 %v11941_v57, %v12598_v55  ;;  %v12600_v0 = vand.u32 4294901760, %v11960_v14  ;;  %v6444_v50 = vand.u32 4294901760, %v6443_v39 }
 0xa10   : > { %v7081_v42 = vsub.f32 %v11930_v53, %v12599_v31  ;;  %v9312_v44 = vpack.c.bf16 %v6450_v51, %v6438_v19  ;;  %v6474_v55 = vand.u32 4294901760, %v6473_v25  ;;  %v6484_v17 = vand.u32 4294901760, %v12003_v15 }
 0xa11   : > { %8507 = vmatpush3.msra.mxu1 %v12008_v13  ;;  %v6479_v63 = vsub.f32 %v11960_v14, %v12600_v0  ;;  %v6467_v6 = vsub.f32 %v11975_v37, %v12365_v60  ;;  %v9400_v0 = vpack.c.bf16 %v7075_v49, %v7068_v61  ;;  %v7089_v24 = vand.u32 4294901760, %v7088_v27 }
 0xa12   : > { %9396 = vmatprep.subr.bf16.mxu1 %v12381_v29  ;;  %8509 = vmatmul.mubr.f32.vlgmr.msra.gmra.mrb[8].mxu1 %v11884_v32  ;;  %v9314_v32 = vpack.c.bf16 %v6456_v9, %v6444_v50  ;;  %v6462_v51 = vand.u32 4294901760, %v6461_v33  ;;  %v12038_v19 = vsub.f32 %v6288_v23, %v12008_v13  ;;  %v12601_v39 = vand.u32 4294901760, %v11989_v18 }
 0xa13   : > { %9398 = vmatpush3.bf16.msra.mxu1 %v11917_v40  ;;  %9311 = vmatpush1.bf16.msra.mxu0 %v9310_v47  ;;  %v6480_v25 = vand.u32 4294901760, %v6479_v63  ;;  %v6490_v47 = vand.u32 4294901760, %v12019_v4  ;;  %v7082_v60 = vand.u32 4294901760, %v7081_v42  ;;  %v6485_v9 = vsub.f32 %v12003_v15, %v6484_v17 }
 0xa14   : > { %9399 = vmatprep.subr.bf16.mxu1 %v12381_v29  ;;  %9313 = vmatprep.subr.bf16.mxu0 %v9312_v44  ;;  %v7102_v40 = vsub.f32 %v11989_v18, %v12601_v39  ;;  %v9316_v31 = vpack.c.bf16 %v6474_v55, %v6462_v51  ;;  %v12602_v61 = vand.u32 4294901760, %v12006_v7  ;;  %v6468_v49 = vand.u32 4294901760, %v6467_v6 }
 0xa15   : > { %8529 = vmatprep.mubr.msk.f32.mxu1 %vm9601_vm1, %v12373_v35  ;;  %v9403_v23 = vpack.c.bf16 %v7089_v24, %v7082_v60  ;;  %v7108_v42 = vand.u32 4294901760, %v12038_v19  ;;  %v6491_v44 = vsub.f32 %v12019_v4, %v6490_v47  ;;  %v6486_v50 = vand.u32 4294901760, %v6485_v9 }
 0xa16   : > { %v7095_v27 = vsub.f32 %v12006_v7, %v12602_v61  ;;  %v7103_v33 = vand.u32 4294901760, %v7102_v40  ;;  %v9318_v63 = vpack.c.bf16 %v6480_v25, %v6468_v49  ;;  %v9324_v51 = vpack.c.bf16 %v11830_v5, %v11820_v1 }
 0xa17   : > { %9401 = vmatpush3.bf16.msra.mxu1 %v9400_v0  ;;  %9315 = vmatpush1.bf16.msra.mxu0 %v9314_v32  ;;  %v7109_v24 = vsub.f32 %v12038_v19, %v7108_v42  ;;  %v6492_v60 = vand.u32 4294901760, %v6491_v44  ;;  %v9322_v0 = vpack.c.bf16 %v11779_v45, %v11773_v30  ;;  %v9409_v39 = vpack.c.bf16 %v11813_v8, %v11791_v22  ;;  %v12605_v44 = vld [vmem:[#allocation9_spill] sm:$0xff] }
 0xa18   : > { %9402 = vmatprep.subr.bf16.mxu1 %v12381_v29  ;;  %9317 = vmatprep.subr.bf16.mxu0 %v9316_v31  ;;  %v7096_v55 = vand.u32 4294901760, %v7095_v27  ;;  %v9320_v31 = vpack.c.bf16 %v11777_v16, %v11769_v28  ;;  %v9326_v40 = vpack.c.bf16 %v11881_v10, %v11851_v43  ;;  %v9328_v25 = vpack.c.bf16 %v11908_v54, %v11906_v62 }
 0xa19   : > { %v7110_v32 = vand.u32 4294901760, %v7109_v24  ;;  %v9412_v9 = vpack.c.bf16 %v11899_v12, %v11876_v3  ;;  %v9330_v61 = vpack.c.bf16 %v11925_v36, %v11911_v11  ;;  %v9332_v27 = vpack.c.bf16 %v11943_v34, %v11941_v57 }
 0xa1a   : > { %v9406_v6 = vpack.c.bf16 %v7103_v33, %v7096_v55  ;;  %v9415_v49 = vpack.c.bf16 %v11951_v59, %v11930_v53  ;;  %v9418_v33 = vpack.c.bf16 %v11989_v18, %v12006_v7  ;;  %v12607_v55 = vand.u32 4294901760, %v11769_v28 }
 0xa1b   : > { %9404 = vmatpush3.bf16.msra.mxu1 %v9403_v23  ;;  %9319 = vmatpush1.bf16.msra.mxu0 %v9318_v63  ;;  %v9334_v23 = vpack.c.bf16 %v11960_v14, %v11975_v37  ;;  %v12603_v63 = vld [vmem:[#allocation13_spill] sm:$0xff] }
 0xa1c   : > { %9405 = vmatprep.subr.bf16.mxu1 %v12381_v29  ;;  %6487 = vmatprep.subr.mxu0 %v6486_v50  ;;  %v12606_v50 = vld [vmem:[#allocation10_spill] sm:$0xff] }
 0xa1f   : > { %9407 = vmatpush3.bf16.msra.mxu1 %v9406_v6  ;;  %6493 = vmatpush1.msra.mxu0 %v6492_v60  ;;  %v12608_v6 = vand.u32 4294901760, %v11777_v16  ;;  %v12609_v60 = vld [vmem:[#allocation11_spill] sm:$0xff]  ;;  %v12615_v16 = vand.u32 4294901760, %v11791_v22  ;;  %v12621_v22 = vand.u32 4294901760, %v11876_v3  ;;  %v12627_v3 = vand.u32 4294901760, %v11930_v53 }
 0xa20   : > { %8527 = vmatprep.subr.mxu1 %v12373_v35  ;;  %9321 = vmatprep.subr.bf16.mxu0 %v9320_v31  ;;  %v12610_v31 = vand.u32 4294901760, %v11773_v30  ;;  %v12616_v30 = vand.u32 4294901760, %v11813_v8  ;;  %v12622_v8 = vand.u32 4294901760, %v11899_v12  ;;  %v12628_v12 = vand.u32 4294901760, %v11951_v59 }
 0xa21   : > { %6542 = vmatmul.mubr.f32.vlgmr.msra.gmra.mrb[8].mxu0 %v11775_v20  ;;  %v9352_v24 = vpack.c.bf16 %v12608_v6, %v12607_v55 }
 0xa22   : > { %9323 = vmatpush1.bf16.msra.mxu0 %v9322_v0  ;;  %6648 = vmatprep.mubr.f32.mxu0 %v12373_v35  ;;  %v12611_v0 = vand.u32 4294901760, %v11779_v45  ;;  %v12617_v45 = vand.u32 4294901760, %v11851_v43  ;;  %v9436_v43 = vpack.c.bf16 %v12622_v8, %v12621_v22  ;;  %v9439_v55 = vpack.c.bf16 %v12628_v12, %v12627_v3 }
 0xa23   : > { %8528 = vmatpush3.msra.mxu1 %v7110_v32  ;;  %9325 = vmatprep.subr.bf16.mxu0 %v9324_v51  ;;  %v12612_v51 = vld [vmem:[#allocation12_spill] sm:$0xff] }
 0xa24   : > { %9408 = vmatprep.subr.bf16.mxu1 %v12381_v29  ;;  %8530 = vmatmul.mubr.f32.vlgmr.msra.gmra.mrb[8].mxu1 %v11775_v20  ;;  %v9354_v32 = vpack.c.bf16 %v12611_v0, %v12610_v31 }
 0xa25   : > { %9410 = vmatpush3.bf16.msra.mxu1 %v9409_v39  ;;  %8550 = vmatprep.mubr.msk.f32.mxu1 %vm9601_vm1, %v12373_v35  ;;  %v12613_v39 = vand.u32 4294901760, %v11820_v1  ;;  %v12618_v1 = vand.u32 4294901760, %v11881_v10  ;;  %v12623_v10 = vand.u32 4294901760, %v11911_v11  ;;  %v12629_v11 = vand.u32 4294901760, %v11975_v37 }
 0xa26   : > { %9411 = vmatprep.subr.bf16.mxu1 %v12381_v29  ;;  %9327 = vmatpush1.bf16.msra.mxu0 %v9326_v40  ;;  %v12614_v40 = vand.u32 4294901760, %v11830_v5 }
 0xa27   : > { %9329 = vmatprep.subr.bf16.mxu0 %v9328_v25  ;;  %v9433_v25 = vpack.c.bf16 %v12616_v30, %v12615_v16  ;;  %v9358_v5 = vpack.c.bf16 %v12618_v1, %v12617_v45 }
 0xa28   : > { %v9356_v28 = vpack.c.bf16 %v12614_v40, %v12613_v39 }
 0xa29   : > { %9413 = vmatpush3.bf16.msra.mxu1 %v9412_v9  ;;  %v12619_v9 = vand.u32 4294901760, %v11906_v62 }
 0xa2a   : > { %9414 = vmatprep.subr.bf16.mxu1 %v12381_v29  ;;  %9331 = vmatpush1.bf16.msra.mxu0 %v9330_v61  ;;  %v12620_v61 = vand.u32 4294901760, %v11908_v54  ;;  %v12625_v54 = vand.u32 4294901760, %v11941_v57  ;;  %v12632_v57 = vand.u32 4294901760, %v11989_v18 }
 0xa2b   : > { %9333 = vmatprep.subr.bf16.mxu0 %v9332_v27 }
 0xa2c   : > { %v9360_v27 = vpack.c.bf16 %v12620_v61, %v12619_v9 }
 0xa2d   : > { %9416 = vmatpush3.bf16.msra.mxu1 %v9415_v49  ;;  %v12624_v49 = vand.u32 4294901760, %v11925_v36  ;;  %v12630_v36 = vand.u32 4294901760, %v11960_v14 }
 0xa2e   : > { %9417 = vmatprep.subr.bf16.mxu1 %v12381_v29  ;;  %9335 = vmatpush1.bf16.msra.mxu0 %v9334_v23  ;;  %v12626_v23 = vand.u32 4294901760, %v11943_v34  ;;  %v12631_v34 = vand.u32 4294901760, %v12006_v7 }
 0xa2f   : > { %6598 = vmatprep.subr.mxu0 %v12003_v15  ;;  %v9362_v62 = vpack.c.bf16 %v12624_v49, %v12623_v10  ;;  %v9366_v6 = vpack.c.bf16 %v12630_v36, %v12629_v11 }
 0xa31   : > { %9419 = vmatpush3.bf16.msra.mxu1 %v9418_v33  ;;  %v9364_v33 = vpack.c.bf16 %v12626_v23, %v12625_v54 }
 0xa32   : > { %8548 = vmatprep.subr.mxu1 %v12373_v35  ;;  %6601 = vmatpush1.msra.mxu0 %v12019_v4 }
 0xa33   : > { %9337 = vmatprep.subr.bf16.mxu0 %v11759_v26  ;;  %6651 = vmatmul.mubr.f32.vlgmr.msra.gmra.mrb[8].mxu0 %v11794_v38 }
 0xa34   : > { %9339 = vmatpush1.bf16.msra.mxu0 %v11761_v56  ;;  %6739 = vmatprep.mubr.f32.mxu0 %v12373_v35 }
 0xa35   : > { %8549 = vmatpush3.msra.mxu1 %v12038_v19  ;;  %9341 = vmatprep.subr.bf16.mxu0 %v11797_v52 }
 0xa36   : > { %9420 = vmatprep.subr.bf16.mxu1 %v12381_v29  ;;  %8551 = vmatmul.mubr.f32.vlgmr.msra.gmra.mrb[8].mxu1 %v11794_v38  ;;  %v12604_v38 = vld [vmem:[#allocation5_spill] sm:$0xff] }
 0xa37   : > { %9422 = vmatpush3.bf16.msra.mxu1 %v11789_v21  ;;  %8571 = vmatprep.mubr.msk.f32.mxu1 %vm9601_vm1, %v12373_v35 }
 0xa38   : > { %9423 = vmatprep.subr.bf16.mxu1 %v12381_v29  ;;  %9343 = vmatpush1.bf16.msra.mxu0 %v11801_v48 }
 0xa39   : > { %9345 = vmatprep.subr.bf16.mxu0 %v11858_v46 }
 0xa3b   : > { %9425 = vmatpush3.bf16.msra.mxu1 %v11848_v41 }
 0xa3c   : > { %9426 = vmatprep.subr.bf16.mxu1 %v12381_v29  ;;  %9347 = vmatpush1.bf16.msra.mxu0 %v11860_v2 }
 0xa3d   : > { %9349 = vmatprep.subr.bf16.mxu0 %v12603_v63 }
 0xa3f   : > { %9428 = vmatpush3.bf16.msra.mxu1 %v12604_v38 }
 0xa40   : > { %9429 = vmatprep.subr.bf16.mxu1 %v12381_v29  ;;  %9351 = vmatpush1.bf16.msra.mxu0 %v12605_v44 }
 0xa41   : > { %6690 = vmatprep.subr.mxu0 %v11954_v58 }
 0xa43   : > { %9431 = vmatpush3.bf16.msra.mxu1 %v12606_v50 }
 0xa44   : > { %8569 = vmatprep.subr.mxu1 %v12373_v35  ;;  %6692 = vmatpush1.msra.mxu0 %v12609_v60 }
 0xa45   : > { %9353 = vmatprep.subr.bf16.mxu0 %v9352_v24  ;;  %6743 = vmatmul.mubr.f32.vlgmr.msra.gmra.mrb[8].mxu0 %v12612_v51  ;;  %v9442_v24 = vpack.c.bf16 %v12632_v57, %v12631_v34 }
 0xa46   : > { %9355 = vmatpush1.bf16.msra.mxu0 %v9354_v32  ;;  %6867 = vmatprep.mubr.f32.mxu0 %v12373_v35 }
 0xa47   : > { %8570 = vmatpush3.msra.mxu1 %v12008_v13  ;;  %9357 = vmatprep.subr.bf16.mxu0 %v9356_v28 }
 0xa48   : > { %9432 = vmatprep.subr.bf16.mxu1 %v12381_v29  ;;  %8572 = vmatmul.mubr.f32.vlgmr.msra.gmra.mrb[8].mxu1 %v12612_v51 }
 0xa49   : > { %9434 = vmatpush3.bf16.msra.mxu1 %v9433_v25  ;;  %8592 = vmatprep.mubr.msk.f32.mxu1 %vm9601_vm1, %v12373_v35 }
 0xa4a   : > { %9435 = vmatprep.subr.bf16.mxu1 %v12381_v29  ;;  %9359 = vmatpush1.bf16.msra.mxu0 %v9358_v5 }
 0xa4b   : > { %9361 = vmatprep.subr.bf16.mxu0 %v9360_v27 }
 0xa4d   : > { %9437 = vmatpush3.bf16.msra.mxu1 %v9436_v43 }
 0xa4e   : > { %9438 = vmatprep.subr.bf16.mxu1 %v12381_v29  ;;  %9363 = vmatpush1.bf16.msra.mxu0 %v9362_v62 }
 0xa4f   : > { %9365 = vmatprep.subr.bf16.mxu0 %v9364_v33 }
 0xa51   : > { %9440 = vmatpush3.bf16.msra.mxu1 %v9439_v55 }
 0xa52   : > { %9441 = vmatprep.subr.bf16.mxu1 %v12381_v29  ;;  %9367 = vmatpush1.bf16.msra.mxu0 %v9366_v6 }
 0xa53   : > { %6816 = vmatprep.subr.mxu0 %v6484_v17 }
 0xa55   : > { %9443 = vmatpush3.bf16.msra.mxu1 %v9442_v24 }
 0xa56   : > { %8590 = vmatprep.subr.mxu1 %v12373_v35  ;;  %6820 = vmatpush1.msra.mxu0 %v6490_v47 }
 0xa57   : > { %9369 = vmatprep.subr.bf16.mxu0 %v11759_v26  ;;  %6869 = vmatmul.mubr.f32.vlgmr.msra.gmra.mrb[8].mxu0 %v11775_v20 }
 0xa58   : > { %9371 = vmatpush1.bf16.msra.mxu0 %v11761_v56  ;;  %6957 = vmatprep.mubr.f32.mxu0 %v12373_v35  ;;  %v12633_v56 = vld [vmem:[#allocation6_spill] sm:$0xff] }
 0xa59   : > { %8591 = vmatpush3.msra.mxu1 %v7108_v42  ;;  %9373 = vmatprep.subr.bf16.mxu0 %v11797_v52  ;;  %v12634_v52 = vld [vmem:[#allocation7_spill] sm:$0xff] }
 0xa5a   : > { %9444 = vmatprep.subr.bf16.mxu1 %v12381_v29  ;;  %8593 = vmatmul.mubr.f32.vlgmr.msra.gmra.mrb[8].mxu1 %v11775_v20 }
 0xa5b   : > { %9446 = vmatpush3.bf16.msra.mxu1 %v11789_v21  ;;  %8613 = vmatprep.mubr.msk.f32.mxu1 %vm9601_vm1, %v12373_v35 }
 0xa5c   : > { %9447 = vmatprep.subr.bf16.mxu1 %v12381_v29  ;;  %9375 = vmatpush1.bf16.msra.mxu0 %v11801_v48 }
 0xa5d   : > { %9377 = vmatprep.subr.bf16.mxu0 %v11858_v46 }
 0xa5f   : > { %9449 = vmatpush3.bf16.msra.mxu1 %v11848_v41 }
 0xa60   : > { %9450 = vmatprep.subr.bf16.mxu1 %v12381_v29  ;;  %9379 = vmatpush1.bf16.msra.mxu0 %v11860_v2  ;;  %v12635_v2 = vld [vmem:[#allocation8_spill] sm:$0xff] }
 0xa61   : > { %9381 = vmatprep.subr.bf16.mxu0 %v12603_v63 }
 0xa63   : > { %9452 = vmatpush3.bf16.msra.mxu1 %v12604_v38 }
 0xa64   : > { %9453 = vmatprep.subr.bf16.mxu1 %v12381_v29  ;;  %9383 = vmatpush1.bf16.msra.mxu0 %v12605_v44 }
 0xa65   : > { %6908 = vmatprep.subr.mxu0 %v11954_v58 }
 0xa67   : > { %9455 = vmatpush3.bf16.msra.mxu1 %v12606_v50 }
 0xa68   : > { %8611 = vmatprep.subr.mxu1 %v12373_v35  ;;  %6910 = vmatpush1.msra.mxu0 %v12609_v60 }
 0xa69   : > { %6959 = vmatmul.mubr.f32.vlgmr.msra.gmra.mrb[8].mxu0 %v11775_v20 }
 0xa6b   : > { %8612 = vmatpush3.msra.mxu1 %v12008_v13 }
 0xa6c   : > { %8614 = vmatmul.mubr.f32.vlgmr.msra.gmra.mrb[8].mxu1 %v11775_v20 }
 0xb3c   : > { %v6960_v26 = vpop.f32.mrb[8].mxu0 }
 0xb3d   : > { %v7515_v21 = vmul.f32 %v6960_v26, %v12633_v56  ;;  %v6962_v29 = vpop.f32.mrb[9].mxu0 }
 0xb3e   : > { %v7516_v48 = vmul.f32 %v6962_v29, %v12634_v52 }
 0xb3f   : > { %v7511_v41 = vpop.f32.mrb[8].mxu1  ;;  %v7525_v46 = vmul.f32 %v7515_v21, %v7515_v21 }
 0xb40   : > { %v7517_v53 = vmul.f32 %v7511_v41, %v12635_v2  ;;  %v8615_v14 = vpop.f32.mrb[9].mxu1  ;;  %v7518_v59 = vadd.f32 %v7516_v48, %v7515_v21  ;;  %v7526_v58 = vmul.f32 %v7516_v48, %v7516_v48  ;;  %7540 = vrot.lane.b32.xlu0 %v7516_v48, %s9602_s11 }
 0xb42   : > { %v7527_v13 = vmul.f32 %v7517_v53, %v7517_v53  ;;  %v7528_v37 = vadd.f32 %v7526_v58, %v7525_v46  ;;  %v7519_v20 = vsel %vm261_vm0, %v7517_v53, 0.0 }
 0xb43   : > { %v7520_v18 = vadd.f32 %v7519_v20, %v7518_v59 }
 0xb44   : > { %v7529_v15 = vsel %vm261_vm0, %v7527_v13, 0.0 }
 0xb45   : > { %v7530_v7 = vadd.f32 %v7529_v15, %v7528_v37 }
 0xb47   : > { %7531 = vadd.xlane.f32.xlu1 %v7530_v7 }
 0xb58   : > { %7542 = vrot.lane.b32.xlu1 %v7517_v53, %s9602_s11 }
 0xb5f   : > { %7521 = vadd.xlane.f32.xlu0 %v7520_v18 }
 0xb75   : > { %7538 = vrot.lane.b32.xlu0 %v7515_v21, %s9602_s11 }
 0xbb2   : > { %v7541_v17 = vpop.permute.xlu0 %7540 }
 0xbd4   : > { %v7532_v4 = vpop.xlane.xlu1 %7531 }
 0xbd5   : > { %7533 = vst.msk [vmem:[%s245_s29] sm:$0xff] %vm7523_vm14, %v7532_v4 }
 0xbd8   : > { %v7543_v19 = vpop.permute.xlu1 %7542 }
 0xbd9   : > { %v7545_v47 = vsel %vm1717_vm13, %v7541_v17, %v7543_v19 }
 0xbda   : > { %7551 = vst.msk [vmem:[%s237_s25 + $0x10] sm:$0xff] %vm1726_vm12, %v7545_v47 }
 0xbdb   : > { %7553 = vst.msk [vmem:[%s237_s25 + $0x10] sm:$0xff] %vm7552_vm15, %v12373_v35 }
 0xbec   : > { %v7522_v42 = vpop.xlane.xlu0 %7521 }
 0xbed   : > { %7524 = vst.msk [vmem:[%s241_s19] sm:$0xff] %vm7523_vm14, %v7522_v42 }
 0xbf0   : > { %v7539_v63 = vpop.permute.xlu0 %7538 }
 0xbf1   : > { %v7544_v38 = vsel %vm1717_vm13, %v7539_v63, %v7541_v17  ;;  %7549 = vst.msk [vmem:[%s237_s25] sm:$0xff] %vm1723_vm11, %v7539_v63 }
 0xbf2   : > { %7550 = vst [vmem:[%s237_s25 + $0x8] sm:$0xff] %v7544_v38 }
 0xbf3 PF: > { %s16_s18 = sadd.s32 1, %s9589_s18  }
 0xbf4   : > { %p13_p4 = scmp.ge.s32.totalorder %s16_s18, 4  }
 0xbf6   :  { %15 = sbr.rel (!%p13_p4) target bundleno = 1 (0x1), region = 90 }

</bundles_post_ra>
